<compile_context>
chip_gen: v5e
topology: v5e:2x2
jax: 0.10.0
libtpu: 0.0.40
codegen_flags: <defaults>
</compile_context>

<pallas_src>
import jax
import jax.numpy as jnp
from jax import lax
from jax.experimental import pallas as pl
from jax.experimental.pallas import tpu as pltpu


# ------------------------- collapsed parity weights ------------------------ #
def _collapse_weights(weight):
    """(Cout, Cin, 3, 3, 3) OIDHW conv weight -> (4, 12, Cin, Cout).

    For output parity rh = h_out % 2 the 3 H-taps of the conv on the
    2x-upsampled, zero-padded input collapse onto the original-resolution
    zero-padded input xz as:
        rh = 0: rows (h, h+1) of xz with weights (w0, w1 + w2)
        rh = 1: rows (h+1, h+2) of xz with weights (w0 + w1, w2)
    (identically along W).  Parity index = rh*2 + rw; tap = kt*4 + i*2 + j.
    """
    wt = jnp.transpose(weight, (2, 3, 4, 1, 0)).astype(jnp.float32)  # (kt,kh,kw,ci,co)
    m = jnp.array([[[1., 0., 0.], [0., 1., 1.]],     # parity 0: offsets {0,1}
                   [[1., 1., 0.], [0., 0., 1.]]],    # parity 1: offsets {1,2}
                  dtype=jnp.float32)                 # (parity, offset i, orig tap k)
    w_eff = jnp.einsum('aph,bqw,thwco->abtpqco', m, m, wt)   # (2,2,3,2,2,ci,co)
    c_out, c_in = weight.shape[0], weight.shape[1]
    return w_eff.reshape(4, 12, c_in, c_out)


# ----------------------------- Pallas kernel ------------------------------- #
def _upconv_kernel(x0_ref, x1_ref, x2_ref, w_ref, b_ref, o_ref, acc_ref):
    # x{0,1,2}_ref: (1, 1, 1, tH+2, W+2, Cin) -- zero-padded original-res tile,
    #               temporal taps kt = 0, 1, 2 of the edge-padded T axis.
    # w_ref:        (4, 12, Cin, Cout)  collapsed parity weights
    # b_ref:        (1, Cout)
    # o_ref:        (1, 1, tH, 2, W, 2*Cout)
    # acc_ref:      VMEM (tH*W, Cout) float32 scratch accumulator
    t_h = o_ref.shape[2]
    w_n = o_ref.shape[4]
    c_out = o_ref.shape[5] // 2
    c_in = x0_ref.shape[5]
    nrow = t_h * w_n
    taps = (x0_ref, x1_ref, x2_ref)
    bias = b_ref[...].astype(jnp.float32)            # (1, Cout) -> broadcasts

    for rh in range(2):
        for rw in range(2):
            par = rh * 2 + rw
            first = True
            for kt in range(3):
                xf = taps[kt]
                for i in range(2):
                    for j in range(2):
                        tap = kt * 4 + i * 2 + j
                        patch = xf[0, 0, 0,
                                   rh + i:rh + i + t_h,
                                   rw + j:rw + j + w_n, :]     # (tH, W, Cin)
                        lhs = patch.reshape(nrow, c_in)        # native dtype
                        contrib = jnp.dot(lhs, w_ref[par, tap],
                                          preferred_element_type=jnp.float32)
                        if first:
                            acc_ref[...] = contrib
                            first = False
                        else:
                            acc_ref[...] += contrib
            out = (acc_ref[...] + bias).astype(o_ref.dtype)
            out = out.reshape(t_h, 1, w_n, c_out)
            o_ref[0, 0, :, rh:rh + 1, :, rw * c_out:(rw + 1) * c_out] = out


def _upconv_pallas(xt, w_eff, bias2d, *, out_dtype):
    # xt: (B, T+2, nH, tH+2, W+2, Cin)
    b, t_pad, n_h, t_h_p, w_p, c_in = xt.shape
    t_out, t_h, w_n = t_pad - 2, t_h_p - 2, w_p - 2
    h_full = n_h * t_h
    c_out = w_eff.shape[-1]
    isz = jnp.dtype(out_dtype).itemsize

    def x_spec(kt):
        return pl.BlockSpec((1, 1, 1, t_h_p, w_p, c_in),
                            lambda bb, tt, mm, kt=kt: (bb, tt + kt, mm, 0, 0, 0))

    # VMEM budget: 2x(3 input tap blocks) + 2x(output block) + weights + acc.
    blk_bytes = (2 * (3 * t_h_p * w_p * c_in + t_h * 2 * w_n * 2 * c_out) * isz
                 + (4 * 12 * c_in + 1) * c_out * isz
                 + t_h * w_n * c_out * 4)
    vmem_limit = int(min(max(4 * blk_bytes, 32 * 1024 * 1024), 64 * 1024 * 1024))

    flops = 2 * 12 * c_in * c_out * b * t_out * (2 * h_full) * (2 * w_n)
    bytes_accessed = isz * (3 * b * t_out * t_h_p * w_p * c_in * n_h
                            + b * t_out * h_full * 2 * w_n * 2 * c_out
                            + 4 * 12 * c_in * c_out)

    return pl.pallas_call(
        _upconv_kernel,
        out_shape=jax.ShapeDtypeStruct((b, t_out, h_full, 2, w_n, 2 * c_out),
                                       out_dtype),
        grid=(b, t_out, n_h),
        in_specs=[
            x_spec(0), x_spec(1), x_spec(2),
            pl.BlockSpec((4, 12, c_in, c_out), lambda bb, tt, mm: (0, 0, 0, 0)),
            pl.BlockSpec((1, c_out), lambda bb, tt, mm: (0, 0)),
        ],
        out_specs=pl.BlockSpec((1, 1, t_h, 2, w_n, 2 * c_out),
                               lambda bb, tt, mm: (bb, tt, mm, 0, 0, 0)),
        scratch_shapes=[pltpu.VMEM((t_h * w_n, c_out), jnp.float32)],
        compiler_params=pltpu.CompilerParams(
            dimension_semantics=("parallel", "parallel", "parallel"),
            vmem_limit_bytes=vmem_limit),
        cost_estimate=pl.CostEstimate(flops=flops, transcendentals=0,
                                      bytes_accessed=bytes_accessed),
    )(xt, xt, xt, w_eff, bias2d)


# --------------------------------- wrapper --------------------------------- #
def _pick_tile_h(h, max_tile=8):
    # Largest divisor of H <= max_tile; default sized so blocks fit v7x's
    # 32 MiB scoped VMEM even at C~512, W~256 original resolution.
    for t in range(min(h, max_tile), 0, -1):
        if h % t == 0:
            return t
    return 1


def _finalize(y6, n):
    # y6: (B, T, H, 2, W, 2*Cout) -> NCTHW with the torch rearrange/trim.
    b, t, h, _, w, two_cout = y6.shape
    c_out = two_cout // 2
    y = y6.reshape(b, t, 2 * h, 2 * w, c_out)          # free row-major reshape
    if n == 1:
        return jnp.transpose(y, (0, 4, 1, 2, 3))
    c = c_out // n
    y = y.reshape(b, t, 2 * h, 2 * w, n, c)
    y = jnp.transpose(y, (0, 5, 1, 4, 2, 3))           # (B, c, T, n, 2H, 2W)
    y = y.reshape(b, c, t * n, 2 * h, 2 * w)
    return y[:, :, 1:]                                  # drop first frame


def upsample3d_forward(x, weight, bias, *, up_time=False, causal=False,
                       tile_h=None):
    """x: (B, C, T, H, W) NCTHW; weight: (C*n, C, 3, 3, 3) OIDHW; bias: (C*n,)."""
    n = 2 if up_time else 1
    b, c, t, h, w = x.shape
    c_out = c * n
    ori_dtype = x.dtype
    # torch casts bf16->fp16 around nearest interpolate; nearest only copies
    # values so the round-trip is numerically a no-op -- we stay in ori_dtype.

    # --- cheap XLA glue, all on the ORIGINAL (un-upsampled) resolution ------ #
    xc = jnp.transpose(x, (0, 2, 3, 4, 1))             # (B, T, H, W, C)
    if causal:
        xc = jnp.pad(xc, ((0, 0), (2, 0), (0, 0), (0, 0), (0, 0)), mode="edge")
    else:
        xc = jnp.pad(xc, ((0, 0), (1, 1), (0, 0), (0, 0), (0, 0)), mode="edge")
    xc = jnp.pad(xc, ((0, 0), (0, 0), (1, 1), (1, 1), (0, 0)))   # zero pad H/W
    xc = xc.astype(ori_dtype)

    t_h = tile_h if tile_h is not None else _pick_tile_h(h)
    assert h % t_h == 0, "tile_h must divide H"
    n_h = h // t_h
    if n_h == 1:
        xt = xc[:, :, None]                            # (B, T+2, 1, H+2, W+2, C)
    else:                                              # halo'd H tiles (small tensor)
        xt = jnp.stack(
            [lax.slice_in_dim(xc, m * t_h, m * t_h + t_h + 2, axis=2)
             for m in range(n_h)], axis=2)             # (B, T+2, nH, tH+2, W+2, C)

    w_eff = _collapse_weights(weight).astype(weight.dtype)   # (4, 12, C, Cout)
    bias2d = bias.reshape(1, c_out)

    y6 = _upconv_pallas(xt, w_eff, bias2d, out_dtype=ori_dtype)
    return _finalize(y6, n)


# ------------------------------ pure-JAX reference ------------------------- #
def _upsample_and_pad_ref(x, causal):
    x = jnp.repeat(x, 2, axis=3)
    x = jnp.repeat(x, 2, axis=4)
    x = jnp.pad(x, ((0, 0), (0, 0), (0, 0), (1, 1), (1, 1)))
    if causal:
        x = jnp.pad(x, ((0, 0), (0, 0), (2, 0), (0, 0), (0, 0)), mode="edge")
    else:
        x = jnp.pad(x, ((0, 0), (0, 0), (1, 1), (0, 0), (0, 0)), mode="edge")
    return x


def _rearrange_and_trim_ref(y, n):
    if n == 1:
        return y
    b, nc, t, h, w = y.shape
    c = nc // n
    y = y.reshape(b, n, c, t, h, w)
    y = jnp.transpose(y, (0, 2, 3, 1, 4, 5)).reshape(b, c, t * n, h, w)
    return y[:, :, 1:, :, :]


def upsample3d_reference(x, weight, bias, *, up_time=False, causal=False):
    n = 2 if up_time else 1
    xp = _upsample_and_pad_ref(x, causal)
    y = lax.conv_general_dilated(
        xp, weight, window_strides=(1, 1, 1), padding="VALID",
        dimension_numbers=("NCDHW", "OIDHW", "NCDHW"))
    y = y + bias.reshape(1, -1, 1, 1, 1)
    return _rearrange_and_trim_ref(y, n)


# ----------------------------------- main ----------------------------------- #
if __name__ == "__main__":
    B, C, T, H, W = 2, 4, 4, 8, 8

    key = jax.random.PRNGKey(0)
    x = jax.random.normal(key, (B, C, T, H, W), dtype=jnp.float32)

    def make_params(c_in, up_time, seed):
        n = 2 if up_time else 1
        c_out = c_in * n
        fan_in = c_in * 3 * 3 * 3
        bound = 1.0 / (fan_in ** 0.5)
        kw_, kb_ = jax.random.split(jax.random.PRNGKey(seed))
        weight = jax.random.uniform(kw_, (c_out, c_in, 3, 3, 3),
                                    minval=-bound, maxval=bound, dtype=jnp.float32)
        bias = jax.random.uniform(kb_, (c_out,),
                                  minval=-bound, maxval=bound, dtype=jnp.float32)
        return weight, bias

    # (up_time, causal, tile_h) -- tile_h=4 exercises the halo'd H-tile path.
    configs = [(False, False, None), (False, True, 4),
               (True, False, 4), (True, True, None)]

    ok = True
    for idx, (up_time, causal, tile_h) in enumerate(configs):
        weight, bias = make_params(C, up_time, seed=idx + 1)
        out = jax.block_until_ready(
            upsample3d_forward(x, weight, bias, up_time=up_time,
                               causal=causal, tile_h=tile_h))
        ref = jax.block_until_ready(
            upsample3d_reference(x, weight, bias, up_time=up_time, causal=causal))
        if out.shape != ref.shape or not jnp.allclose(out, ref, atol=1e-3, rtol=1e-3):
            ok = False

    if ok:
        print("KERNEL_OK")
    else:
        print("KERNEL_MISMATCH")
</pallas_src>

<mosaic_0001>
module attributes {stable_mosaic.version = 11 : i64} {
  func.func @_upconv_kernel(%arg0: i32, %arg1: i32, %arg2: i32, %arg3: memref<1x1x1x10x10x4xf32, #tpu.memory_space<vmem>>, %arg4: memref<1x1x1x10x10x4xf32, #tpu.memory_space<vmem>>, %arg5: memref<1x1x1x10x10x4xf32, #tpu.memory_space<vmem>>, %arg6: memref<4x12x4x4xf32, #tpu.memory_space<vmem>>, %arg7: memref<1x4xf32, #tpu.memory_space<vmem>>, %arg8: memref<1x1x8x2x8x8xf32, #tpu.memory_space<vmem>>, %arg9: memref<64x4xf32, #tpu.memory_space<vmem>>) attributes {dimension_semantics = [#tpu.dimension_semantics<parallel>, #tpu.dimension_semantics<parallel>, #tpu.dimension_semantics<parallel>], iteration_bounds = array<i64: 2, 4, 1>, scalar_prefetch = 0 : i64, scratch_operands = 1 : i64, tpu.core_type = #tpu.core_type<tc>, window_params = [{transform_indices = @transform_0, window_bounds = array<i64: 1, 1, 1, 10, 10, 4>}, {transform_indices = @transform_1, window_bounds = array<i64: 1, 1, 1, 10, 10, 4>}, {transform_indices = @transform_2, window_bounds = array<i64: 1, 1, 1, 10, 10, 4>}, {pipeline_mode = #tpu.pipeline_mode<synchronous>, transform_indices = @transform_3, window_bounds = array<i64: 4, 12, 4, 4>}, {pipeline_mode = #tpu.pipeline_mode<synchronous>, transform_indices = @transform_4, window_bounds = array<i64: 1, 4>}, {transform_indices = @transform_5, window_bounds = array<i64: 1, 1, 8, 2, 8, 8>}]} {
    %c0 = arith.constant 0 : index
    %c0_0 = arith.constant 0 : index
    %0 = vector.load %arg7[%c0, %c0_0] : memref<1x4xf32, #tpu.memory_space<vmem>>, vector<1x4xf32>
    %c0_1 = arith.constant 0 : index
    %c0_2 = arith.constant 0 : index
    %c0_3 = arith.constant 0 : index
    %c0_4 = arith.constant 0 : index
    %c0_5 = arith.constant 0 : index
    %c0_6 = arith.constant 0 : index
    %1 = vector.load %arg3[%c0_1, %c0_2, %c0_3, %c0_4, %c0_5, %c0_6] : memref<1x1x1x10x10x4xf32, #tpu.memory_space<vmem>>, vector<1x1x1x8x8x4xf32>
    %2 = vector.shape_cast %1 : vector<1x1x1x8x8x4xf32> to vector<8x8x4xf32>
    %3 = vector.shape_cast %2 : vector<8x8x4xf32> to vector<64x4xf32>
    %c0_7 = arith.constant 0 : index
    %c0_8 = arith.constant 0 : index
    %c0_9 = arith.constant 0 : index
    %c0_10 = arith.constant 0 : index
    %4 = vector.load %arg6[%c0_7, %c0_8, %c0_9, %c0_10] : memref<4x12x4x4xf32, #tpu.memory_space<vmem>>, vector<1x1x4x4xf32>
    %5 = vector.shape_cast %4 : vector<1x1x4x4xf32> to vector<4x4xf32>
    %cst = arith.constant dense<0.000000e+00> : vector<64x4xf32>
    %6 = tpu.matmul %3, %5, %cst {dimension_numbers = #tpu.dot_dimension_numbers<[1], [0], [0], [1], [0, 0, 1, 1], [], []>} : vector<64x4xf32>, vector<4x4xf32>, vector<64x4xf32> -> vector<64x4xf32>
    %c0_11 = arith.constant 0 : index
    %c0_12 = arith.constant 0 : index
    %7 = vector.load %arg9[%c0_11, %c0_12] : memref<64x4xf32, #tpu.memory_space<vmem>>, vector<64x4xf32>
    tpu.vector_store %arg9[%c0_11, %c0_12], %6 {strides = array<i32>} : memref<64x4xf32, #tpu.memory_space<vmem>>, vector<64x4xf32>,
    %c0_13 = arith.constant 0 : index
    %c0_14 = arith.constant 0 : index
    %c0_15 = arith.constant 0 : index
    %c0_16 = arith.constant 0 : index
    %c1 = arith.constant 1 : index
    %c0_17 = arith.constant 0 : index
    %8 = vector.load %arg3[%c0_13, %c0_14, %c0_15, %c0_16, %c1, %c0_17] : memref<1x1x1x10x10x4xf32, #tpu.memory_space<vmem>>, vector<1x1x1x8x8x4xf32>
    %9 = vector.shape_cast %8 : vector<1x1x1x8x8x4xf32> to vector<8x8x4xf32>
    %10 = vector.shape_cast %9 : vector<8x8x4xf32> to vector<64x4xf32>
    %c0_18 = arith.constant 0 : index
    %c1_19 = arith.constant 1 : index
    %c0_20 = arith.constant 0 : index
    %c0_21 = arith.constant 0 : index
    %11 = vector.load %arg6[%c0_18, %c1_19, %c0_20, %c0_21] : memref<4x12x4x4xf32, #tpu.memory_space<vmem>>, vector<1x1x4x4xf32>
    %12 = vector.shape_cast %11 : vector<1x1x4x4xf32> to vector<4x4xf32>
    %cst_22 = arith.constant dense<0.000000e+00> : vector<64x4xf32>
    %13 = tpu.matmul %10, %12, %cst_22 {dimension_numbers = #tpu.dot_dimension_numbers<[1], [0], [0], [1], [0, 0, 1, 1], [], []>} : vector<64x4xf32>, vector<4x4xf32>, vector<64x4xf32> -> vector<64x4xf32>
    %c0_23 = arith.constant 0 : index
    %c0_24 = arith.constant 0 : index
    %14 = vector.load %arg9[%c0_23, %c0_24] : memref<64x4xf32, #tpu.memory_space<vmem>>, vector<64x4xf32>
    %15 = arith.addf %14, %13 : vector<64x4xf32>
    %c0_25 = arith.constant 0 : index
    %c0_26 = arith.constant 0 : index
    %16 = vector.load %arg9[%c0_25, %c0_26] : memref<64x4xf32, #tpu.memory_space<vmem>>, vector<64x4xf32>
    tpu.vector_store %arg9[%c0_25, %c0_26], %15 {strides = array<i32>} : memref<64x4xf32, #tpu.memory_space<vmem>>, vector<64x4xf32>,
    %c0_27 = arith.constant 0 : index
    %c0_28 = arith.constant 0 : index
    %c0_29 = arith.constant 0 : index
    %c1_30 = arith.constant 1 : index
    %c0_31 = arith.constant 0 : index
    %c0_32 = arith.constant 0 : index
    %17 = vector.load %arg3[%c0_27, %c0_28, %c0_29, %c1_30, %c0_31, %c0_32] : memref<1x1x1x10x10x4xf32, #tpu.memory_space<vmem>>, vector<1x1x1x8x8x4xf32>
    %18 = vector.shape_cast %17 : vector<1x1x1x8x8x4xf32> to vector<8x8x4xf32>
    %19 = vector.shape_cast %18 : vector<8x8x4xf32> to vector<64x4xf32>
    %c0_33 = arith.constant 0 : index
    %c2 = arith.constant 2 : index
    %c0_34 = arith.constant 0 : index
    %c0_35 = arith.constant 0 : index
    %20 = vector.load %arg6[%c0_33, %c2, %c0_34, %c0_35] : memref<4x12x4x4xf32, #tpu.memory_space<vmem>>, vector<1x1x4x4xf32>
    %21 = vector.shape_cast %20 : vector<1x1x4x4xf32> to vector<4x4xf32>
    %cst_36 = arith.constant dense<0.000000e+00> : vector<64x4xf32>
    %22 = tpu.matmul %19, %21, %cst_36 {dimension_numbers = #tpu.dot_dimension_numbers<[1], [0], [0], [1], [0, 0, 1, 1], [], []>} : vector<64x4xf32>, vector<4x4xf32>, vector<64x4xf32> -> vector<64x4xf32>
    %c0_37 = arith.constant 0 : index
    %c0_38 = arith.constant 0 : index
    %23 = vector.load %arg9[%c0_37, %c0_38] : memref<64x4xf32, #tpu.memory_space<vmem>>, vector<64x4xf32>
    %24 = arith.addf %23, %22 : vector<64x4xf32>
    %c0_39 = arith.constant 0 : index
    %c0_40 = arith.constant 0 : index
    %25 = vector.load %arg9[%c0_39, %c0_40] : memref<64x4xf32, #tpu.memory_space<vmem>>, vector<64x4xf32>
    tpu.vector_store %arg9[%c0_39, %c0_40], %24 {strides = array<i32>} : memref<64x4xf32, #tpu.memory_space<vmem>>, vector<64x4xf32>,
    %c0_41 = arith.constant 0 : index
    %c0_42 = arith.constant 0 : index
    %c0_43 = arith.constant 0 : index
    %c1_44 = arith.constant 1 : index
    %c1_45 = arith.constant 1 : index
    %c0_46 = arith.constant 0 : index
    %26 = vector.load %arg3[%c0_41, %c0_42, %c0_43, %c1_44, %c1_45, %c0_46] : memref<1x1x1x10x10x4xf32, #tpu.memory_space<vmem>>, vector<1x1x1x8x8x4xf32>
    %27 = vector.shape_cast %26 : vector<1x1x1x8x8x4xf32> to vector<8x8x4xf32>
    %28 = vector.shape_cast %27 : vector<8x8x4xf32> to vector<64x4xf32>
    %c0_47 = arith.constant 0 : index
    %c3 = arith.constant 3 : index
    %c0_48 = arith.constant 0 : index
    %c0_49 = arith.constant 0 : index
    %29 = vector.load %arg6[%c0_47, %c3, %c0_48, %c0_49] : memref<4x12x4x4xf32, #tpu.memory_space<vmem>>, vector<1x1x4x4xf32>
    %30 = vector.shape_cast %29 : vector<1x1x4x4xf32> to vector<4x4xf32>
    %cst_50 = arith.constant dense<0.000000e+00> : vector<64x4xf32>
    %31 = tpu.matmul %28, %30, %cst_50 {dimension_numbers = #tpu.dot_dimension_numbers<[1], [0], [0], [1], [0, 0, 1, 1], [], []>} : vector<64x4xf32>, vector<4x4xf32>, vector<64x4xf32> -> vector<64x4xf32>
    %c0_51 = arith.constant 0 : index
    %c0_52 = arith.constant 0 : index
    %32 = vector.load %arg9[%c0_51, %c0_52] : memref<64x4xf32, #tpu.memory_space<vmem>>, vector<64x4xf32>
    %33 = arith.addf %32, %31 : vector<64x4xf32>
    %c0_53 = arith.constant 0 : index
    %c0_54 = arith.constant 0 : index
    %34 = vector.load %arg9[%c0_53, %c0_54] : memref<64x4xf32, #tpu.memory_space<vmem>>, vector<64x4xf32>
    tpu.vector_store %arg9[%c0_53, %c0_54], %33 {strides = array<i32>} : memref<64x4xf32, #tpu.memory_space<vmem>>, vector<64x4xf32>,
    %c0_55 = arith.constant 0 : index
    %c0_56 = arith.constant 0 : index
    %c0_57 = arith.constant 0 : index
    %c0_58 = arith.constant 0 : index
    %c0_59 = arith.constant 0 : index
    %c0_60 = arith.constant 0 : index
    %35 = vector.load %arg4[%c0_55, %c0_56, %c0_57, %c0_58, %c0_59, %c0_60] : memref<1x1x1x10x10x4xf32, #tpu.memory_space<vmem>>, vector<1x1x1x8x8x4xf32>
    %36 = vector.shape_cast %35 : vector<1x1x1x8x8x4xf32> to vector<8x8x4xf32>
    %37 = vector.shape_cast %36 : vector<8x8x4xf32> to vector<64x4xf32>
    %c0_61 = arith.constant 0 : index
    %c4 = arith.constant 4 : index
    %c0_62 = arith.constant 0 : index
    %c0_63 = arith.constant 0 : index
    %38 = vector.load %arg6[%c0_61, %c4, %c0_62, %c0_63] : memref<4x12x4x4xf32, #tpu.memory_space<vmem>>, vector<1x1x4x4xf32>
    %39 = vector.shape_cast %38 : vector<1x1x4x4xf32> to vector<4x4xf32>
    %cst_64 = arith.constant dense<0.000000e+00> : vector<64x4xf32>
    %40 = tpu.matmul %37, %39, %cst_64 {dimension_numbers = #tpu.dot_dimension_numbers<[1], [0], [0], [1], [0, 0, 1, 1], [], []>} : vector<64x4xf32>, vector<4x4xf32>, vector<64x4xf32> -> vector<64x4xf32>
    %c0_65 = arith.constant 0 : index
    %c0_66 = arith.constant 0 : index
    %41 = vector.load %arg9[%c0_65, %c0_66] : memref<64x4xf32, #tpu.memory_space<vmem>>, vector<64x4xf32>
    %42 = arith.addf %41, %40 : vector<64x4xf32>
    %c0_67 = arith.constant 0 : index
    %c0_68 = arith.constant 0 : index
    %43 = vector.load %arg9[%c0_67, %c0_68] : memref<64x4xf32, #tpu.memory_space<vmem>>, vector<64x4xf32>
    tpu.vector_store %arg9[%c0_67, %c0_68], %42 {strides = array<i32>} : memref<64x4xf32, #tpu.memory_space<vmem>>, vector<64x4xf32>,
    %c0_69 = arith.constant 0 : index
    %c0_70 = arith.constant 0 : index
    %c0_71 = arith.constant 0 : index
    %c0_72 = arith.constant 0 : index
    %c1_73 = arith.constant 1 : index
    %c0_74 = arith.constant 0 : index
    %44 = vector.load %arg4[%c0_69, %c0_70, %c0_71, %c0_72, %c1_73, %c0_74] : memref<1x1x1x10x10x4xf32, #tpu.memory_space<vmem>>, vector<1x1x1x8x8x4xf32>
    %45 = vector.shape_cast %44 : vector<1x1x1x8x8x4xf32> to vector<8x8x4xf32>
    %46 = vector.shape_cast %45 : vector<8x8x4xf32> to vector<64x4xf32>
    %c0_75 = arith.constant 0 : index
    %c5 = arith.constant 5 : index
    %c0_76 = arith.constant 0 : index
    %c0_77 = arith.constant 0 : index
    %47 = vector.load %arg6[%c0_75, %c5, %c0_76, %c0_77] : memref<4x12x4x4xf32, #tpu.memory_space<vmem>>, vector<1x1x4x4xf32>
    %48 = vector.shape_cast %47 : vector<1x1x4x4xf32> to vector<4x4xf32>
    %cst_78 = arith.constant dense<0.000000e+00> : vector<64x4xf32>
    %49 = tpu.matmul %46, %48, %cst_78 {dimension_numbers = #tpu.dot_dimension_numbers<[1], [0], [0], [1], [0, 0, 1, 1], [], []>} : vector<64x4xf32>, vector<4x4xf32>, vector<64x4xf32> -> vector<64x4xf32>
    %c0_79 = arith.constant 0 : index
    %c0_80 = arith.constant 0 : index
    %50 = vector.load %arg9[%c0_79, %c0_80] : memref<64x4xf32, #tpu.memory_space<vmem>>, vector<64x4xf32>
    %51 = arith.addf %50, %49 : vector<64x4xf32>
    %c0_81 = arith.constant 0 : index
    %c0_82 = arith.constant 0 : index
    %52 = vector.load %arg9[%c0_81, %c0_82] : memref<64x4xf32, #tpu.memory_space<vmem>>, vector<64x4xf32>
    tpu.vector_store %arg9[%c0_81, %c0_82], %51 {strides = array<i32>} : memref<64x4xf32, #tpu.memory_space<vmem>>, vector<64x4xf32>,
    %c0_83 = arith.constant 0 : index
    %c0_84 = arith.constant 0 : index
    %c0_85 = arith.constant 0 : index
    %c1_86 = arith.constant 1 : index
    %c0_87 = arith.constant 0 : index
    %c0_88 = arith.constant 0 : index
    %53 = vector.load %arg4[%c0_83, %c0_84, %c0_85, %c1_86, %c0_87, %c0_88] : memref<1x1x1x10x10x4xf32, #tpu.memory_space<vmem>>, vector<1x1x1x8x8x4xf32>
    %54 = vector.shape_cast %53 : vector<1x1x1x8x8x4xf32> to vector<8x8x4xf32>
    %55 = vector.shape_cast %54 : vector<8x8x4xf32> to vector<64x4xf32>
    %c0_89 = arith.constant 0 : index
    %c6 = arith.constant 6 : index
    %c0_90 = arith.constant 0 : index
    %c0_91 = arith.constant 0 : index
    %56 = vector.load %arg6[%c0_89, %c6, %c0_90, %c0_91] : memref<4x12x4x4xf32, #tpu.memory_space<vmem>>, vector<1x1x4x4xf32>
    %57 = vector.shape_cast %56 : vector<1x1x4x4xf32> to vector<4x4xf32>
    %cst_92 = arith.constant dense<0.000000e+00> : vector<64x4xf32>
    %58 = tpu.matmul %55, %57, %cst_92 {dimension_numbers = #tpu.dot_dimension_numbers<[1], [0], [0], [1], [0, 0, 1, 1], [], []>} : vector<64x4xf32>, vector<4x4xf32>, vector<64x4xf32> -> vector<64x4xf32>
    %c0_93 = arith.constant 0 : index
    %c0_94 = arith.constant 0 : index
    %59 = vector.load %arg9[%c0_93, %c0_94] : memref<64x4xf32, #tpu.memory_space<vmem>>, vector<64x4xf32>
    %60 = arith.addf %59, %58 : vector<64x4xf32>
    %c0_95 = arith.constant 0 : index
    %c0_96 = arith.constant 0 : index
    %61 = vector.load %arg9[%c0_95, %c0_96] : memref<64x4xf32, #tpu.memory_space<vmem>>, vector<64x4xf32>
    tpu.vector_store %arg9[%c0_95, %c0_96], %60 {strides = array<i32>} : memref<64x4xf32, #tpu.memory_space<vmem>>, vector<64x4xf32>,
    %c0_97 = arith.constant 0 : index
    %c0_98 = arith.constant 0 : index
    %c0_99 = arith.constant 0 : index
    %c1_100 = arith.constant 1 : index
    %c1_101 = arith.constant 1 : index
    %c0_102 = arith.constant 0 : index
    %62 = vector.load %arg4[%c0_97, %c0_98, %c0_99, %c1_100, %c1_101, %c0_102] : memref<1x1x1x10x10x4xf32, #tpu.memory_space<vmem>>, vector<1x1x1x8x8x4xf32>
    %63 = vector.shape_cast %62 : vector<1x1x1x8x8x4xf32> to vector<8x8x4xf32>
    %64 = vector.shape_cast %63 : vector<8x8x4xf32> to vector<64x4xf32>
    %c0_103 = arith.constant 0 : index
    %c7 = arith.constant 7 : index
    %c0_104 = arith.constant 0 : index
    %c0_105 = arith.constant 0 : index
    %65 = vector.load %arg6[%c0_103, %c7, %c0_104, %c0_105] : memref<4x12x4x4xf32, #tpu.memory_space<vmem>>, vector<1x1x4x4xf32>
    %66 = vector.shape_cast %65 : vector<1x1x4x4xf32> to vector<4x4xf32>
    %cst_106 = arith.constant dense<0.000000e+00> : vector<64x4xf32>
    %67 = tpu.matmul %64, %66, %cst_106 {dimension_numbers = #tpu.dot_dimension_numbers<[1], [0], [0], [1], [0, 0, 1, 1], [], []>} : vector<64x4xf32>, vector<4x4xf32>, vector<64x4xf32> -> vector<64x4xf32>
    %c0_107 = arith.constant 0 : index
    %c0_108 = arith.constant 0 : index
    %68 = vector.load %arg9[%c0_107, %c0_108] : memref<64x4xf32, #tpu.memory_space<vmem>>, vector<64x4xf32>
    %69 = arith.addf %68, %67 : vector<64x4xf32>
    %c0_109 = arith.constant 0 : index
    %c0_110 = arith.constant 0 : index
    %70 = vector.load %arg9[%c0_109, %c0_110] : memref<64x4xf32, #tpu.memory_space<vmem>>, vector<64x4xf32>
    tpu.vector_store %arg9[%c0_109, %c0_110], %69 {strides = array<i32>} : memref<64x4xf32, #tpu.memory_space<vmem>>, vector<64x4xf32>,
    %c0_111 = arith.constant 0 : index
    %c0_112 = arith.constant 0 : index
    %c0_113 = arith.constant 0 : index
    %c0_114 = arith.constant 0 : index
    %c0_115 = arith.constant 0 : index
    %c0_116 = arith.constant 0 : index
    %71 = vector.load %arg5[%c0_111, %c0_112, %c0_113, %c0_114, %c0_115, %c0_116] : memref<1x1x1x10x10x4xf32, #tpu.memory_space<vmem>>, vector<1x1x1x8x8x4xf32>
    %72 = vector.shape_cast %71 : vector<1x1x1x8x8x4xf32> to vector<8x8x4xf32>
    %73 = vector.shape_cast %72 : vector<8x8x4xf32> to vector<64x4xf32>
    %c0_117 = arith.constant 0 : index
    %c8 = arith.constant 8 : index
    %c0_118 = arith.constant 0 : index
    %c0_119 = arith.constant 0 : index
    %74 = vector.load %arg6[%c0_117, %c8, %c0_118, %c0_119] : memref<4x12x4x4xf32, #tpu.memory_space<vmem>>, vector<1x1x4x4xf32>
    %75 = vector.shape_cast %74 : vector<1x1x4x4xf32> to vector<4x4xf32>
    %cst_120 = arith.constant dense<0.000000e+00> : vector<64x4xf32>
    %76 = tpu.matmul %73, %75, %cst_120 {dimension_numbers = #tpu.dot_dimension_numbers<[1], [0], [0], [1], [0, 0, 1, 1], [], []>} : vector<64x4xf32>, vector<4x4xf32>, vector<64x4xf32> -> vector<64x4xf32>
    %c0_121 = arith.constant 0 : index
    %c0_122 = arith.constant 0 : index
    %77 = vector.load %arg9[%c0_121, %c0_122] : memref<64x4xf32, #tpu.memory_space<vmem>>, vector<64x4xf32>
    %78 = arith.addf %77, %76 : vector<64x4xf32>
    %c0_123 = arith.constant 0 : index
    %c0_124 = arith.constant 0 : index
    %79 = vector.load %arg9[%c0_123, %c0_124] : memref<64x4xf32, #tpu.memory_space<vmem>>, vector<64x4xf32>
    tpu.vector_store %arg9[%c0_123, %c0_124], %78 {strides = array<i32>} : memref<64x4xf32, #tpu.memory_space<vmem>>, vector<64x4xf32>,
    %c0_125 = arith.constant 0 : index
    %c0_126 = arith.constant 0 : index
    %c0_127 = arith.constant 0 : index
    %c0_128 = arith.constant 0 : index
    %c1_129 = arith.constant 1 : index
    %c0_130 = arith.constant 0 : index
    %80 = vector.load %arg5[%c0_125, %c0_126, %c0_127, %c0_128, %c1_129, %c0_130] : memref<1x1x1x10x10x4xf32, #tpu.memory_space<vmem>>, vector<1x1x1x8x8x4xf32>
    %81 = vector.shape_cast %80 : vector<1x1x1x8x8x4xf32> to vector<8x8x4xf32>
    %82 = vector.shape_cast %81 : vector<8x8x4xf32> to vector<64x4xf32>
    %c0_131 = arith.constant 0 : index
    %c9 = arith.constant 9 : index
    %c0_132 = arith.constant 0 : index
    %c0_133 = arith.constant 0 : index
    %83 = vector.load %arg6[%c0_131, %c9, %c0_132, %c0_133] : memref<4x12x4x4xf32, #tpu.memory_space<vmem>>, vector<1x1x4x4xf32>
    %84 = vector.shape_cast %83 : vector<1x1x4x4xf32> to vector<4x4xf32>
    %cst_134 = arith.constant dense<0.000000e+00> : vector<64x4xf32>
    %85 = tpu.matmul %82, %84, %cst_134 {dimension_numbers = #tpu.dot_dimension_numbers<[1], [0], [0], [1], [0, 0, 1, 1], [], []>} : vector<64x4xf32>, vector<4x4xf32>, vector<64x4xf32> -> vector<64x4xf32>
    %c0_135 = arith.constant 0 : index
    %c0_136 = arith.constant 0 : index
    %86 = vector.load %arg9[%c0_135, %c0_136] : memref<64x4xf32, #tpu.memory_space<vmem>>, vector<64x4xf32>
    %87 = arith.addf %86, %85 : vector<64x4xf32>
    %c0_137 = arith.constant 0 : index
    %c0_138 = arith.constant 0 : index
    %88 = vector.load %arg9[%c0_137, %c0_138] : memref<64x4xf32, #tpu.memory_space<vmem>>, vector<64x4xf32>
    tpu.vector_store %arg9[%c0_137, %c0_138], %87 {strides = array<i32>} : memref<64x4xf32, #tpu.memory_space<vmem>>, vector<64x4xf32>,
    %c0_139 = arith.constant 0 : index
    %c0_140 = arith.constant 0 : index
    %c0_141 = arith.constant 0 : index
    %c1_142 = arith.constant 1 : index
    %c0_143 = arith.constant 0 : index
    %c0_144 = arith.constant 0 : index
    %89 = vector.load %arg5[%c0_139, %c0_140, %c0_141, %c1_142, %c0_143, %c0_144] : memref<1x1x1x10x10x4xf32, #tpu.memory_space<vmem>>, vector<1x1x1x8x8x4xf32>
    %90 = vector.shape_cast %89 : vector<1x1x1x8x8x4xf32> to vector<8x8x4xf32>
    %91 = vector.shape_cast %90 : vector<8x8x4xf32> to vector<64x4xf32>
    %c0_145 = arith.constant 0 : index
    %c10 = arith.constant 10 : index
    %c0_146 = arith.constant 0 : index
    %c0_147 = arith.constant 0 : index
    %92 = vector.load %arg6[%c0_145, %c10, %c0_146, %c0_147] : memref<4x12x4x4xf32, #tpu.memory_space<vmem>>, vector<1x1x4x4xf32>
    %93 = vector.shape_cast %92 : vector<1x1x4x4xf32> to vector<4x4xf32>
    %cst_148 = arith.constant dense<0.000000e+00> : vector<64x4xf32>
    %94 = tpu.matmul %91, %93, %cst_148 {dimension_numbers = #tpu.dot_dimension_numbers<[1], [0], [0], [1], [0, 0, 1, 1], [], []>} : vector<64x4xf32>, vector<4x4xf32>, vector<64x4xf32> -> vector<64x4xf32>
    %c0_149 = arith.constant 0 : index
    %c0_150 = arith.constant 0 : index
    %95 = vector.load %arg9[%c0_149, %c0_150] : memref<64x4xf32, #tpu.memory_space<vmem>>, vector<64x4xf32>
    %96 = arith.addf %95, %94 : vector<64x4xf32>
    %c0_151 = arith.constant 0 : index
    %c0_152 = arith.constant 0 : index
    %97 = vector.load %arg9[%c0_151, %c0_152] : memref<64x4xf32, #tpu.memory_space<vmem>>, vector<64x4xf32>
    tpu.vector_store %arg9[%c0_151, %c0_152], %96 {strides = array<i32>} : memref<64x4xf32, #tpu.memory_space<vmem>>, vector<64x4xf32>,
    %c0_153 = arith.constant 0 : index
    %c0_154 = arith.constant 0 : index
    %c0_155 = arith.constant 0 : index
    %c1_156 = arith.constant 1 : index
    %c1_157 = arith.constant 1 : index
    %c0_158 = arith.constant 0 : index
    %98 = vector.load %arg5[%c0_153, %c0_154, %c0_155, %c1_156, %c1_157, %c0_158] : memref<1x1x1x10x10x4xf32, #tpu.memory_space<vmem>>, vector<1x1x1x8x8x4xf32>
    %99 = vector.shape_cast %98 : vector<1x1x1x8x8x4xf32> to vector<8x8x4xf32>
    %100 = vector.shape_cast %99 : vector<8x8x4xf32> to vector<64x4xf32>
    %c0_159 = arith.constant 0 : index
    %c11 = arith.constant 11 : index
    %c0_160 = arith.constant 0 : index
    %c0_161 = arith.constant 0 : index
    %101 = vector.load %arg6[%c0_159, %c11, %c0_160, %c0_161] : memref<4x12x4x4xf32, #tpu.memory_space<vmem>>, vector<1x1x4x4xf32>
    %102 = vector.shape_cast %101 : vector<1x1x4x4xf32> to vector<4x4xf32>
    %cst_162 = arith.constant dense<0.000000e+00> : vector<64x4xf32>
    %103 = tpu.matmul %100, %102, %cst_162 {dimension_numbers = #tpu.dot_dimension_numbers<[1], [0], [0], [1], [0, 0, 1, 1], [], []>} : vector<64x4xf32>, vector<4x4xf32>, vector<64x4xf32> -> vector<64x4xf32>
    %c0_163 = arith.constant 0 : index
    %c0_164 = arith.constant 0 : index
    %104 = vector.load %arg9[%c0_163, %c0_164] : memref<64x4xf32, #tpu.memory_space<vmem>>, vector<64x4xf32>
    %105 = arith.addf %104, %103 : vector<64x4xf32>
    %c0_165 = arith.constant 0 : index
    %c0_166 = arith.constant 0 : index
    %106 = vector.load %arg9[%c0_165, %c0_166] : memref<64x4xf32, #tpu.memory_space<vmem>>, vector<64x4xf32>
    tpu.vector_store %arg9[%c0_165, %c0_166], %105 {strides = array<i32>} : memref<64x4xf32, #tpu.memory_space<vmem>>, vector<64x4xf32>,
    %c0_167 = arith.constant 0 : index
    %c0_168 = arith.constant 0 : index
    %107 = vector.load %arg9[%c0_167, %c0_168] : memref<64x4xf32, #tpu.memory_space<vmem>>, vector<64x4xf32>
    %108 = vector.broadcast %0 : vector<1x4xf32> to vector<64x4xf32>
    %109 = arith.addf %107, %108 : vector<64x4xf32>
    %110 = vector.shape_cast %109 : vector<64x4xf32> to vector<8x1x8x4xf32>
    %c0_169 = arith.constant 0 : index
    %c0_170 = arith.constant 0 : index
    %c0_171 = arith.constant 0 : index
    %c0_172 = arith.constant 0 : index
    %c0_173 = arith.constant 0 : index
    %c0_174 = arith.constant 0 : index
    %111 = vector.load %arg8[%c0_169, %c0_170, %c0_171, %c0_172, %c0_173, %c0_174] : memref<1x1x8x2x8x8xf32, #tpu.memory_space<vmem>>, vector<1x1x8x1x8x4xf32>
    %112 = vector.shape_cast %111 : vector<1x1x8x1x8x4xf32> to vector<8x1x8x4xf32>
    %113 = vector.shape_cast %110 : vector<8x1x8x4xf32> to vector<1x1x8x1x8x4xf32>
    tpu.vector_store %arg8[%c0_169, %c0_170, %c0_171, %c0_172, %c0_173, %c0_174], %113 {strides = array<i32>} : memref<1x1x8x2x8x8xf32, #tpu.memory_space<vmem>>, vector<1x1x8x1x8x4xf32>,
    %c0_175 = arith.constant 0 : index
    %c0_176 = arith.constant 0 : index
    %c0_177 = arith.constant 0 : index
    %c0_178 = arith.constant 0 : index
    %c1_179 = arith.constant 1 : index
    %c0_180 = arith.constant 0 : index
    %114 = vector.load %arg3[%c0_175, %c0_176, %c0_177, %c0_178, %c1_179, %c0_180] : memref<1x1x1x10x10x4xf32, #tpu.memory_space<vmem>>, vector<1x1x1x8x8x4xf32>
    %115 = vector.shape_cast %114 : vector<1x1x1x8x8x4xf32> to vector<8x8x4xf32>
    %116 = vector.shape_cast %115 : vector<8x8x4xf32> to vector<64x4xf32>
    %c1_181 = arith.constant 1 : index
    %c0_182 = arith.constant 0 : index
    %c0_183 = arith.constant 0 : index
    %c0_184 = arith.constant 0 : index
    %117 = vector.load %arg6[%c1_181, %c0_182, %c0_183, %c0_184] : memref<4x12x4x4xf32, #tpu.memory_space<vmem>>, vector<1x1x4x4xf32>
    %118 = vector.shape_cast %117 : vector<1x1x4x4xf32> to vector<4x4xf32>
    %cst_185 = arith.constant dense<0.000000e+00> : vector<64x4xf32>
    %119 = tpu.matmul %116, %118, %cst_185 {dimension_numbers = #tpu.dot_dimension_numbers<[1], [0], [0], [1], [0, 0, 1, 1], [], []>} : vector<64x4xf32>, vector<4x4xf32>, vector<64x4xf32> -> vector<64x4xf32>
    %c0_186 = arith.constant 0 : index
    %c0_187 = arith.constant 0 : index
    %120 = vector.load %arg9[%c0_186, %c0_187] : memref<64x4xf32, #tpu.memory_space<vmem>>, vector<64x4xf32>
    tpu.vector_store %arg9[%c0_186, %c0_187], %119 {strides = array<i32>} : memref<64x4xf32, #tpu.memory_space<vmem>>, vector<64x4xf32>,
    %c0_188 = arith.constant 0 : index
    %c0_189 = arith.constant 0 : index
    %c0_190 = arith.constant 0 : index
    %c0_191 = arith.constant 0 : index
    %c2_192 = arith.constant 2 : index
    %c0_193 = arith.constant 0 : index
    %121 = vector.load %arg3[%c0_188, %c0_189, %c0_190, %c0_191, %c2_192, %c0_193] : memref<1x1x1x10x10x4xf32, #tpu.memory_space<vmem>>, vector<1x1x1x8x8x4xf32>
    %122 = vector.shape_cast %121 : vector<1x1x1x8x8x4xf32> to vector<8x8x4xf32>
    %123 = vector.shape_cast %122 : vector<8x8x4xf32> to vector<64x4xf32>
    %c1_194 = arith.constant 1 : index
    %c1_195 = arith.constant 1 : index
    %c0_196 = arith.constant 0 : index
    %c0_197 = arith.constant 0 : index
    %124 = vector.load %arg6[%c1_194, %c1_195, %c0_196, %c0_197] : memref<4x12x4x4xf32, #tpu.memory_space<vmem>>, vector<1x1x4x4xf32>
    %125 = vector.shape_cast %124 : vector<1x1x4x4xf32> to vector<4x4xf32>
    %cst_198 = arith.constant dense<0.000000e+00> : vector<64x4xf32>
    %126 = tpu.matmul %123, %125, %cst_198 {dimension_numbers = #tpu.dot_dimension_numbers<[1], [0], [0], [1], [0, 0, 1, 1], [], []>} : vector<64x4xf32>, vector<4x4xf32>, vector<64x4xf32> -> vector<64x4xf32>
    %c0_199 = arith.constant 0 : index
    %c0_200 = arith.constant 0 : index
    %127 = vector.load %arg9[%c0_199, %c0_200] : memref<64x4xf32, #tpu.memory_space<vmem>>, vector<64x4xf32>
    %128 = arith.addf %127, %126 : vector<64x4xf32>
    %c0_201 = arith.constant 0 : index
    %c0_202 = arith.constant 0 : index
    %129 = vector.load %arg9[%c0_201, %c0_202] : memref<64x4xf32, #tpu.memory_space<vmem>>, vector<64x4xf32>
    tpu.vector_store %arg9[%c0_201, %c0_202], %128 {strides = array<i32>} : memref<64x4xf32, #tpu.memory_space<vmem>>, vector<64x4xf32>,
    %c0_203 = arith.constant 0 : index
    %c0_204 = arith.constant 0 : index
    %c0_205 = arith.constant 0 : index
    %c1_206 = arith.constant 1 : index
    %c1_207 = arith.constant 1 : index
    %c0_208 = arith.constant 0 : index
    %130 = vector.load %arg3[%c0_203, %c0_204, %c0_205, %c1_206, %c1_207, %c0_208] : memref<1x1x1x10x10x4xf32, #tpu.memory_space<vmem>>, vector<1x1x1x8x8x4xf32>
    %131 = vector.shape_cast %130 : vector<1x1x1x8x8x4xf32> to vector<8x8x4xf32>
    %132 = vector.shape_cast %131 : vector<8x8x4xf32> to vector<64x4xf32>
    %c1_209 = arith.constant 1 : index
    %c2_210 = arith.constant 2 : index
    %c0_211 = arith.constant 0 : index
    %c0_212 = arith.constant 0 : index
    %133 = vector.load %arg6[%c1_209, %c2_210, %c0_211, %c0_212] : memref<4x12x4x4xf32, #tpu.memory_space<vmem>>, vector<1x1x4x4xf32>
    %134 = vector.shape_cast %133 : vector<1x1x4x4xf32> to vector<4x4xf32>
    %cst_213 = arith.constant dense<0.000000e+00> : vector<64x4xf32>
    %135 = tpu.matmul %132, %134, %cst_213 {dimension_numbers = #tpu.dot_dimension_numbers<[1], [0], [0], [1], [0, 0, 1, 1], [], []>} : vector<64x4xf32>, vector<4x4xf32>, vector<64x4xf32> -> vector<64x4xf32>
    %c0_214 = arith.constant 0 : index
    %c0_215 = arith.constant 0 : index
    %136 = vector.load %arg9[%c0_214, %c0_215] : memref<64x4xf32, #tpu.memory_space<vmem>>, vector<64x4xf32>
    %137 = arith.addf %136, %135 : vector<64x4xf32>
    %c0_216 = arith.constant 0 : index
    %c0_217 = arith.constant 0 : index
    %138 = vector.load %arg9[%c0_216, %c0_217] : memref<64x4xf32, #tpu.memory_space<vmem>>, vector<64x4xf32>
    tpu.vector_store %arg9[%c0_216, %c0_217], %137 {strides = array<i32>} : memref<64x4xf32, #tpu.memory_space<vmem>>, vector<64x4xf32>,
    %c0_218 = arith.constant 0 : index
    %c0_219 = arith.constant 0 : index
    %c0_220 = arith.constant 0 : index
    %c1_221 = arith.constant 1 : index
    %c2_222 = arith.constant 2 : index
    %c0_223 = arith.constant 0 : index
    %139 = vector.load %arg3[%c0_218, %c0_219, %c0_220, %c1_221, %c2_222, %c0_223] : memref<1x1x1x10x10x4xf32, #tpu.memory_space<vmem>>, vector<1x1x1x8x8x4xf32>
    %140 = vector.shape_cast %139 : vector<1x1x1x8x8x4xf32> to vector<8x8x4xf32>
    %141 = vector.shape_cast %140 : vector<8x8x4xf32> to vector<64x4xf32>
    %c1_224 = arith.constant 1 : index
    %c3_225 = arith.constant 3 : index
    %c0_226 = arith.constant 0 : index
    %c0_227 = arith.constant 0 : index
    %142 = vector.load %arg6[%c1_224, %c3_225, %c0_226, %c0_227] : memref<4x12x4x4xf32, #tpu.memory_space<vmem>>, vector<1x1x4x4xf32>
    %143 = vector.shape_cast %142 : vector<1x1x4x4xf32> to vector<4x4xf32>
    %cst_228 = arith.constant dense<0.000000e+00> : vector<64x4xf32>
    %144 = tpu.matmul %141, %143, %cst_228 {dimension_numbers = #tpu.dot_dimension_numbers<[1], [0], [0], [1], [0, 0, 1, 1], [], []>} : vector<64x4xf32>, vector<4x4xf32>, vector<64x4xf32> -> vector<64x4xf32>
    %c0_229 = arith.constant 0 : index
    %c0_230 = arith.constant 0 : index
    %145 = vector.load %arg9[%c0_229, %c0_230] : memref<64x4xf32, #tpu.memory_space<vmem>>, vector<64x4xf32>
    %146 = arith.addf %145, %144 : vector<64x4xf32>
    %c0_231 = arith.constant 0 : index
    %c0_232 = arith.constant 0 : index
    %147 = vector.load %arg9[%c0_231, %c0_232] : memref<64x4xf32, #tpu.memory_space<vmem>>, vector<64x4xf32>
    tpu.vector_store %arg9[%c0_231, %c0_232], %146 {strides = array<i32>} : memref<64x4xf32, #tpu.memory_space<vmem>>, vector<64x4xf32>,
    %c0_233 = arith.constant 0 : index
    %c0_234 = arith.constant 0 : index
    %c0_235 = arith.constant 0 : index
    %c0_236 = arith.constant 0 : index
    %c1_237 = arith.constant 1 : index
    %c0_238 = arith.constant 0 : index
    %148 = vector.load %arg4[%c0_233, %c0_234, %c0_235, %c0_236, %c1_237, %c0_238] : memref<1x1x1x10x10x4xf32, #tpu.memory_space<vmem>>, vector<1x1x1x8x8x4xf32>
    %149 = vector.shape_cast %148 : vector<1x1x1x8x8x4xf32> to vector<8x8x4xf32>
    %150 = vector.shape_cast %149 : vector<8x8x4xf32> to vector<64x4xf32>
    %c1_239 = arith.constant 1 : index
    %c4_240 = arith.constant 4 : index
    %c0_241 = arith.constant 0 : index
    %c0_242 = arith.constant 0 : index
    %151 = vector.load %arg6[%c1_239, %c4_240, %c0_241, %c0_242] : memref<4x12x4x4xf32, #tpu.memory_space<vmem>>, vector<1x1x4x4xf32>
    %152 = vector.shape_cast %151 : vector<1x1x4x4xf32> to vector<4x4xf32>
    %cst_243 = arith.constant dense<0.000000e+00> : vector<64x4xf32>
    %153 = tpu.matmul %150, %152, %cst_243 {dimension_numbers = #tpu.dot_dimension_numbers<[1], [0], [0], [1], [0, 0, 1, 1], [], []>} : vector<64x4xf32>, vector<4x4xf32>, vector<64x4xf32> -> vector<64x4xf32>
    %c0_244 = arith.constant 0 : index
    %c0_245 = arith.constant 0 : index
    %154 = vector.load %arg9[%c0_244, %c0_245] : memref<64x4xf32, #tpu.memory_space<vmem>>, vector<64x4xf32>
    %155 = arith.addf %154, %153 : vector<64x4xf32>
    %c0_246 = arith.constant 0 : index
    %c0_247 = arith.constant 0 : index
    %156 = vector.load %arg9[%c0_246, %c0_247] : memref<64x4xf32, #tpu.memory_space<vmem>>, vector<64x4xf32>
    tpu.vector_store %arg9[%c0_246, %c0_247], %155 {strides = array<i32>} : memref<64x4xf32, #tpu.memory_space<vmem>>, vector<64x4xf32>,
    %c0_248 = arith.constant 0 : index
    %c0_249 = arith.constant 0 : index
    %c0_250 = arith.constant 0 : index
    %c0_251 = arith.constant 0 : index
    %c2_252 = arith.constant 2 : index
    %c0_253 = arith.constant 0 : index
    %157 = vector.load %arg4[%c0_248, %c0_249, %c0_250, %c0_251, %c2_252, %c0_253] : memref<1x1x1x10x10x4xf32, #tpu.memory_space<vmem>>, vector<1x1x1x8x8x4xf32>
    %158 = vector.shape_cast %157 : vector<1x1x1x8x8x4xf32> to vector<8x8x4xf32>
    %159 = vector.shape_cast %158 : vector<8x8x4xf32> to vector<64x4xf32>
    %c1_254 = arith.constant 1 : index
    %c5_255 = arith.constant 5 : index
    %c0_256 = arith.constant 0 : index
    %c0_257 = arith.constant 0 : index
    %160 = vector.load %arg6[%c1_254, %c5_255, %c0_256, %c0_257] : memref<4x12x4x4xf32, #tpu.memory_space<vmem>>, vector<1x1x4x4xf32>
    %161 = vector.shape_cast %160 : vector<1x1x4x4xf32> to vector<4x4xf32>
    %cst_258 = arith.constant dense<0.000000e+00> : vector<64x4xf32>
    %162 = tpu.matmul %159, %161, %cst_258 {dimension_numbers = #tpu.dot_dimension_numbers<[1], [0], [0], [1], [0, 0, 1, 1], [], []>} : vector<64x4xf32>, vector<4x4xf32>, vector<64x4xf32> -> vector<64x4xf32>
    %c0_259 = arith.constant 0 : index
    %c0_260 = arith.constant 0 : index
    %163 = vector.load %arg9[%c0_259, %c0_260] : memref<64x4xf32, #tpu.memory_space<vmem>>, vector<64x4xf32>
    %164 = arith.addf %163, %162 : vector<64x4xf32>
    %c0_261 = arith.constant 0 : index
    %c0_262 = arith.constant 0 : index
    %165 = vector.load %arg9[%c0_261, %c0_262] : memref<64x4xf32, #tpu.memory_space<vmem>>, vector<64x4xf32>
    tpu.vector_store %arg9[%c0_261, %c0_262], %164 {strides = array<i32>} : memref<64x4xf32, #tpu.memory_space<vmem>>, vector<64x4xf32>,
    %c0_263 = arith.constant 0 : index
    %c0_264 = arith.constant 0 : index
    %c0_265 = arith.constant 0 : index
    %c1_266 = arith.constant 1 : index
    %c1_267 = arith.constant 1 : index
    %c0_268 = arith.constant 0 : index
    %166 = vector.load %arg4[%c0_263, %c0_264, %c0_265, %c1_266, %c1_267, %c0_268] : memref<1x1x1x10x10x4xf32, #tpu.memory_space<vmem>>, vector<1x1x1x8x8x4xf32>
    %167 = vector.shape_cast %166 : vector<1x1x1x8x8x4xf32> to vector<8x8x4xf32>
    %168 = vector.shape_cast %167 : vector<8x8x4xf32> to vector<64x4xf32>
    %c1_269 = arith.constant 1 : index
    %c6_270 = arith.constant 6 : index
    %c0_271 = arith.constant 0 : index
    %c0_272 = arith.constant 0 : index
    %169 = vector.load %arg6[%c1_269, %c6_270, %c0_271, %c0_272] : memref<4x12x4x4xf32, #tpu.memory_space<vmem>>, vector<1x1x4x4xf32>
    %170 = vector.shape_cast %169 : vector<1x1x4x4xf32> to vector<4x4xf32>
    %cst_273 = arith.constant dense<0.000000e+00> : vector<64x4xf32>
    %171 = tpu.matmul %168, %170, %cst_273 {dimension_numbers = #tpu.dot_dimension_numbers<[1], [0], [0], [1], [0, 0, 1, 1], [], []>} : vector<64x4xf32>, vector<4x4xf32>, vector<64x4xf32> -> vector<64x4xf32>
    %c0_274 = arith.constant 0 : index
    %c0_275 = arith.constant 0 : index
    %172 = vector.load %arg9[%c0_274, %c0_275] : memref<64x4xf32, #tpu.memory_space<vmem>>, vector<64x4xf32>
    %173 = arith.addf %172, %171 : vector<64x4xf32>
    %c0_276 = arith.constant 0 : index
    %c0_277 = arith.constant 0 : index
    %174 = vector.load %arg9[%c0_276, %c0_277] : memref<64x4xf32, #tpu.memory_space<vmem>>, vector<64x4xf32>
    tpu.vector_store %arg9[%c0_276, %c0_277], %173 {strides = array<i32>} : memref<64x4xf32, #tpu.memory_space<vmem>>, vector<64x4xf32>,
    %c0_278 = arith.constant 0 : index
    %c0_279 = arith.constant 0 : index
    %c0_280 = arith.constant 0 : index
    %c1_281 = arith.constant 1 : index
    %c2_282 = arith.constant 2 : index
    %c0_283 = arith.constant 0 : index
    %175 = vector.load %arg4[%c0_278, %c0_279, %c0_280, %c1_281, %c2_282, %c0_283] : memref<1x1x1x10x10x4xf32, #tpu.memory_space<vmem>>, vector<1x1x1x8x8x4xf32>
    %176 = vector.shape_cast %175 : vector<1x1x1x8x8x4xf32> to vector<8x8x4xf32>
    %177 = vector.shape_cast %176 : vector<8x8x4xf32> to vector<64x4xf32>
    %c1_284 = arith.constant 1 : index
    %c7_285 = arith.constant 7 : index
    %c0_286 = arith.constant 0 : index
    %c0_287 = arith.constant 0 : index
    %178 = vector.load %arg6[%c1_284, %c7_285, %c0_286, %c0_287] : memref<4x12x4x4xf32, #tpu.memory_space<vmem>>, vector<1x1x4x4xf32>
    %179 = vector.shape_cast %178 : vector<1x1x4x4xf32> to vector<4x4xf32>
    %cst_288 = arith.constant dense<0.000000e+00> : vector<64x4xf32>
    %180 = tpu.matmul %177, %179, %cst_288 {dimension_numbers = #tpu.dot_dimension_numbers<[1], [0], [0], [1], [0, 0, 1, 1], [], []>} : vector<64x4xf32>, vector<4x4xf32>, vector<64x4xf32> -> vector<64x4xf32>
    %c0_289 = arith.constant 0 : index
    %c0_290 = arith.constant 0 : index
    %181 = vector.load %arg9[%c0_289, %c0_290] : memref<64x4xf32, #tpu.memory_space<vmem>>, vector<64x4xf32>
    %182 = arith.addf %181, %180 : vector<64x4xf32>
    %c0_291 = arith.constant 0 : index
    %c0_292 = arith.constant 0 : index
    %183 = vector.load %arg9[%c0_291, %c0_292] : memref<64x4xf32, #tpu.memory_space<vmem>>, vector<64x4xf32>
    tpu.vector_store %arg9[%c0_291, %c0_292], %182 {strides = array<i32>} : memref<64x4xf32, #tpu.memory_space<vmem>>, vector<64x4xf32>,
    %c0_293 = arith.constant 0 : index
    %c0_294 = arith.constant 0 : index
    %c0_295 = arith.constant 0 : index
    %c0_296 = arith.constant 0 : index
    %c1_297 = arith.constant 1 : index
    %c0_298 = arith.constant 0 : index
    %184 = vector.load %arg5[%c0_293, %c0_294, %c0_295, %c0_296, %c1_297, %c0_298] : memref<1x1x1x10x10x4xf32, #tpu.memory_space<vmem>>, vector<1x1x1x8x8x4xf32>
    %185 = vector.shape_cast %184 : vector<1x1x1x8x8x4xf32> to vector<8x8x4xf32>
    %186 = vector.shape_cast %185 : vector<8x8x4xf32> to vector<64x4xf32>
    %c1_299 = arith.constant 1 : index
    %c8_300 = arith.constant 8 : index
    %c0_301 = arith.constant 0 : index
    %c0_302 = arith.constant 0 : index
    %187 = vector.load %arg6[%c1_299, %c8_300, %c0_301, %c0_302] : memref<4x12x4x4xf32, #tpu.memory_space<vmem>>, vector<1x1x4x4xf32>
    %188 = vector.shape_cast %187 : vector<1x1x4x4xf32> to vector<4x4xf32>
    %cst_303 = arith.constant dense<0.000000e+00> : vector<64x4xf32>
    %189 = tpu.matmul %186, %188, %cst_303 {dimension_numbers = #tpu.dot_dimension_numbers<[1], [0], [0], [1], [0, 0, 1, 1], [], []>} : vector<64x4xf32>, vector<4x4xf32>, vector<64x4xf32> -> vector<64x4xf32>
    %c0_304 = arith.constant 0 : index
    %c0_305 = arith.constant 0 : index
    %190 = vector.load %arg9[%c0_304, %c0_305] : memref<64x4xf32, #tpu.memory_space<vmem>>, vector<64x4xf32>
    %191 = arith.addf %190, %189 : vector<64x4xf32>
    %c0_306 = arith.constant 0 : index
    %c0_307 = arith.constant 0 : index
    %192 = vector.load %arg9[%c0_306, %c0_307] : memref<64x4xf32, #tpu.memory_space<vmem>>, vector<64x4xf32>
    tpu.vector_store %arg9[%c0_306, %c0_307], %191 {strides = array<i32>} : memref<64x4xf32, #tpu.memory_space<vmem>>, vector<64x4xf32>,
    %c0_308 = arith.constant 0 : index
    %c0_309 = arith.constant 0 : index
    %c0_310 = arith.constant 0 : index
    %c0_311 = arith.constant 0 : index
    %c2_312 = arith.constant 2 : index
    %c0_313 = arith.constant 0 : index
    %193 = vector.load %arg5[%c0_308, %c0_309, %c0_310, %c0_311, %c2_312, %c0_313] : memref<1x1x1x10x10x4xf32, #tpu.memory_space<vmem>>, vector<1x1x1x8x8x4xf32>
    %194 = vector.shape_cast %193 : vector<1x1x1x8x8x4xf32> to vector<8x8x4xf32>
    %195 = vector.shape_cast %194 : vector<8x8x4xf32> to vector<64x4xf32>
    %c1_314 = arith.constant 1 : index
    %c9_315 = arith.constant 9 : index
    %c0_316 = arith.constant 0 : index
    %c0_317 = arith.constant 0 : index
    %196 = vector.load %arg6[%c1_314, %c9_315, %c0_316, %c0_317] : memref<4x12x4x4xf32, #tpu.memory_space<vmem>>, vector<1x1x4x4xf32>
    %197 = vector.shape_cast %196 : vector<1x1x4x4xf32> to vector<4x4xf32>
    %cst_318 = arith.constant dense<0.000000e+00> : vector<64x4xf32>
    %198 = tpu.matmul %195, %197, %cst_318 {dimension_numbers = #tpu.dot_dimension_numbers<[1], [0], [0], [1], [0, 0, 1, 1], [], []>} : vector<64x4xf32>, vector<4x4xf32>, vector<64x4xf32> -> vector<64x4xf32>
    %c0_319 = arith.constant 0 : index
    %c0_320 = arith.constant 0 : index
    %199 = vector.load %arg9[%c0_319, %c0_320] : memref<64x4xf32, #tpu.memory_space<vmem>>, vector<64x4xf32>
    %200 = arith.addf %199, %198 : vector<64x4xf32>
    %c0_321 = arith.constant 0 : index
    %c0_322 = arith.constant 0 : index
    %201 = vector.load %arg9[%c0_321, %c0_322] : memref<64x4xf32, #tpu.memory_space<vmem>>, vector<64x4xf32>
    tpu.vector_store %arg9[%c0_321, %c0_322], %200 {strides = array<i32>} : memref<64x4xf32, #tpu.memory_space<vmem>>, vector<64x4xf32>,
    %c0_323 = arith.constant 0 : index
    %c0_324 = arith.constant 0 : index
    %c0_325 = arith.constant 0 : index
    %c1_326 = arith.constant 1 : index
    %c1_327 = arith.constant 1 : index
    %c0_328 = arith.constant 0 : index
    %202 = vector.load %arg5[%c0_323, %c0_324, %c0_325, %c1_326, %c1_327, %c0_328] : memref<1x1x1x10x10x4xf32, #tpu.memory_space<vmem>>, vector<1x1x1x8x8x4xf32>
    %203 = vector.shape_cast %202 : vector<1x1x1x8x8x4xf32> to vector<8x8x4xf32>
    %204 = vector.shape_cast %203 : vector<8x8x4xf32> to vector<64x4xf32>
    %c1_329 = arith.constant 1 : index
    %c10_330 = arith.constant 10 : index
    %c0_331 = arith.constant 0 : index
    %c0_332 = arith.constant 0 : index
    %205 = vector.load %arg6[%c1_329, %c10_330, %c0_331, %c0_332] : memref<4x12x4x4xf32, #tpu.memory_space<vmem>>, vector<1x1x4x4xf32>
    %206 = vector.shape_cast %205 : vector<1x1x4x4xf32> to vector<4x4xf32>
    %cst_333 = arith.constant dense<0.000000e+00> : vector<64x4xf32>
    %207 = tpu.matmul %204, %206, %cst_333 {dimension_numbers = #tpu.dot_dimension_numbers<[1], [0], [0], [1], [0, 0, 1, 1], [], []>} : vector<64x4xf32>, vector<4x4xf32>, vector<64x4xf32> -> vector<64x4xf32>
    %c0_334 = arith.constant 0 : index
    %c0_335 = arith.constant 0 : index
    %208 = vector.load %arg9[%c0_334, %c0_335] : memref<64x4xf32, #tpu.memory_space<vmem>>, vector<64x4xf32>
    %209 = arith.addf %208, %207 : vector<64x4xf32>
    %c0_336 = arith.constant 0 : index
    %c0_337 = arith.constant 0 : index
    %210 = vector.load %arg9[%c0_336, %c0_337] : memref<64x4xf32, #tpu.memory_space<vmem>>, vector<64x4xf32>
    tpu.vector_store %arg9[%c0_336, %c0_337], %209 {strides = array<i32>} : memref<64x4xf32, #tpu.memory_space<vmem>>, vector<64x4xf32>,
    %c0_338 = arith.constant 0 : index
    %c0_339 = arith.constant 0 : index
    %c0_340 = arith.constant 0 : index
    %c1_341 = arith.constant 1 : index
    %c2_342 = arith.constant 2 : index
    %c0_343 = arith.constant 0 : index
    %211 = vector.load %arg5[%c0_338, %c0_339, %c0_340, %c1_341, %c2_342, %c0_343] : memref<1x1x1x10x10x4xf32, #tpu.memory_space<vmem>>, vector<1x1x1x8x8x4xf32>
    %212 = vector.shape_cast %211 : vector<1x1x1x8x8x4xf32> to vector<8x8x4xf32>
    %213 = vector.shape_cast %212 : vector<8x8x4xf32> to vector<64x4xf32>
    %c1_344 = arith.constant 1 : index
    %c11_345 = arith.constant 11 : index
    %c0_346 = arith.constant 0 : index
    %c0_347 = arith.constant 0 : index
    %214 = vector.load %arg6[%c1_344, %c11_345, %c0_346, %c0_347] : memref<4x12x4x4xf32, #tpu.memory_space<vmem>>, vector<1x1x4x4xf32>
    %215 = vector.shape_cast %214 : vector<1x1x4x4xf32> to vector<4x4xf32>
    %cst_348 = arith.constant dense<0.000000e+00> : vector<64x4xf32>
    %216 = tpu.matmul %213, %215, %cst_348 {dimension_numbers = #tpu.dot_dimension_numbers<[1], [0], [0], [1], [0, 0, 1, 1], [], []>} : vector<64x4xf32>, vector<4x4xf32>, vector<64x4xf32> -> vector<64x4xf32>
    %c0_349 = arith.constant 0 : index
    %c0_350 = arith.constant 0 : index
    %217 = vector.load %arg9[%c0_349, %c0_350] : memref<64x4xf32, #tpu.memory_space<vmem>>, vector<64x4xf32>
    %218 = arith.addf %217, %216 : vector<64x4xf32>
    %c0_351 = arith.constant 0 : index
    %c0_352 = arith.constant 0 : index
    %219 = vector.load %arg9[%c0_351, %c0_352] : memref<64x4xf32, #tpu.memory_space<vmem>>, vector<64x4xf32>
    tpu.vector_store %arg9[%c0_351, %c0_352], %218 {strides = array<i32>} : memref<64x4xf32, #tpu.memory_space<vmem>>, vector<64x4xf32>,
    %c0_353 = arith.constant 0 : index
    %c0_354 = arith.constant 0 : index
    %220 = vector.load %arg9[%c0_353, %c0_354] : memref<64x4xf32, #tpu.memory_space<vmem>>, vector<64x4xf32>
    %221 = vector.broadcast %0 : vector<1x4xf32> to vector<64x4xf32>
    %222 = arith.addf %220, %221 : vector<64x4xf32>
    %223 = vector.shape_cast %222 : vector<64x4xf32> to vector<8x1x8x4xf32>
    %c0_355 = arith.constant 0 : index
    %c0_356 = arith.constant 0 : index
    %c0_357 = arith.constant 0 : index
    %c0_358 = arith.constant 0 : index
    %c0_359 = arith.constant 0 : index
    %c4_360 = arith.constant 4 : index
    %224 = vector.load %arg8[%c0_355, %c0_356, %c0_357, %c0_358, %c0_359, %c4_360] : memref<1x1x8x2x8x8xf32, #tpu.memory_space<vmem>>, vector<1x1x8x1x8x4xf32>
    %225 = vector.shape_cast %224 : vector<1x1x8x1x8x4xf32> to vector<8x1x8x4xf32>
    %226 = vector.shape_cast %223 : vector<8x1x8x4xf32> to vector<1x1x8x1x8x4xf32>
    tpu.vector_store %arg8[%c0_355, %c0_356, %c0_357, %c0_358, %c0_359, %c4_360], %226 {strides = array<i32>} : memref<1x1x8x2x8x8xf32, #tpu.memory_space<vmem>>, vector<1x1x8x1x8x4xf32>,
    %c0_361 = arith.constant 0 : index
    %c0_362 = arith.constant 0 : index
    %c0_363 = arith.constant 0 : index
    %c1_364 = arith.constant 1 : index
    %c0_365 = arith.constant 0 : index
    %c0_366 = arith.constant 0 : index
    %227 = vector.load %arg3[%c0_361, %c0_362, %c0_363, %c1_364, %c0_365, %c0_366] : memref<1x1x1x10x10x4xf32, #tpu.memory_space<vmem>>, vector<1x1x1x8x8x4xf32>
    %228 = vector.shape_cast %227 : vector<1x1x1x8x8x4xf32> to vector<8x8x4xf32>
    %229 = vector.shape_cast %228 : vector<8x8x4xf32> to vector<64x4xf32>
    %c2_367 = arith.constant 2 : index
    %c0_368 = arith.constant 0 : index
    %c0_369 = arith.constant 0 : index
    %c0_370 = arith.constant 0 : index
    %230 = vector.load %arg6[%c2_367, %c0_368, %c0_369, %c0_370] : memref<4x12x4x4xf32, #tpu.memory_space<vmem>>, vector<1x1x4x4xf32>
    %231 = vector.shape_cast %230 : vector<1x1x4x4xf32> to vector<4x4xf32>
    %cst_371 = arith.constant dense<0.000000e+00> : vector<64x4xf32>
    %232 = tpu.matmul %229, %231, %cst_371 {dimension_numbers = #tpu.dot_dimension_numbers<[1], [0], [0], [1], [0, 0, 1, 1], [], []>} : vector<64x4xf32>, vector<4x4xf32>, vector<64x4xf32> -> vector<64x4xf32>
    %c0_372 = arith.constant 0 : index
    %c0_373 = arith.constant 0 : index
    %233 = vector.load %arg9[%c0_372, %c0_373] : memref<64x4xf32, #tpu.memory_space<vmem>>, vector<64x4xf32>
    tpu.vector_store %arg9[%c0_372, %c0_373], %232 {strides = array<i32>} : memref<64x4xf32, #tpu.memory_space<vmem>>, vector<64x4xf32>,
    %c0_374 = arith.constant 0 : index
    %c0_375 = arith.constant 0 : index
    %c0_376 = arith.constant 0 : index
    %c1_377 = arith.constant 1 : index
    %c1_378 = arith.constant 1 : index
    %c0_379 = arith.constant 0 : index
    %234 = vector.load %arg3[%c0_374, %c0_375, %c0_376, %c1_377, %c1_378, %c0_379] : memref<1x1x1x10x10x4xf32, #tpu.memory_space<vmem>>, vector<1x1x1x8x8x4xf32>
    %235 = vector.shape_cast %234 : vector<1x1x1x8x8x4xf32> to vector<8x8x4xf32>
    %236 = vector.shape_cast %235 : vector<8x8x4xf32> to vector<64x4xf32>
    %c2_380 = arith.constant 2 : index
    %c1_381 = arith.constant 1 : index
    %c0_382 = arith.constant 0 : index
    %c0_383 = arith.constant 0 : index
    %237 = vector.load %arg6[%c2_380, %c1_381, %c0_382, %c0_383] : memref<4x12x4x4xf32, #tpu.memory_space<vmem>>, vector<1x1x4x4xf32>
    %238 = vector.shape_cast %237 : vector<1x1x4x4xf32> to vector<4x4xf32>
    %cst_384 = arith.constant dense<0.000000e+00> : vector<64x4xf32>
    %239 = tpu.matmul %236, %238, %cst_384 {dimension_numbers = #tpu.dot_dimension_numbers<[1], [0], [0], [1], [0, 0, 1, 1], [], []>} : vector<64x4xf32>, vector<4x4xf32>, vector<64x4xf32> -> vector<64x4xf32>
    %c0_385 = arith.constant 0 : index
    %c0_386 = arith.constant 0 : index
    %240 = vector.load %arg9[%c0_385, %c0_386] : memref<64x4xf32, #tpu.memory_space<vmem>>, vector<64x4xf32>
    %241 = arith.addf %240, %239 : vector<64x4xf32>
    %c0_387 = arith.constant 0 : index
    %c0_388 = arith.constant 0 : index
    %242 = vector.load %arg9[%c0_387, %c0_388] : memref<64x4xf32, #tpu.memory_space<vmem>>, vector<64x4xf32>
    tpu.vector_store %arg9[%c0_387, %c0_388], %241 {strides = array<i32>} : memref<64x4xf32, #tpu.memory_space<vmem>>, vector<64x4xf32>,
    %c0_389 = arith.constant 0 : index
    %c0_390 = arith.constant 0 : index
    %c0_391 = arith.constant 0 : index
    %c2_392 = arith.constant 2 : index
    %c0_393 = arith.constant 0 : index
    %c0_394 = arith.constant 0 : index
    %243 = vector.load %arg3[%c0_389, %c0_390, %c0_391, %c2_392, %c0_393, %c0_394] : memref<1x1x1x10x10x4xf32, #tpu.memory_space<vmem>>, vector<1x1x1x8x8x4xf32>
    %244 = vector.shape_cast %243 : vector<1x1x1x8x8x4xf32> to vector<8x8x4xf32>
    %245 = vector.shape_cast %244 : vector<8x8x4xf32> to vector<64x4xf32>
    %c2_395 = arith.constant 2 : index
    %c2_396 = arith.constant 2 : index
    %c0_397 = arith.constant 0 : index
    %c0_398 = arith.constant 0 : index
    %246 = vector.load %arg6[%c2_395, %c2_396, %c0_397, %c0_398] : memref<4x12x4x4xf32, #tpu.memory_space<vmem>>, vector<1x1x4x4xf32>
    %247 = vector.shape_cast %246 : vector<1x1x4x4xf32> to vector<4x4xf32>
    %cst_399 = arith.constant dense<0.000000e+00> : vector<64x4xf32>
    %248 = tpu.matmul %245, %247, %cst_399 {dimension_numbers = #tpu.dot_dimension_numbers<[1], [0], [0], [1], [0, 0, 1, 1], [], []>} : vector<64x4xf32>, vector<4x4xf32>, vector<64x4xf32> -> vector<64x4xf32>
    %c0_400 = arith.constant 0 : index
    %c0_401 = arith.constant 0 : index
    %249 = vector.load %arg9[%c0_400, %c0_401] : memref<64x4xf32, #tpu.memory_space<vmem>>, vector<64x4xf32>
    %250 = arith.addf %249, %248 : vector<64x4xf32>
    %c0_402 = arith.constant 0 : index
    %c0_403 = arith.constant 0 : index
    %251 = vector.load %arg9[%c0_402, %c0_403] : memref<64x4xf32, #tpu.memory_space<vmem>>, vector<64x4xf32>
    tpu.vector_store %arg9[%c0_402, %c0_403], %250 {strides = array<i32>} : memref<64x4xf32, #tpu.memory_space<vmem>>, vector<64x4xf32>,
    %c0_404 = arith.constant 0 : index
    %c0_405 = arith.constant 0 : index
    %c0_406 = arith.constant 0 : index
    %c2_407 = arith.constant 2 : index
    %c1_408 = arith.constant 1 : index
    %c0_409 = arith.constant 0 : index
    %252 = vector.load %arg3[%c0_404, %c0_405, %c0_406, %c2_407, %c1_408, %c0_409] : memref<1x1x1x10x10x4xf32, #tpu.memory_space<vmem>>, vector<1x1x1x8x8x4xf32>
    %253 = vector.shape_cast %252 : vector<1x1x1x8x8x4xf32> to vector<8x8x4xf32>
    %254 = vector.shape_cast %253 : vector<8x8x4xf32> to vector<64x4xf32>
    %c2_410 = arith.constant 2 : index
    %c3_411 = arith.constant 3 : index
    %c0_412 = arith.constant 0 : index
    %c0_413 = arith.constant 0 : index
    %255 = vector.load %arg6[%c2_410, %c3_411, %c0_412, %c0_413] : memref<4x12x4x4xf32, #tpu.memory_space<vmem>>, vector<1x1x4x4xf32>
    %256 = vector.shape_cast %255 : vector<1x1x4x4xf32> to vector<4x4xf32>
    %cst_414 = arith.constant dense<0.000000e+00> : vector<64x4xf32>
    %257 = tpu.matmul %254, %256, %cst_414 {dimension_numbers = #tpu.dot_dimension_numbers<[1], [0], [0], [1], [0, 0, 1, 1], [], []>} : vector<64x4xf32>, vector<4x4xf32>, vector<64x4xf32> -> vector<64x4xf32>
    %c0_415 = arith.constant 0 : index
    %c0_416 = arith.constant 0 : index
    %258 = vector.load %arg9[%c0_415, %c0_416] : memref<64x4xf32, #tpu.memory_space<vmem>>, vector<64x4xf32>
    %259 = arith.addf %258, %257 : vector<64x4xf32>
    %c0_417 = arith.constant 0 : index
    %c0_418 = arith.constant 0 : index
    %260 = vector.load %arg9[%c0_417, %c0_418] : memref<64x4xf32, #tpu.memory_space<vmem>>, vector<64x4xf32>
    tpu.vector_store %arg9[%c0_417, %c0_418], %259 {strides = array<i32>} : memref<64x4xf32, #tpu.memory_space<vmem>>, vector<64x4xf32>,
    %c0_419 = arith.constant 0 : index
    %c0_420 = arith.constant 0 : index
    %c0_421 = arith.constant 0 : index
    %c1_422 = arith.constant 1 : index
    %c0_423 = arith.constant 0 : index
    %c0_424 = arith.constant 0 : index
    %261 = vector.load %arg4[%c0_419, %c0_420, %c0_421, %c1_422, %c0_423, %c0_424] : memref<1x1x1x10x10x4xf32, #tpu.memory_space<vmem>>, vector<1x1x1x8x8x4xf32>
    %262 = vector.shape_cast %261 : vector<1x1x1x8x8x4xf32> to vector<8x8x4xf32>
    %263 = vector.shape_cast %262 : vector<8x8x4xf32> to vector<64x4xf32>
    %c2_425 = arith.constant 2 : index
    %c4_426 = arith.constant 4 : index
    %c0_427 = arith.constant 0 : index
    %c0_428 = arith.constant 0 : index
    %264 = vector.load %arg6[%c2_425, %c4_426, %c0_427, %c0_428] : memref<4x12x4x4xf32, #tpu.memory_space<vmem>>, vector<1x1x4x4xf32>
    %265 = vector.shape_cast %264 : vector<1x1x4x4xf32> to vector<4x4xf32>
    %cst_429 = arith.constant dense<0.000000e+00> : vector<64x4xf32>
    %266 = tpu.matmul %263, %265, %cst_429 {dimension_numbers = #tpu.dot_dimension_numbers<[1], [0], [0], [1], [0, 0, 1, 1], [], []>} : vector<64x4xf32>, vector<4x4xf32>, vector<64x4xf32> -> vector<64x4xf32>
    %c0_430 = arith.constant 0 : index
    %c0_431 = arith.constant 0 : index
    %267 = vector.load %arg9[%c0_430, %c0_431] : memref<64x4xf32, #tpu.memory_space<vmem>>, vector<64x4xf32>
    %268 = arith.addf %267, %266 : vector<64x4xf32>
    %c0_432 = arith.constant 0 : index
    %c0_433 = arith.constant 0 : index
    %269 = vector.load %arg9[%c0_432, %c0_433] : memref<64x4xf32, #tpu.memory_space<vmem>>, vector<64x4xf32>
    tpu.vector_store %arg9[%c0_432, %c0_433], %268 {strides = array<i32>} : memref<64x4xf32, #tpu.memory_space<vmem>>, vector<64x4xf32>,
    %c0_434 = arith.constant 0 : index
    %c0_435 = arith.constant 0 : index
    %c0_436 = arith.constant 0 : index
    %c1_437 = arith.constant 1 : index
    %c1_438 = arith.constant 1 : index
    %c0_439 = arith.constant 0 : index
    %270 = vector.load %arg4[%c0_434, %c0_435, %c0_436, %c1_437, %c1_438, %c0_439] : memref<1x1x1x10x10x4xf32, #tpu.memory_space<vmem>>, vector<1x1x1x8x8x4xf32>
    %271 = vector.shape_cast %270 : vector<1x1x1x8x8x4xf32> to vector<8x8x4xf32>
    %272 = vector.shape_cast %271 : vector<8x8x4xf32> to vector<64x4xf32>
    %c2_440 = arith.constant 2 : index
    %c5_441 = arith.constant 5 : index
    %c0_442 = arith.constant 0 : index
    %c0_443 = arith.constant 0 : index
    %273 = vector.load %arg6[%c2_440, %c5_441, %c0_442, %c0_443] : memref<4x12x4x4xf32, #tpu.memory_space<vmem>>, vector<1x1x4x4xf32>
    %274 = vector.shape_cast %273 : vector<1x1x4x4xf32> to vector<4x4xf32>
    %cst_444 = arith.constant dense<0.000000e+00> : vector<64x4xf32>
    %275 = tpu.matmul %272, %274, %cst_444 {dimension_numbers = #tpu.dot_dimension_numbers<[1], [0], [0], [1], [0, 0, 1, 1], [], []>} : vector<64x4xf32>, vector<4x4xf32>, vector<64x4xf32> -> vector<64x4xf32>
    %c0_445 = arith.constant 0 : index
    %c0_446 = arith.constant 0 : index
    %276 = vector.load %arg9[%c0_445, %c0_446] : memref<64x4xf32, #tpu.memory_space<vmem>>, vector<64x4xf32>
    %277 = arith.addf %276, %275 : vector<64x4xf32>
    %c0_447 = arith.constant 0 : index
    %c0_448 = arith.constant 0 : index
    %278 = vector.load %arg9[%c0_447, %c0_448] : memref<64x4xf32, #tpu.memory_space<vmem>>, vector<64x4xf32>
    tpu.vector_store %arg9[%c0_447, %c0_448], %277 {strides = array<i32>} : memref<64x4xf32, #tpu.memory_space<vmem>>, vector<64x4xf32>,
    %c0_449 = arith.constant 0 : index
    %c0_450 = arith.constant 0 : index
    %c0_451 = arith.constant 0 : index
    %c2_452 = arith.constant 2 : index
    %c0_453 = arith.constant 0 : index
    %c0_454 = arith.constant 0 : index
    %279 = vector.load %arg4[%c0_449, %c0_450, %c0_451, %c2_452, %c0_453, %c0_454] : memref<1x1x1x10x10x4xf32, #tpu.memory_space<vmem>>, vector<1x1x1x8x8x4xf32>
    %280 = vector.shape_cast %279 : vector<1x1x1x8x8x4xf32> to vector<8x8x4xf32>
    %281 = vector.shape_cast %280 : vector<8x8x4xf32> to vector<64x4xf32>
    %c2_455 = arith.constant 2 : index
    %c6_456 = arith.constant 6 : index
    %c0_457 = arith.constant 0 : index
    %c0_458 = arith.constant 0 : index
    %282 = vector.load %arg6[%c2_455, %c6_456, %c0_457, %c0_458] : memref<4x12x4x4xf32, #tpu.memory_space<vmem>>, vector<1x1x4x4xf32>
    %283 = vector.shape_cast %282 : vector<1x1x4x4xf32> to vector<4x4xf32>
    %cst_459 = arith.constant dense<0.000000e+00> : vector<64x4xf32>
    %284 = tpu.matmul %281, %283, %cst_459 {dimension_numbers = #tpu.dot_dimension_numbers<[1], [0], [0], [1], [0, 0, 1, 1], [], []>} : vector<64x4xf32>, vector<4x4xf32>, vector<64x4xf32> -> vector<64x4xf32>
    %c0_460 = arith.constant 0 : index
    %c0_461 = arith.constant 0 : index
    %285 = vector.load %arg9[%c0_460, %c0_461] : memref<64x4xf32, #tpu.memory_space<vmem>>, vector<64x4xf32>
    %286 = arith.addf %285, %284 : vector<64x4xf32>
    %c0_462 = arith.constant 0 : index
    %c0_463 = arith.constant 0 : index
    %287 = vector.load %arg9[%c0_462, %c0_463] : memref<64x4xf32, #tpu.memory_space<vmem>>, vector<64x4xf32>
    tpu.vector_store %arg9[%c0_462, %c0_463], %286 {strides = array<i32>} : memref<64x4xf32, #tpu.memory_space<vmem>>, vector<64x4xf32>,
    %c0_464 = arith.constant 0 : index
    %c0_465 = arith.constant 0 : index
    %c0_466 = arith.constant 0 : index
    %c2_467 = arith.constant 2 : index
    %c1_468 = arith.constant 1 : index
    %c0_469 = arith.constant 0 : index
    %288 = vector.load %arg4[%c0_464, %c0_465, %c0_466, %c2_467, %c1_468, %c0_469] : memref<1x1x1x10x10x4xf32, #tpu.memory_space<vmem>>, vector<1x1x1x8x8x4xf32>
    %289 = vector.shape_cast %288 : vector<1x1x1x8x8x4xf32> to vector<8x8x4xf32>
    %290 = vector.shape_cast %289 : vector<8x8x4xf32> to vector<64x4xf32>
    %c2_470 = arith.constant 2 : index
    %c7_471 = arith.constant 7 : index
    %c0_472 = arith.constant 0 : index
    %c0_473 = arith.constant 0 : index
    %291 = vector.load %arg6[%c2_470, %c7_471, %c0_472, %c0_473] : memref<4x12x4x4xf32, #tpu.memory_space<vmem>>, vector<1x1x4x4xf32>
    %292 = vector.shape_cast %291 : vector<1x1x4x4xf32> to vector<4x4xf32>
    %cst_474 = arith.constant dense<0.000000e+00> : vector<64x4xf32>
    %293 = tpu.matmul %290, %292, %cst_474 {dimension_numbers = #tpu.dot_dimension_numbers<[1], [0], [0], [1], [0, 0, 1, 1], [], []>} : vector<64x4xf32>, vector<4x4xf32>, vector<64x4xf32> -> vector<64x4xf32>
    %c0_475 = arith.constant 0 : index
    %c0_476 = arith.constant 0 : index
    %294 = vector.load %arg9[%c0_475, %c0_476] : memref<64x4xf32, #tpu.memory_space<vmem>>, vector<64x4xf32>
    %295 = arith.addf %294, %293 : vector<64x4xf32>
    %c0_477 = arith.constant 0 : index
    %c0_478 = arith.constant 0 : index
    %296 = vector.load %arg9[%c0_477, %c0_478] : memref<64x4xf32, #tpu.memory_space<vmem>>, vector<64x4xf32>
    tpu.vector_store %arg9[%c0_477, %c0_478], %295 {strides = array<i32>} : memref<64x4xf32, #tpu.memory_space<vmem>>, vector<64x4xf32>,
    %c0_479 = arith.constant 0 : index
    %c0_480 = arith.constant 0 : index
    %c0_481 = arith.constant 0 : index
    %c1_482 = arith.constant 1 : index
    %c0_483 = arith.constant 0 : index
    %c0_484 = arith.constant 0 : index
    %297 = vector.load %arg5[%c0_479, %c0_480, %c0_481, %c1_482, %c0_483, %c0_484] : memref<1x1x1x10x10x4xf32, #tpu.memory_space<vmem>>, vector<1x1x1x8x8x4xf32>
    %298 = vector.shape_cast %297 : vector<1x1x1x8x8x4xf32> to vector<8x8x4xf32>
    %299 = vector.shape_cast %298 : vector<8x8x4xf32> to vector<64x4xf32>
    %c2_485 = arith.constant 2 : index
    %c8_486 = arith.constant 8 : index
    %c0_487 = arith.constant 0 : index
    %c0_488 = arith.constant 0 : index
    %300 = vector.load %arg6[%c2_485, %c8_486, %c0_487, %c0_488] : memref<4x12x4x4xf32, #tpu.memory_space<vmem>>, vector<1x1x4x4xf32>
    %301 = vector.shape_cast %300 : vector<1x1x4x4xf32> to vector<4x4xf32>
    %cst_489 = arith.constant dense<0.000000e+00> : vector<64x4xf32>
    %302 = tpu.matmul %299, %301, %cst_489 {dimension_numbers = #tpu.dot_dimension_numbers<[1], [0], [0], [1], [0, 0, 1, 1], [], []>} : vector<64x4xf32>, vector<4x4xf32>, vector<64x4xf32> -> vector<64x4xf32>
    %c0_490 = arith.constant 0 : index
    %c0_491 = arith.constant 0 : index
    %303 = vector.load %arg9[%c0_490, %c0_491] : memref<64x4xf32, #tpu.memory_space<vmem>>, vector<64x4xf32>
    %304 = arith.addf %303, %302 : vector<64x4xf32>
    %c0_492 = arith.constant 0 : index
    %c0_493 = arith.constant 0 : index
    %305 = vector.load %arg9[%c0_492, %c0_493] : memref<64x4xf32, #tpu.memory_space<vmem>>, vector<64x4xf32>
    tpu.vector_store %arg9[%c0_492, %c0_493], %304 {strides = array<i32>} : memref<64x4xf32, #tpu.memory_space<vmem>>, vector<64x4xf32>,
    %c0_494 = arith.constant 0 : index
    %c0_495 = arith.constant 0 : index
    %c0_496 = arith.constant 0 : index
    %c1_497 = arith.constant 1 : index
    %c1_498 = arith.constant 1 : index
    %c0_499 = arith.constant 0 : index
    %306 = vector.load %arg5[%c0_494, %c0_495, %c0_496, %c1_497, %c1_498, %c0_499] : memref<1x1x1x10x10x4xf32, #tpu.memory_space<vmem>>, vector<1x1x1x8x8x4xf32>
    %307 = vector.shape_cast %306 : vector<1x1x1x8x8x4xf32> to vector<8x8x4xf32>
    %308 = vector.shape_cast %307 : vector<8x8x4xf32> to vector<64x4xf32>
    %c2_500 = arith.constant 2 : index
    %c9_501 = arith.constant 9 : index
    %c0_502 = arith.constant 0 : index
    %c0_503 = arith.constant 0 : index
    %309 = vector.load %arg6[%c2_500, %c9_501, %c0_502, %c0_503] : memref<4x12x4x4xf32, #tpu.memory_space<vmem>>, vector<1x1x4x4xf32>
    %310 = vector.shape_cast %309 : vector<1x1x4x4xf32> to vector<4x4xf32>
    %cst_504 = arith.constant dense<0.000000e+00> : vector<64x4xf32>
    %311 = tpu.matmul %308, %310, %cst_504 {dimension_numbers = #tpu.dot_dimension_numbers<[1], [0], [0], [1], [0, 0, 1, 1], [], []>} : vector<64x4xf32>, vector<4x4xf32>, vector<64x4xf32> -> vector<64x4xf32>
    %c0_505 = arith.constant 0 : index
    %c0_506 = arith.constant 0 : index
    %312 = vector.load %arg9[%c0_505, %c0_506] : memref<64x4xf32, #tpu.memory_space<vmem>>, vector<64x4xf32>
    %313 = arith.addf %312, %311 : vector<64x4xf32>
    %c0_507 = arith.constant 0 : index
    %c0_508 = arith.constant 0 : index
    %314 = vector.load %arg9[%c0_507, %c0_508] : memref<64x4xf32, #tpu.memory_space<vmem>>, vector<64x4xf32>
    tpu.vector_store %arg9[%c0_507, %c0_508], %313 {strides = array<i32>} : memref<64x4xf32, #tpu.memory_space<vmem>>, vector<64x4xf32>,
    %c0_509 = arith.constant 0 : index
    %c0_510 = arith.constant 0 : index
    %c0_511 = arith.constant 0 : index
    %c2_512 = arith.constant 2 : index
    %c0_513 = arith.constant 0 : index
    %c0_514 = arith.constant 0 : index
    %315 = vector.load %arg5[%c0_509, %c0_510, %c0_511, %c2_512, %c0_513, %c0_514] : memref<1x1x1x10x10x4xf32, #tpu.memory_space<vmem>>, vector<1x1x1x8x8x4xf32>
    %316 = vector.shape_cast %315 : vector<1x1x1x8x8x4xf32> to vector<8x8x4xf32>
    %317 = vector.shape_cast %316 : vector<8x8x4xf32> to vector<64x4xf32>
    %c2_515 = arith.constant 2 : index
    %c10_516 = arith.constant 10 : index
    %c0_517 = arith.constant 0 : index
    %c0_518 = arith.constant 0 : index
    %318 = vector.load %arg6[%c2_515, %c10_516, %c0_517, %c0_518] : memref<4x12x4x4xf32, #tpu.memory_space<vmem>>, vector<1x1x4x4xf32>
    %319 = vector.shape_cast %318 : vector<1x1x4x4xf32> to vector<4x4xf32>
    %cst_519 = arith.constant dense<0.000000e+00> : vector<64x4xf32>
    %320 = tpu.matmul %317, %319, %cst_519 {dimension_numbers = #tpu.dot_dimension_numbers<[1], [0], [0], [1], [0, 0, 1, 1], [], []>} : vector<64x4xf32>, vector<4x4xf32>, vector<64x4xf32> -> vector<64x4xf32>
    %c0_520 = arith.constant 0 : index
    %c0_521 = arith.constant 0 : index
    %321 = vector.load %arg9[%c0_520, %c0_521] : memref<64x4xf32, #tpu.memory_space<vmem>>, vector<64x4xf32>
    %322 = arith.addf %321, %320 : vector<64x4xf32>
    %c0_522 = arith.constant 0 : index
    %c0_523 = arith.constant 0 : index
    %323 = vector.load %arg9[%c0_522, %c0_523] : memref<64x4xf32, #tpu.memory_space<vmem>>, vector<64x4xf32>
    tpu.vector_store %arg9[%c0_522, %c0_523], %322 {strides = array<i32>} : memref<64x4xf32, #tpu.memory_space<vmem>>, vector<64x4xf32>,
    %c0_524 = arith.constant 0 : index
    %c0_525 = arith.constant 0 : index
    %c0_526 = arith.constant 0 : index
    %c2_527 = arith.constant 2 : index
    %c1_528 = arith.constant 1 : index
    %c0_529 = arith.constant 0 : index
    %324 = vector.load %arg5[%c0_524, %c0_525, %c0_526, %c2_527, %c1_528, %c0_529] : memref<1x1x1x10x10x4xf32, #tpu.memory_space<vmem>>, vector<1x1x1x8x8x4xf32>
    %325 = vector.shape_cast %324 : vector<1x1x1x8x8x4xf32> to vector<8x8x4xf32>
    %326 = vector.shape_cast %325 : vector<8x8x4xf32> to vector<64x4xf32>
    %c2_530 = arith.constant 2 : index
    %c11_531 = arith.constant 11 : index
    %c0_532 = arith.constant 0 : index
    %c0_533 = arith.constant 0 : index
    %327 = vector.load %arg6[%c2_530, %c11_531, %c0_532, %c0_533] : memref<4x12x4x4xf32, #tpu.memory_space<vmem>>, vector<1x1x4x4xf32>
    %328 = vector.shape_cast %327 : vector<1x1x4x4xf32> to vector<4x4xf32>
    %cst_534 = arith.constant dense<0.000000e+00> : vector<64x4xf32>
    %329 = tpu.matmul %326, %328, %cst_534 {dimension_numbers = #tpu.dot_dimension_numbers<[1], [0], [0], [1], [0, 0, 1, 1], [], []>} : vector<64x4xf32>, vector<4x4xf32>, vector<64x4xf32> -> vector<64x4xf32>
    %c0_535 = arith.constant 0 : index
    %c0_536 = arith.constant 0 : index
    %330 = vector.load %arg9[%c0_535, %c0_536] : memref<64x4xf32, #tpu.memory_space<vmem>>, vector<64x4xf32>
    %331 = arith.addf %330, %329 : vector<64x4xf32>
    %c0_537 = arith.constant 0 : index
    %c0_538 = arith.constant 0 : index
    %332 = vector.load %arg9[%c0_537, %c0_538] : memref<64x4xf32, #tpu.memory_space<vmem>>, vector<64x4xf32>
    tpu.vector_store %arg9[%c0_537, %c0_538], %331 {strides = array<i32>} : memref<64x4xf32, #tpu.memory_space<vmem>>, vector<64x4xf32>,
    %c0_539 = arith.constant 0 : index
    %c0_540 = arith.constant 0 : index
    %333 = vector.load %arg9[%c0_539, %c0_540] : memref<64x4xf32, #tpu.memory_space<vmem>>, vector<64x4xf32>
    %334 = vector.broadcast %0 : vector<1x4xf32> to vector<64x4xf32>
    %335 = arith.addf %333, %334 : vector<64x4xf32>
    %336 = vector.shape_cast %335 : vector<64x4xf32> to vector<8x1x8x4xf32>
    %c0_541 = arith.constant 0 : index
    %c0_542 = arith.constant 0 : index
    %c0_543 = arith.constant 0 : index
    %c1_544 = arith.constant 1 : index
    %c0_545 = arith.constant 0 : index
    %c0_546 = arith.constant 0 : index
    %337 = vector.load %arg8[%c0_541, %c0_542, %c0_543, %c1_544, %c0_545, %c0_546] : memref<1x1x8x2x8x8xf32, #tpu.memory_space<vmem>>, vector<1x1x8x1x8x4xf32>
    %338 = vector.shape_cast %337 : vector<1x1x8x1x8x4xf32> to vector<8x1x8x4xf32>
    %339 = vector.shape_cast %336 : vector<8x1x8x4xf32> to vector<1x1x8x1x8x4xf32>
    tpu.vector_store %arg8[%c0_541, %c0_542, %c0_543, %c1_544, %c0_545, %c0_546], %339 {strides = array<i32>} : memref<1x1x8x2x8x8xf32, #tpu.memory_space<vmem>>, vector<1x1x8x1x8x4xf32>,
    %c0_547 = arith.constant 0 : index
    %c0_548 = arith.constant 0 : index
    %c0_549 = arith.constant 0 : index
    %c1_550 = arith.constant 1 : index
    %c1_551 = arith.constant 1 : index
    %c0_552 = arith.constant 0 : index
    %340 = vector.load %arg3[%c0_547, %c0_548, %c0_549, %c1_550, %c1_551, %c0_552] : memref<1x1x1x10x10x4xf32, #tpu.memory_space<vmem>>, vector<1x1x1x8x8x4xf32>
    %341 = vector.shape_cast %340 : vector<1x1x1x8x8x4xf32> to vector<8x8x4xf32>
    %342 = vector.shape_cast %341 : vector<8x8x4xf32> to vector<64x4xf32>
    %c3_553 = arith.constant 3 : index
    %c0_554 = arith.constant 0 : index
    %c0_555 = arith.constant 0 : index
    %c0_556 = arith.constant 0 : index
    %343 = vector.load %arg6[%c3_553, %c0_554, %c0_555, %c0_556] : memref<4x12x4x4xf32, #tpu.memory_space<vmem>>, vector<1x1x4x4xf32>
    %344 = vector.shape_cast %343 : vector<1x1x4x4xf32> to vector<4x4xf32>
    %cst_557 = arith.constant dense<0.000000e+00> : vector<64x4xf32>
    %345 = tpu.matmul %342, %344, %cst_557 {dimension_numbers = #tpu.dot_dimension_numbers<[1], [0], [0], [1], [0, 0, 1, 1], [], []>} : vector<64x4xf32>, vector<4x4xf32>, vector<64x4xf32> -> vector<64x4xf32>
    %c0_558 = arith.constant 0 : index
    %c0_559 = arith.constant 0 : index
    %346 = vector.load %arg9[%c0_558, %c0_559] : memref<64x4xf32, #tpu.memory_space<vmem>>, vector<64x4xf32>
    tpu.vector_store %arg9[%c0_558, %c0_559], %345 {strides = array<i32>} : memref<64x4xf32, #tpu.memory_space<vmem>>, vector<64x4xf32>,
    %c0_560 = arith.constant 0 : index
    %c0_561 = arith.constant 0 : index
    %c0_562 = arith.constant 0 : index
    %c1_563 = arith.constant 1 : index
    %c2_564 = arith.constant 2 : index
    %c0_565 = arith.constant 0 : index
    %347 = vector.load %arg3[%c0_560, %c0_561, %c0_562, %c1_563, %c2_564, %c0_565] : memref<1x1x1x10x10x4xf32, #tpu.memory_space<vmem>>, vector<1x1x1x8x8x4xf32>
    %348 = vector.shape_cast %347 : vector<1x1x1x8x8x4xf32> to vector<8x8x4xf32>
    %349 = vector.shape_cast %348 : vector<8x8x4xf32> to vector<64x4xf32>
    %c3_566 = arith.constant 3 : index
    %c1_567 = arith.constant 1 : index
    %c0_568 = arith.constant 0 : index
    %c0_569 = arith.constant 0 : index
    %350 = vector.load %arg6[%c3_566, %c1_567, %c0_568, %c0_569] : memref<4x12x4x4xf32, #tpu.memory_space<vmem>>, vector<1x1x4x4xf32>
    %351 = vector.shape_cast %350 : vector<1x1x4x4xf32> to vector<4x4xf32>
    %cst_570 = arith.constant dense<0.000000e+00> : vector<64x4xf32>
    %352 = tpu.matmul %349, %351, %cst_570 {dimension_numbers = #tpu.dot_dimension_numbers<[1], [0], [0], [1], [0, 0, 1, 1], [], []>} : vector<64x4xf32>, vector<4x4xf32>, vector<64x4xf32> -> vector<64x4xf32>
    %c0_571 = arith.constant 0 : index
    %c0_572 = arith.constant 0 : index
    %353 = vector.load %arg9[%c0_571, %c0_572] : memref<64x4xf32, #tpu.memory_space<vmem>>, vector<64x4xf32>
    %354 = arith.addf %353, %352 : vector<64x4xf32>
    %c0_573 = arith.constant 0 : index
    %c0_574 = arith.constant 0 : index
    %355 = vector.load %arg9[%c0_573, %c0_574] : memref<64x4xf32, #tpu.memory_space<vmem>>, vector<64x4xf32>
    tpu.vector_store %arg9[%c0_573, %c0_574], %354 {strides = array<i32>} : memref<64x4xf32, #tpu.memory_space<vmem>>, vector<64x4xf32>,
    %c0_575 = arith.constant 0 : index
    %c0_576 = arith.constant 0 : index
    %c0_577 = arith.constant 0 : index
    %c2_578 = arith.constant 2 : index
    %c1_579 = arith.constant 1 : index
    %c0_580 = arith.constant 0 : index
    %356 = vector.load %arg3[%c0_575, %c0_576, %c0_577, %c2_578, %c1_579, %c0_580] : memref<1x1x1x10x10x4xf32, #tpu.memory_space<vmem>>, vector<1x1x1x8x8x4xf32>
    %357 = vector.shape_cast %356 : vector<1x1x1x8x8x4xf32> to vector<8x8x4xf32>
    %358 = vector.shape_cast %357 : vector<8x8x4xf32> to vector<64x4xf32>
    %c3_581 = arith.constant 3 : index
    %c2_582 = arith.constant 2 : index
    %c0_583 = arith.constant 0 : index
    %c0_584 = arith.constant 0 : index
    %359 = vector.load %arg6[%c3_581, %c2_582, %c0_583, %c0_584] : memref<4x12x4x4xf32, #tpu.memory_space<vmem>>, vector<1x1x4x4xf32>
    %360 = vector.shape_cast %359 : vector<1x1x4x4xf32> to vector<4x4xf32>
    %cst_585 = arith.constant dense<0.000000e+00> : vector<64x4xf32>
    %361 = tpu.matmul %358, %360, %cst_585 {dimension_numbers = #tpu.dot_dimension_numbers<[1], [0], [0], [1], [0, 0, 1, 1], [], []>} : vector<64x4xf32>, vector<4x4xf32>, vector<64x4xf32> -> vector<64x4xf32>
    %c0_586 = arith.constant 0 : index
    %c0_587 = arith.constant 0 : index
    %362 = vector.load %arg9[%c0_586, %c0_587] : memref<64x4xf32, #tpu.memory_space<vmem>>, vector<64x4xf32>
    %363 = arith.addf %362, %361 : vector<64x4xf32>
    %c0_588 = arith.constant 0 : index
    %c0_589 = arith.constant 0 : index
    %364 = vector.load %arg9[%c0_588, %c0_589] : memref<64x4xf32, #tpu.memory_space<vmem>>, vector<64x4xf32>
    tpu.vector_store %arg9[%c0_588, %c0_589], %363 {strides = array<i32>} : memref<64x4xf32, #tpu.memory_space<vmem>>, vector<64x4xf32>,
    %c0_590 = arith.constant 0 : index
    %c0_591 = arith.constant 0 : index
    %c0_592 = arith.constant 0 : index
    %c2_593 = arith.constant 2 : index
    %c2_594 = arith.constant 2 : index
    %c0_595 = arith.constant 0 : index
    %365 = vector.load %arg3[%c0_590, %c0_591, %c0_592, %c2_593, %c2_594, %c0_595] : memref<1x1x1x10x10x4xf32, #tpu.memory_space<vmem>>, vector<1x1x1x8x8x4xf32>
    %366 = vector.shape_cast %365 : vector<1x1x1x8x8x4xf32> to vector<8x8x4xf32>
    %367 = vector.shape_cast %366 : vector<8x8x4xf32> to vector<64x4xf32>
    %c3_596 = arith.constant 3 : index
    %c3_597 = arith.constant 3 : index
    %c0_598 = arith.constant 0 : index
    %c0_599 = arith.constant 0 : index
    %368 = vector.load %arg6[%c3_596, %c3_597, %c0_598, %c0_599] : memref<4x12x4x4xf32, #tpu.memory_space<vmem>>, vector<1x1x4x4xf32>
    %369 = vector.shape_cast %368 : vector<1x1x4x4xf32> to vector<4x4xf32>
    %cst_600 = arith.constant dense<0.000000e+00> : vector<64x4xf32>
    %370 = tpu.matmul %367, %369, %cst_600 {dimension_numbers = #tpu.dot_dimension_numbers<[1], [0], [0], [1], [0, 0, 1, 1], [], []>} : vector<64x4xf32>, vector<4x4xf32>, vector<64x4xf32> -> vector<64x4xf32>
    %c0_601 = arith.constant 0 : index
    %c0_602 = arith.constant 0 : index
    %371 = vector.load %arg9[%c0_601, %c0_602] : memref<64x4xf32, #tpu.memory_space<vmem>>, vector<64x4xf32>
    %372 = arith.addf %371, %370 : vector<64x4xf32>
    %c0_603 = arith.constant 0 : index
    %c0_604 = arith.constant 0 : index
    %373 = vector.load %arg9[%c0_603, %c0_604] : memref<64x4xf32, #tpu.memory_space<vmem>>, vector<64x4xf32>
    tpu.vector_store %arg9[%c0_603, %c0_604], %372 {strides = array<i32>} : memref<64x4xf32, #tpu.memory_space<vmem>>, vector<64x4xf32>,
    %c0_605 = arith.constant 0 : index
    %c0_606 = arith.constant 0 : index
    %c0_607 = arith.constant 0 : index
    %c1_608 = arith.constant 1 : index
    %c1_609 = arith.constant 1 : index
    %c0_610 = arith.constant 0 : index
    %374 = vector.load %arg4[%c0_605, %c0_606, %c0_607, %c1_608, %c1_609, %c0_610] : memref<1x1x1x10x10x4xf32, #tpu.memory_space<vmem>>, vector<1x1x1x8x8x4xf32>
    %375 = vector.shape_cast %374 : vector<1x1x1x8x8x4xf32> to vector<8x8x4xf32>
    %376 = vector.shape_cast %375 : vector<8x8x4xf32> to vector<64x4xf32>
    %c3_611 = arith.constant 3 : index
    %c4_612 = arith.constant 4 : index
    %c0_613 = arith.constant 0 : index
    %c0_614 = arith.constant 0 : index
    %377 = vector.load %arg6[%c3_611, %c4_612, %c0_613, %c0_614] : memref<4x12x4x4xf32, #tpu.memory_space<vmem>>, vector<1x1x4x4xf32>
    %378 = vector.shape_cast %377 : vector<1x1x4x4xf32> to vector<4x4xf32>
    %cst_615 = arith.constant dense<0.000000e+00> : vector<64x4xf32>
    %379 = tpu.matmul %376, %378, %cst_615 {dimension_numbers = #tpu.dot_dimension_numbers<[1], [0], [0], [1], [0, 0, 1, 1], [], []>} : vector<64x4xf32>, vector<4x4xf32>, vector<64x4xf32> -> vector<64x4xf32>
    %c0_616 = arith.constant 0 : index
    %c0_617 = arith.constant 0 : index
    %380 = vector.load %arg9[%c0_616, %c0_617] : memref<64x4xf32, #tpu.memory_space<vmem>>, vector<64x4xf32>
    %381 = arith.addf %380, %379 : vector<64x4xf32>
    %c0_618 = arith.constant 0 : index
    %c0_619 = arith.constant 0 : index
    %382 = vector.load %arg9[%c0_618, %c0_619] : memref<64x4xf32, #tpu.memory_space<vmem>>, vector<64x4xf32>
    tpu.vector_store %arg9[%c0_618, %c0_619], %381 {strides = array<i32>} : memref<64x4xf32, #tpu.memory_space<vmem>>, vector<64x4xf32>,
    %c0_620 = arith.constant 0 : index
    %c0_621 = arith.constant 0 : index
    %c0_622 = arith.constant 0 : index
    %c1_623 = arith.constant 1 : index
    %c2_624 = arith.constant 2 : index
    %c0_625 = arith.constant 0 : index
    %383 = vector.load %arg4[%c0_620, %c0_621, %c0_622, %c1_623, %c2_624, %c0_625] : memref<1x1x1x10x10x4xf32, #tpu.memory_space<vmem>>, vector<1x1x1x8x8x4xf32>
    %384 = vector.shape_cast %383 : vector<1x1x1x8x8x4xf32> to vector<8x8x4xf32>
    %385 = vector.shape_cast %384 : vector<8x8x4xf32> to vector<64x4xf32>
    %c3_626 = arith.constant 3 : index
    %c5_627 = arith.constant 5 : index
    %c0_628 = arith.constant 0 : index
    %c0_629 = arith.constant 0 : index
    %386 = vector.load %arg6[%c3_626, %c5_627, %c0_628, %c0_629] : memref<4x12x4x4xf32, #tpu.memory_space<vmem>>, vector<1x1x4x4xf32>
    %387 = vector.shape_cast %386 : vector<1x1x4x4xf32> to vector<4x4xf32>
    %cst_630 = arith.constant dense<0.000000e+00> : vector<64x4xf32>
    %388 = tpu.matmul %385, %387, %cst_630 {dimension_numbers = #tpu.dot_dimension_numbers<[1], [0], [0], [1], [0, 0, 1, 1], [], []>} : vector<64x4xf32>, vector<4x4xf32>, vector<64x4xf32> -> vector<64x4xf32>
    %c0_631 = arith.constant 0 : index
    %c0_632 = arith.constant 0 : index
    %389 = vector.load %arg9[%c0_631, %c0_632] : memref<64x4xf32, #tpu.memory_space<vmem>>, vector<64x4xf32>
    %390 = arith.addf %389, %388 : vector<64x4xf32>
    %c0_633 = arith.constant 0 : index
    %c0_634 = arith.constant 0 : index
    %391 = vector.load %arg9[%c0_633, %c0_634] : memref<64x4xf32, #tpu.memory_space<vmem>>, vector<64x4xf32>
    tpu.vector_store %arg9[%c0_633, %c0_634], %390 {strides = array<i32>} : memref<64x4xf32, #tpu.memory_space<vmem>>, vector<64x4xf32>,
    %c0_635 = arith.constant 0 : index
    %c0_636 = arith.constant 0 : index
    %c0_637 = arith.constant 0 : index
    %c2_638 = arith.constant 2 : index
    %c1_639 = arith.constant 1 : index
    %c0_640 = arith.constant 0 : index
    %392 = vector.load %arg4[%c0_635, %c0_636, %c0_637, %c2_638, %c1_639, %c0_640] : memref<1x1x1x10x10x4xf32, #tpu.memory_space<vmem>>, vector<1x1x1x8x8x4xf32>
    %393 = vector.shape_cast %392 : vector<1x1x1x8x8x4xf32> to vector<8x8x4xf32>
    %394 = vector.shape_cast %393 : vector<8x8x4xf32> to vector<64x4xf32>
    %c3_641 = arith.constant 3 : index
    %c6_642 = arith.constant 6 : index
    %c0_643 = arith.constant 0 : index
    %c0_644 = arith.constant 0 : index
    %395 = vector.load %arg6[%c3_641, %c6_642, %c0_643, %c0_644] : memref<4x12x4x4xf32, #tpu.memory_space<vmem>>, vector<1x1x4x4xf32>
    %396 = vector.shape_cast %395 : vector<1x1x4x4xf32> to vector<4x4xf32>
    %cst_645 = arith.constant dense<0.000000e+00> : vector<64x4xf32>
    %397 = tpu.matmul %394, %396, %cst_645 {dimension_numbers = #tpu.dot_dimension_numbers<[1], [0], [0], [1], [0, 0, 1, 1], [], []>} : vector<64x4xf32>, vector<4x4xf32>, vector<64x4xf32> -> vector<64x4xf32>
    %c0_646 = arith.constant 0 : index
    %c0_647 = arith.constant 0 : index
    %398 = vector.load %arg9[%c0_646, %c0_647] : memref<64x4xf32, #tpu.memory_space<vmem>>, vector<64x4xf32>
    %399 = arith.addf %398, %397 : vector<64x4xf32>
    %c0_648 = arith.constant 0 : index
    %c0_649 = arith.constant 0 : index
    %400 = vector.load %arg9[%c0_648, %c0_649] : memref<64x4xf32, #tpu.memory_space<vmem>>, vector<64x4xf32>
    tpu.vector_store %arg9[%c0_648, %c0_649], %399 {strides = array<i32>} : memref<64x4xf32, #tpu.memory_space<vmem>>, vector<64x4xf32>,
    %c0_650 = arith.constant 0 : index
    %c0_651 = arith.constant 0 : index
    %c0_652 = arith.constant 0 : index
    %c2_653 = arith.constant 2 : index
    %c2_654 = arith.constant 2 : index
    %c0_655 = arith.constant 0 : index
    %401 = vector.load %arg4[%c0_650, %c0_651, %c0_652, %c2_653, %c2_654, %c0_655] : memref<1x1x1x10x10x4xf32, #tpu.memory_space<vmem>>, vector<1x1x1x8x8x4xf32>
    %402 = vector.shape_cast %401 : vector<1x1x1x8x8x4xf32> to vector<8x8x4xf32>
    %403 = vector.shape_cast %402 : vector<8x8x4xf32> to vector<64x4xf32>
    %c3_656 = arith.constant 3 : index
    %c7_657 = arith.constant 7 : index
    %c0_658 = arith.constant 0 : index
    %c0_659 = arith.constant 0 : index
    %404 = vector.load %arg6[%c3_656, %c7_657, %c0_658, %c0_659] : memref<4x12x4x4xf32, #tpu.memory_space<vmem>>, vector<1x1x4x4xf32>
    %405 = vector.shape_cast %404 : vector<1x1x4x4xf32> to vector<4x4xf32>
    %cst_660 = arith.constant dense<0.000000e+00> : vector<64x4xf32>
    %406 = tpu.matmul %403, %405, %cst_660 {dimension_numbers = #tpu.dot_dimension_numbers<[1], [0], [0], [1], [0, 0, 1, 1], [], []>} : vector<64x4xf32>, vector<4x4xf32>, vector<64x4xf32> -> vector<64x4xf32>
    %c0_661 = arith.constant 0 : index
    %c0_662 = arith.constant 0 : index
    %407 = vector.load %arg9[%c0_661, %c0_662] : memref<64x4xf32, #tpu.memory_space<vmem>>, vector<64x4xf32>
    %408 = arith.addf %407, %406 : vector<64x4xf32>
    %c0_663 = arith.constant 0 : index
    %c0_664 = arith.constant 0 : index
    %409 = vector.load %arg9[%c0_663, %c0_664] : memref<64x4xf32, #tpu.memory_space<vmem>>, vector<64x4xf32>
    tpu.vector_store %arg9[%c0_663, %c0_664], %408 {strides = array<i32>} : memref<64x4xf32, #tpu.memory_space<vmem>>, vector<64x4xf32>,
    %c0_665 = arith.constant 0 : index
    %c0_666 = arith.constant 0 : index
    %c0_667 = arith.constant 0 : index
    %c1_668 = arith.constant 1 : index
    %c1_669 = arith.constant 1 : index
    %c0_670 = arith.constant 0 : index
    %410 = vector.load %arg5[%c0_665, %c0_666, %c0_667, %c1_668, %c1_669, %c0_670] : memref<1x1x1x10x10x4xf32, #tpu.memory_space<vmem>>, vector<1x1x1x8x8x4xf32>
    %411 = vector.shape_cast %410 : vector<1x1x1x8x8x4xf32> to vector<8x8x4xf32>
    %412 = vector.shape_cast %411 : vector<8x8x4xf32> to vector<64x4xf32>
    %c3_671 = arith.constant 3 : index
    %c8_672 = arith.constant 8 : index
    %c0_673 = arith.constant 0 : index
    %c0_674 = arith.constant 0 : index
    %413 = vector.load %arg6[%c3_671, %c8_672, %c0_673, %c0_674] : memref<4x12x4x4xf32, #tpu.memory_space<vmem>>, vector<1x1x4x4xf32>
    %414 = vector.shape_cast %413 : vector<1x1x4x4xf32> to vector<4x4xf32>
    %cst_675 = arith.constant dense<0.000000e+00> : vector<64x4xf32>
    %415 = tpu.matmul %412, %414, %cst_675 {dimension_numbers = #tpu.dot_dimension_numbers<[1], [0], [0], [1], [0, 0, 1, 1], [], []>} : vector<64x4xf32>, vector<4x4xf32>, vector<64x4xf32> -> vector<64x4xf32>
    %c0_676 = arith.constant 0 : index
    %c0_677 = arith.constant 0 : index
    %416 = vector.load %arg9[%c0_676, %c0_677] : memref<64x4xf32, #tpu.memory_space<vmem>>, vector<64x4xf32>
    %417 = arith.addf %416, %415 : vector<64x4xf32>
    %c0_678 = arith.constant 0 : index
    %c0_679 = arith.constant 0 : index
    %418 = vector.load %arg9[%c0_678, %c0_679] : memref<64x4xf32, #tpu.memory_space<vmem>>, vector<64x4xf32>
    tpu.vector_store %arg9[%c0_678, %c0_679], %417 {strides = array<i32>} : memref<64x4xf32, #tpu.memory_space<vmem>>, vector<64x4xf32>,
    %c0_680 = arith.constant 0 : index
    %c0_681 = arith.constant 0 : index
    %c0_682 = arith.constant 0 : index
    %c1_683 = arith.constant 1 : index
    %c2_684 = arith.constant 2 : index
    %c0_685 = arith.constant 0 : index
    %419 = vector.load %arg5[%c0_680, %c0_681, %c0_682, %c1_683, %c2_684, %c0_685] : memref<1x1x1x10x10x4xf32, #tpu.memory_space<vmem>>, vector<1x1x1x8x8x4xf32>
    %420 = vector.shape_cast %419 : vector<1x1x1x8x8x4xf32> to vector<8x8x4xf32>
    %421 = vector.shape_cast %420 : vector<8x8x4xf32> to vector<64x4xf32>
    %c3_686 = arith.constant 3 : index
    %c9_687 = arith.constant 9 : index
    %c0_688 = arith.constant 0 : index
    %c0_689 = arith.constant 0 : index
    %422 = vector.load %arg6[%c3_686, %c9_687, %c0_688, %c0_689] : memref<4x12x4x4xf32, #tpu.memory_space<vmem>>, vector<1x1x4x4xf32>
    %423 = vector.shape_cast %422 : vector<1x1x4x4xf32> to vector<4x4xf32>
    %cst_690 = arith.constant dense<0.000000e+00> : vector<64x4xf32>
    %424 = tpu.matmul %421, %423, %cst_690 {dimension_numbers = #tpu.dot_dimension_numbers<[1], [0], [0], [1], [0, 0, 1, 1], [], []>} : vector<64x4xf32>, vector<4x4xf32>, vector<64x4xf32> -> vector<64x4xf32>
    %c0_691 = arith.constant 0 : index
    %c0_692 = arith.constant 0 : index
    %425 = vector.load %arg9[%c0_691, %c0_692] : memref<64x4xf32, #tpu.memory_space<vmem>>, vector<64x4xf32>
    %426 = arith.addf %425, %424 : vector<64x4xf32>
    %c0_693 = arith.constant 0 : index
    %c0_694 = arith.constant 0 : index
    %427 = vector.load %arg9[%c0_693, %c0_694] : memref<64x4xf32, #tpu.memory_space<vmem>>, vector<64x4xf32>
    tpu.vector_store %arg9[%c0_693, %c0_694], %426 {strides = array<i32>} : memref<64x4xf32, #tpu.memory_space<vmem>>, vector<64x4xf32>,
    %c0_695 = arith.constant 0 : index
    %c0_696 = arith.constant 0 : index
    %c0_697 = arith.constant 0 : index
    %c2_698 = arith.constant 2 : index
    %c1_699 = arith.constant 1 : index
    %c0_700 = arith.constant 0 : index
    %428 = vector.load %arg5[%c0_695, %c0_696, %c0_697, %c2_698, %c1_699, %c0_700] : memref<1x1x1x10x10x4xf32, #tpu.memory_space<vmem>>, vector<1x1x1x8x8x4xf32>
    %429 = vector.shape_cast %428 : vector<1x1x1x8x8x4xf32> to vector<8x8x4xf32>
    %430 = vector.shape_cast %429 : vector<8x8x4xf32> to vector<64x4xf32>
    %c3_701 = arith.constant 3 : index
    %c10_702 = arith.constant 10 : index
    %c0_703 = arith.constant 0 : index
    %c0_704 = arith.constant 0 : index
    %431 = vector.load %arg6[%c3_701, %c10_702, %c0_703, %c0_704] : memref<4x12x4x4xf32, #tpu.memory_space<vmem>>, vector<1x1x4x4xf32>
    %432 = vector.shape_cast %431 : vector<1x1x4x4xf32> to vector<4x4xf32>
    %cst_705 = arith.constant dense<0.000000e+00> : vector<64x4xf32>
    %433 = tpu.matmul %430, %432, %cst_705 {dimension_numbers = #tpu.dot_dimension_numbers<[1], [0], [0], [1], [0, 0, 1, 1], [], []>} : vector<64x4xf32>, vector<4x4xf32>, vector<64x4xf32> -> vector<64x4xf32>
    %c0_706 = arith.constant 0 : index
    %c0_707 = arith.constant 0 : index
    %434 = vector.load %arg9[%c0_706, %c0_707] : memref<64x4xf32, #tpu.memory_space<vmem>>, vector<64x4xf32>
    %435 = arith.addf %434, %433 : vector<64x4xf32>
    %c0_708 = arith.constant 0 : index
    %c0_709 = arith.constant 0 : index
    %436 = vector.load %arg9[%c0_708, %c0_709] : memref<64x4xf32, #tpu.memory_space<vmem>>, vector<64x4xf32>
    tpu.vector_store %arg9[%c0_708, %c0_709], %435 {strides = array<i32>} : memref<64x4xf32, #tpu.memory_space<vmem>>, vector<64x4xf32>,
    %c0_710 = arith.constant 0 : index
    %c0_711 = arith.constant 0 : index
    %c0_712 = arith.constant 0 : index
    %c2_713 = arith.constant 2 : index
    %c2_714 = arith.constant 2 : index
    %c0_715 = arith.constant 0 : index
    %437 = vector.load %arg5[%c0_710, %c0_711, %c0_712, %c2_713, %c2_714, %c0_715] : memref<1x1x1x10x10x4xf32, #tpu.memory_space<vmem>>, vector<1x1x1x8x8x4xf32>
    %438 = vector.shape_cast %437 : vector<1x1x1x8x8x4xf32> to vector<8x8x4xf32>
    %439 = vector.shape_cast %438 : vector<8x8x4xf32> to vector<64x4xf32>
    %c3_716 = arith.constant 3 : index
    %c11_717 = arith.constant 11 : index
    %c0_718 = arith.constant 0 : index
    %c0_719 = arith.constant 0 : index
    %440 = vector.load %arg6[%c3_716, %c11_717, %c0_718, %c0_719] : memref<4x12x4x4xf32, #tpu.memory_space<vmem>>, vector<1x1x4x4xf32>
    %441 = vector.shape_cast %440 : vector<1x1x4x4xf32> to vector<4x4xf32>
    %cst_720 = arith.constant dense<0.000000e+00> : vector<64x4xf32>
    %442 = tpu.matmul %439, %441, %cst_720 {dimension_numbers = #tpu.dot_dimension_numbers<[1], [0], [0], [1], [0, 0, 1, 1], [], []>} : vector<64x4xf32>, vector<4x4xf32>, vector<64x4xf32> -> vector<64x4xf32>
    %c0_721 = arith.constant 0 : index
    %c0_722 = arith.constant 0 : index
    %443 = vector.load %arg9[%c0_721, %c0_722] : memref<64x4xf32, #tpu.memory_space<vmem>>, vector<64x4xf32>
    %444 = arith.addf %443, %442 : vector<64x4xf32>
    %c0_723 = arith.constant 0 : index
    %c0_724 = arith.constant 0 : index
    %445 = vector.load %arg9[%c0_723, %c0_724] : memref<64x4xf32, #tpu.memory_space<vmem>>, vector<64x4xf32>
    tpu.vector_store %arg9[%c0_723, %c0_724], %444 {strides = array<i32>} : memref<64x4xf32, #tpu.memory_space<vmem>>, vector<64x4xf32>,
    %c0_725 = arith.constant 0 : index
    %c0_726 = arith.constant 0 : index
    %446 = vector.load %arg9[%c0_725, %c0_726] : memref<64x4xf32, #tpu.memory_space<vmem>>, vector<64x4xf32>
    %447 = vector.broadcast %0 : vector<1x4xf32> to vector<64x4xf32>
    %448 = arith.addf %446, %447 : vector<64x4xf32>
    %449 = vector.shape_cast %448 : vector<64x4xf32> to vector<8x1x8x4xf32>
    %c0_727 = arith.constant 0 : index
    %c0_728 = arith.constant 0 : index
    %c0_729 = arith.constant 0 : index
    %c1_730 = arith.constant 1 : index
    %c0_731 = arith.constant 0 : index
    %c4_732 = arith.constant 4 : index
    %450 = vector.load %arg8[%c0_727, %c0_728, %c0_729, %c1_730, %c0_731, %c4_732] : memref<1x1x8x2x8x8xf32, #tpu.memory_space<vmem>>, vector<1x1x8x1x8x4xf32>
    %451 = vector.shape_cast %450 : vector<1x1x8x1x8x4xf32> to vector<8x1x8x4xf32>
    %452 = vector.shape_cast %449 : vector<8x1x8x4xf32> to vector<1x1x8x1x8x4xf32>
    tpu.vector_store %arg8[%c0_727, %c0_728, %c0_729, %c1_730, %c0_731, %c4_732], %452 {strides = array<i32>} : memref<1x1x8x2x8x8xf32, #tpu.memory_space<vmem>>, vector<1x1x8x1x8x4xf32>,
    return
  }
  func.func @transform_0(%arg0: i32, %arg1: i32, %arg2: i32) -> (i32, i32, i32, i32, i32, i32) {
    %c0_i32 = arith.constant 0 : i32
    %0 = arith.addi %arg1, %c0_i32 : i32
    %c0_i32_0 = arith.constant 0 : i32
    %c0_i32_1 = arith.constant 0 : i32
    %c0_i32_2 = arith.constant 0 : i32
    %c0_i32_3 = arith.constant 0 : i32
    return %arg0, %0, %arg2, %c0_i32_0, %c0_i32_1, %c0_i32_2 : i32, i32, i32, i32, i32, i32
  }
  func.func @transform_1(%arg0: i32, %arg1: i32, %arg2: i32) -> (i32, i32, i32, i32, i32, i32) {
    %c1_i32 = arith.constant 1 : i32
    %0 = arith.addi %arg1, %c1_i32 : i32
    %c0_i32 = arith.constant 0 : i32
    %c0_i32_0 = arith.constant 0 : i32
    %c0_i32_1 = arith.constant 0 : i32
    %c0_i32_2 = arith.constant 0 : i32
    return %arg0, %0, %arg2, %c0_i32, %c0_i32_0, %c0_i32_1 : i32, i32, i32, i32, i32, i32
  }
  func.func @transform_2(%arg0: i32, %arg1: i32, %arg2: i32) -> (i32, i32, i32, i32, i32, i32) {
    %c2_i32 = arith.constant 2 : i32
    %0 = arith.addi %arg1, %c2_i32 : i32
    %c0_i32 = arith.constant 0 : i32
    %c0_i32_0 = arith.constant 0 : i32
    %c0_i32_1 = arith.constant 0 : i32
    %c0_i32_2 = arith.constant 0 : i32
    return %arg0, %0, %arg2, %c0_i32, %c0_i32_0, %c0_i32_1 : i32, i32, i32, i32, i32, i32
  }
  func.func @transform_3(%arg0: i32, %arg1: i32, %arg2: i32) -> (i32, i32, i32, i32) {
    %c0_i32 = arith.constant 0 : i32
    %c0_i32_0 = arith.constant 0 : i32
    %c0_i32_1 = arith.constant 0 : i32
    %c0_i32_2 = arith.constant 0 : i32
    %c0_i32_3 = arith.constant 0 : i32
    return %c0_i32, %c0_i32_0, %c0_i32_1, %c0_i32_2 : i32, i32, i32, i32
  }
  func.func @transform_4(%arg0: i32, %arg1: i32, %arg2: i32) -> (i32, i32) {
    %c0_i32 = arith.constant 0 : i32
    %c0_i32_0 = arith.constant 0 : i32
    %c0_i32_1 = arith.constant 0 : i32
    return %c0_i32, %c0_i32_0 : i32, i32
  }
  func.func @transform_5(%arg0: i32, %arg1: i32, %arg2: i32) -> (i32, i32, i32, i32, i32, i32) {
    %c0_i32 = arith.constant 0 : i32
    %c0_i32_0 = arith.constant 0 : i32
    %c0_i32_1 = arith.constant 0 : i32
    %c0_i32_2 = arith.constant 0 : i32
    return %arg0, %arg1, %arg2, %c0_i32, %c0_i32_0, %c0_i32_1 : i32, i32, i32, i32, i32, i32
  }
}

</mosaic_0001>

<bundles_post_ra>
// kernel: tpu_custom_call.1
= control target key start
LH: loop header
LB: loop body
LE: loop exit
PB: predicated region body
PF: predicated region fallthrough
CT: control target
= control target key end

     0   :  { %10 = vsyncpa [#allocation4], 0  ;;  %s8273_s0 = inlined_call_operand.vmem [shape: f32[2,6,1,10,10,4], index: 0, kind: input, shape index: {}]   ;;  %s8274_s1 = inlined_call_operand.vmem [shape: f32[2,6,1,10,10,4], index: 1, kind: input, shape index: {}]   ;;  %s8275_s2 = inlined_call_operand.vmem [shape: f32[2,6,1,10,10,4], index: 2, kind: input, shape index: {}]   ;;  %s8276_s3 = inlined_call_operand.vmem [shape: f32[4,12,4,4], index: 3, kind: input, shape index: {}]   ;;  %s8277_s4 = inlined_call_operand.vmem [shape: f32[1,4], index: 4, kind: input, shape index: {}]   ;;  %s8278_s5 = inlined_call_operand.hbm [shape: f32[2,4,8,2,8,8], index: 5, kind: output, shape index: {}]  }
   0x1   :  { %12 = vsyncpa [#allocation4 + $0x1], 0  ;;  %s6570_s18 = smov 0   ;;  %s6572_s19 = smov 0  }
   0x2   :  { %s6574_s20 = smov 0   ;;  %s6576_s21 = smov 0  }
   0x3   :  { %s6578_s22 = smov 0   ;;  %s6580_s23 = smov 0  }
   0x4   :  { %s6582_s24 = smov 0   ;;  %s6584_s25 = smov 0  }
   0x5 LB: > { %s5561_s26 = sadd.s32 4294967295, %s6535_s25   ;;  %s5562_s27 = sadd.s32 4294967294, %s6535_s25   ;;  %s6535_s25 = sphi %s6584_s25, %s18_s25   ;;  %s6531_s24 = sphi %s6582_s24, %s8287_s24   ;;  %s6527_s23 = sphi %s6580_s23, %s8286_s23   ;;  %s6523_s22 = sphi %s6578_s22, %s8285_s22   ;;  %s6519_s21 = sphi %s6576_s21, %s8284_s21   ;;  %s6515_s20 = sphi %s6574_s20, %s8283_s20   ;;  %s6511_s19 = sphi %s6572_s19, %s8282_s19   ;;  %s6507_s18 = sphi %s6570_s18, %s8281_s18  }
   0x6   : > { %s33_s28 = sadd.s32 1, %s6527_s23  ;;  %s37_s29 = sadd.s32 1, %s6531_s24 }
   0x7   : > { %p35_p0 = scmp.ge.s32.totalorder %s33_s28, 4  ;;  %p194_p1 = scmp.ne.s32.totalorder %s6515_s20, %s6511_s19 }
   0x8   : > { %p195_p2 = scmp.eq.s32.totalorder %s5561_s26, 7  ;;  %p200_p5 = scmp.ne.s32.totalorder %s6511_s19, %s6507_s18 }
   0x9   : > { %s8289_s28 = smov (%p35_p0, %s33_s28), 0  ;;  %s8291_s29 = smov (!%p35_p0, %s37_s29), %s6531_s24 }
   0xa   : > { %s178_s30 = ssub.s32 %s6527_s23, %s8289_s28  ;;  %p6621_p3 = por %p195_p2, %p194_p1 }
   0xb   : > { %p39_p4 = scmp.ge.s32.totalorder %s8291_s29, 2  ;;  %p201_p6 = scmp.eq.s32.totalorder %s5562_s27, 7 }
   0xc   : > { %p5565_p7 = scmp.ge.s32.totalorder %s6535_s25, 1  ;;  %p277_p9 = scmp.lt.s32.totalorder %s6535_s25, 9 }
   0xd   : > { %s8293_s29 = smov (%p39_p4, %s8291_s29), 0  ;;  %p6630_p8 = por %p201_p6, %p200_p5 }
   0xe   : > { %s177_s8 = ssub.s32 %s6531_s24, %s8293_s29  ;;  %s184_s9 = sadd.s32 1, %s6515_s20 }
   0xf   : > { %s179_s10 = sor.u32 %s178_s30, %s177_s8  ;;  %p278_p10 = pnand %p5565_p7, %p277_p9 }
  0x10   : > { %p182_p11 = scmp.eq.s32.totalorder %s179_s10, 0  ;;  %p341_p12 = scmp.lt.s32.totalorder (!%p278_p10), %s6523_s22, 1 }
  0x11   : > { %281 = sbr.rel (%p278_p10) target bundleno = 1079 (0x437), region = 40  ;;  %p343_p13 = scmp.lt.s32.totalorder (!%p278_p10), %s6519_s21, 5 }
  0x12   : > { %s6639_s11 = scalar_select %p182_p11, %s6515_s20, %s184_s9  }
  0x13   : > { %s354_s15 = sadd.s32 (!%p278_p10), 1, %s6519_s21 }
  0x14   : > { %p357_p0 = scmp.lt.s32.totalorder (!%p278_p10), %s354_s15, 5 }
  0x16   : > { %v394_v0 = vld [vmem:[%s8276_s3] sm:$0xf]  ;;  %vm420_vm0 = vcmask 1043456   ;;  %v5625_v1 = vld [vmem:[%s8276_s3 + $0x10] sm:$0xf]  ;;  %s342_s30 = scalar_select %p341_p12, %s6523_s22, 1 }
  0x17   : > { %5570 = vmatpush.msk.msra.mxu0 %vm420_vm0, %v394_v0  ;;  %v5579_v2 = vld [vmem:[%s8276_s3 + $0x4] sm:$0xf]  ;;  %v5635_v3 = vld [vmem:[%s8276_s3 + $0x14] sm:$0xf]  ;;  %v5597_v4 = vld [vmem:[%s8276_s3 + $0x8] sm:$0xf] }
  0x18   : > { %5580 = vmatpush.msk.msra.mxu1 %vm420_vm0, %v5579_v2  ;;  %v5653_v5 = vld [vmem:[%s8276_s3 + $0x18] sm:$0xf]  ;;  %s344_s13 = scalar_select %p343_p13, %s6519_s21, 5  ;;  %5598 = vmatpush.msk.msra.mxu2 %vm420_vm0, %v5597_v4  ;;  %v5615_v6 = vld [vmem:[%s8276_s3 + $0xc] sm:$0xf]  ;;  %vm395_vm1 = vcmask 31744  }
  0x19   : > { %5626 = vmatpush.msk.msrb.mxu0 %vm420_vm0, %v5625_v1  ;;  %v5671_v7 = vld [vmem:[%s8276_s3 + $0x1c] sm:$0xf]  ;;  %s6674_s26 = smul.u32 120, %s342_s30  ;;  %5616 = vmatpush.msk.msra.mxu3 %vm420_vm0, %v5615_v6  ;;  %v5681_v20 = vld [vmem:[%s8276_s3 + $0x20] sm:$0xf]  ;;  %s8295_s15 = smov (!%p357_p0, %s354_s15), 5 }
  0x1a   : > { %5636 = vmatpush.msk.msrb.mxu1 %vm420_vm0, %v5635_v3  ;;  %5654 = vmatpush.msk.msrb.mxu2 %vm420_vm0, %v5653_v5  ;;  %s6359_s27 = smul.u32 20, %s344_s13  ;;  %v5691_v23 = vld [vmem:[%s8276_s3 + $0x24] sm:$0xf]  ;;  %v5709_v24 = vld [vmem:[%s8276_s3 + $0x28] sm:$0xf]  ;;  %vm2881_vm2 = vcmask 64544  }
  0x1b   : > { %5672 = vmatpush.msk.msrb.mxu3 %vm420_vm0, %v5671_v7  ;;  %v5727_v29 = vld [vmem:[%s8276_s3 + $0x2c] sm:$0xf]  ;;  %v5737_v42 = vld [vmem:[%s8276_s3 + $0x30] sm:$0xf]  ;;  %v5747_v45 = vld [vmem:[%s8276_s3 + $0x34] sm:$0xf] }
  0x1c   : > { %s351_s8 = sadd.s32 %s6674_s26, %s6359_s27  ;;  %v5765_v48 = vld [vmem:[%s8276_s3 + $0x38] sm:$0xf]  ;;  %v5783_v51 = vld [vmem:[%s8276_s3 + $0x3c] sm:$0xf] }
  0x1d   : > { %s5567_s9 = sshll.u32 %s351_s8, 3 }
  0x1e   : > { %s6683_s14 = scalar_lea.vmem %s8273_s0, %s5567_s9  ;;  %s6361_s9 = smul.u32 20, %s8295_s15 }
  0x1f   : > { %v386_v8 = vld [vmem:[%s6683_s14] sm:$0xff]  ;;  %v387_v10 = vld [vmem:[%s6683_s14 + $0x10] sm:$0xff]  ;;  %s6537_s15 = smov 4  }
  0x20   : > { %v6687_v9 = vld [vmem:[%s6683_s14 + $0x1] sm:$0xff]  ;;  %5571 = vmatmul.msk.f32.vlgmr.msra.gmra.mxu0 %vm395_vm1, %v386_v8  ;;  %v6694_v11 = vld [vmem:[%s6683_s14 + $0x11] sm:$0xff]  ;;  %5599 = vmatmul.msk.f32.vlgmr.msra.gmra.mxu2 %vm395_vm1, %v387_v10  ;;  %s365_s10 = sadd.s32 %s6361_s9, %s6674_s26  ;;  %s369_s9 = sadd.s32 2, %s6519_s21 }
  0x21   : > { %5581 = vmatmul.msk.f32.vlgmr.msra.gmra.mxu1 %vm395_vm1, %v6687_v9  ;;  %5617 = vmatmul.msk.f32.vlgmr.msra.gmra.mxu3 %vm395_vm1, %v6694_v11  ;;  %v388_v12 = vld [vmem:[%s6683_s14 + $0x20] sm:$0xff]  ;;  %v389_v14 = vld [vmem:[%s6683_s14 + $0x30] sm:$0xff]  ;;  %s5568_s12 = sshll.u32 %s365_s10, 3  ;;  %p372_p1 = scmp.lt.s32.totalorder %s369_s9, 5 }
  0x22   : > { %v6704_v13 = vld [vmem:[%s6683_s14 + $0x21] sm:$0xff]  ;;  %v6714_v15 = vld [vmem:[%s6683_s14 + $0x31] sm:$0xff]  ;;  %5682 = vmatpush.msk.msra.mxu0 %vm420_vm0, %v5681_v20  ;;  %5692 = vmatpush.msk.msra.mxu1 %vm420_vm0, %v5691_v23  ;;  %s6789_s17 = scalar_lea.vmem %s8274_s1, %s5568_s12  ;;  %s338_s12 = sand.u32 1, %s6511_s19  }
  0x23   : > { %v390_v16 = vld [vmem:[%s6683_s14 + $0x40] sm:$0xff]  ;;  %v391_v18 = vld [vmem:[%s6683_s14 + $0x50] sm:$0xff]  ;;  %5710 = vmatpush.msk.msra.mxu2 %vm420_vm0, %v5709_v24  ;;  %5728 = vmatpush.msk.msra.mxu3 %vm420_vm0, %v5727_v29  ;;  %s8297_s9 = smov (!%p372_p1, %s369_s9), 5 }
  0x24   : > { %v6724_v17 = vld [vmem:[%s6683_s14 + $0x41] sm:$0xff]  ;;  %v6734_v19 = vld [vmem:[%s6683_s14 + $0x51] sm:$0xff]  ;;  %s6362_s30 = smul.u32 20, %s8297_s9 }
  0x25   : > { %v392_v21 = vld [vmem:[%s6683_s14 + $0x60] sm:$0xff]  ;;  %v393_v25 = vld [vmem:[%s6683_s14 + $0x70] sm:$0xff] }
  0x26   : > { %v6749_v22 = vld [vmem:[%s6683_s14 + $0x61] sm:$0xff]  ;;  %v6767_v26 = vld [vmem:[%s6683_s14 + $0x71] sm:$0xff]  ;;  %s380_s16 = sadd.s32 %s6362_s30, %s6674_s26  ;;  %s5566_s30 = sshll.u32 %s338_s12, 7 }
  0x27   : > { %v5596_v27 = vld [vmem:[%s6683_s14 + $0x80] sm:$0xff]  ;;  %v781_v32 = vld [vmem:[%s6789_s17 + $0x10] sm:$0xff]  ;;  %s5569_s27 = sshll.u32 %s380_s16, 3 }
  0x28   : > { %5572 = vmatmul.msk.f32.gmra.mxu0 %vm395_vm1, %v387_v10  ;;  %5600 = vmatmul.msk.f32.gmra.mxu2 %vm395_vm1, %v388_v12  ;;  %v6775_v28 = vld [vmem:[%s6683_s14 + $0x81] sm:$0xff]  ;;  %v6801_v33 = vld [vmem:[%s6789_s17 + $0x11] sm:$0xff]  ;;  %s6878_s10 = scalar_lea.vmem %s8275_s2, %s5569_s27  ;;  %s7187_s27 = scalar_lea.vmem [#allocation3], %s5566_s30 }
  0x29   : > { %5582 = vmatmul.msk.f32.gmra.mxu1 %vm395_vm1, %v6694_v11  ;;  %5618 = vmatmul.msk.f32.gmra.mxu3 %vm395_vm1, %v6704_v13  ;;  %v780_v30 = vld [vmem:[%s6789_s17] sm:$0xff]  ;;  %v783_v36 = vld [vmem:[%s6789_s17 + $0x30] sm:$0xff]  ;;  %s6355_s30 = sshll.u32 %s6523_s22, 6  ;;  %s5408_s26 = sshll.u32 %s7187_s27, 4  ;;  %s5409_s26 = int_to_ptr.vmem [resolvable:$true] %s5408_s26 }
  0x2a   : > { %v6794_v31 = vld [vmem:[%s6789_s17 + $0x1] sm:$0xff]  ;;  %v6821_v37 = vld [vmem:[%s6789_s17 + $0x31] sm:$0xff] }
  0x2b   : > { %v782_v34 = vld [vmem:[%s6789_s17 + $0x20] sm:$0xff]  ;;  %v785_v40 = vld [vmem:[%s6789_s17 + $0x50] sm:$0xff] }
  0x2c   : > { %v6811_v35 = vld [vmem:[%s6789_s17 + $0x21] sm:$0xff]  ;;  %v887_v41 = vld [vmem:[%s6789_s17 + $0x51] sm:$0xff] }
  0x2d   : > { %v784_v38 = vld [vmem:[%s6789_s17 + $0x40] sm:$0xff]  ;;  %v787_v46 = vld [vmem:[%s6789_s17 + $0x70] sm:$0xff] }
  0x2e   : > { %v6831_v39 = vld [vmem:[%s6789_s17 + $0x41] sm:$0xff]  ;;  %v889_v47 = vld [vmem:[%s6789_s17 + $0x71] sm:$0xff] }
  0x2f   : > { %v786_v43 = vld [vmem:[%s6789_s17 + $0x60] sm:$0xff]  ;;  %v1190_v56 = vld [vmem:[%s6878_s10 + $0x10] sm:$0xff] }
  0x30   : > { %5573 = vmatmul.msk.f32.gmra.mxu0 %vm395_vm1, %v388_v12  ;;  %5601 = vmatmul.msk.f32.gmra.mxu2 %vm395_vm1, %v389_v14  ;;  %v888_v44 = vld [vmem:[%s6789_s17 + $0x61] sm:$0xff]  ;;  %v1292_v57 = vld [vmem:[%s6878_s10 + $0x11] sm:$0xff] }
  0x31   : > { %5583 = vmatmul.msk.f32.gmra.mxu1 %vm395_vm1, %v6704_v13  ;;  %5619 = vmatmul.msk.f32.gmra.mxu3 %vm395_vm1, %v6714_v15  ;;  %v5652_v49 = vld [vmem:[%s6789_s17 + $0x80] sm:$0xff]  ;;  %v1192_v12 = vld [vmem:[%s6878_s10 + $0x30] sm:$0xff] }
  0x32   : > { %v5670_v50 = vld [vmem:[%s6789_s17 + $0x81] sm:$0xff] }
  0x33   : > { %v1189_v53 = vld [vmem:[%s6878_s10] sm:$0xff] }
  0x34   : > { %v1291_v55 = vld [vmem:[%s6878_s10 + $0x1] sm:$0xff] }
  0x35   : > { %v1191_v0 = vld [vmem:[%s6878_s10 + $0x20] sm:$0xff] }
  0x36   : > { %v1293_v1 = vld [vmem:[%s6878_s10 + $0x21] sm:$0xff] }
  0x37   : > { %v1193_v29 = vld [vmem:[%s6878_s10 + $0x40] sm:$0xff] }
  0x38   : > { %5574 = vmatmul.msk.f32.gmra.mxu0 %vm395_vm1, %v389_v14  ;;  %5602 = vmatmul.msk.f32.gmra.mxu2 %vm395_vm1, %v390_v16  ;;  %v1294_v14 = vld [vmem:[%s6878_s10 + $0x31] sm:$0xff] }
  0x39   : > { %5584 = vmatmul.msk.f32.gmra.mxu1 %vm395_vm1, %v6714_v15  ;;  %5620 = vmatmul.msk.f32.gmra.mxu3 %vm395_vm1, %v6724_v17 }
  0x40   : > { %5575 = vmatmul.msk.f32.gmra.mxu0 %vm395_vm1, %v390_v16  ;;  %5603 = vmatmul.msk.f32.gmra.mxu2 %vm395_vm1, %v391_v18 }
  0x41   : > { %5585 = vmatmul.msk.f32.gmra.mxu1 %vm395_vm1, %v6724_v17  ;;  %5621 = vmatmul.msk.f32.gmra.mxu3 %vm395_vm1, %v6734_v19 }
  0x48   : > { %5576 = vmatmul.msk.f32.gmra.mxu0 %vm395_vm1, %v391_v18  ;;  %5604 = vmatmul.msk.f32.gmra.mxu2 %vm395_vm1, %v392_v21 }
  0x49   : > { %5586 = vmatmul.msk.f32.gmra.mxu1 %vm395_vm1, %v6734_v19  ;;  %5622 = vmatmul.msk.f32.gmra.mxu3 %vm395_vm1, %v6749_v22 }
  0x50   : > { %5577 = vmatmul.msk.f32.gmra.mxu0 %vm395_vm1, %v392_v21  ;;  %5605 = vmatmul.msk.f32.gmra.mxu2 %vm395_vm1, %v393_v25 }
  0x51   : > { %5587 = vmatmul.msk.f32.gmra.mxu1 %vm395_vm1, %v6749_v22  ;;  %5623 = vmatmul.msk.f32.gmra.mxu3 %vm395_vm1, %v6767_v26 }
  0x58   : > { %5578 = vmatmul.msk.f32.gmra.mxu0 %vm395_vm1, %v393_v25  ;;  %5606 = vmatmul.msk.f32.gmra.mxu2 %vm395_vm1, %v5596_v27 }
  0x59   : > { %5588 = vmatmul.msk.f32.gmra.mxu1 %vm395_vm1, %v6767_v26  ;;  %5624 = vmatmul.msk.f32.gmra.mxu3 %vm395_vm1, %v6775_v28 }
  0x60   : > { %5627 = vmatmul.msk.f32.vlgmr.msrb.gmra.mxu0 %vm395_vm1, %v780_v30  ;;  %5655 = vmatmul.msk.f32.vlgmr.msrb.gmra.mxu2 %vm395_vm1, %v781_v32  ;;  %v1295_v30 = vld [vmem:[%s6878_s10 + $0x41] sm:$0xff] }
  0x61   : > { %5637 = vmatmul.msk.f32.vlgmr.msrb.gmra.mxu1 %vm395_vm1, %v6794_v31  ;;  %5673 = vmatmul.msk.f32.vlgmr.msrb.gmra.mxu3 %vm395_vm1, %v6801_v33 }
  0x62   : > { %5738 = vmatpush.msk.msrb.mxu0 %vm420_vm0, %v5737_v42  ;;  %5748 = vmatpush.msk.msrb.mxu1 %vm420_vm0, %v5747_v45 }
  0x63   : > { %5766 = vmatpush.msk.msrb.mxu2 %vm420_vm0, %v5765_v48  ;;  %5784 = vmatpush.msk.msrb.mxu3 %vm420_vm0, %v5783_v51 }
  0x68   : > { %5628 = vmatmul.msk.f32.gmra.mxu0 %vm395_vm1, %v781_v32  ;;  %5656 = vmatmul.msk.f32.gmra.mxu2 %vm395_vm1, %v782_v34 }
  0x69   : > { %5638 = vmatmul.msk.f32.gmra.mxu1 %vm395_vm1, %v6801_v33  ;;  %5674 = vmatmul.msk.f32.gmra.mxu3 %vm395_vm1, %v6811_v35 }
  0x70   : > { %5629 = vmatmul.msk.f32.gmra.mxu0 %vm395_vm1, %v782_v34  ;;  %5657 = vmatmul.msk.f32.gmra.mxu2 %vm395_vm1, %v783_v36 }
  0x71   : > { %5639 = vmatmul.msk.f32.gmra.mxu1 %vm395_vm1, %v6811_v35  ;;  %5675 = vmatmul.msk.f32.gmra.mxu3 %vm395_vm1, %v6821_v37 }
  0x78   : > { %5630 = vmatmul.msk.f32.gmra.mxu0 %vm395_vm1, %v783_v36  ;;  %5658 = vmatmul.msk.f32.gmra.mxu2 %vm395_vm1, %v784_v38 }
  0x79   : > { %5640 = vmatmul.msk.f32.gmra.mxu1 %vm395_vm1, %v6821_v37  ;;  %5676 = vmatmul.msk.f32.gmra.mxu3 %vm395_vm1, %v6831_v39 }
  0x80   : > { %5631 = vmatmul.msk.f32.gmra.mxu0 %vm395_vm1, %v784_v38  ;;  %5659 = vmatmul.msk.f32.gmra.mxu2 %vm395_vm1, %v785_v40 }
  0x81   : > { %5641 = vmatmul.msk.f32.gmra.mxu1 %vm395_vm1, %v6831_v39  ;;  %5677 = vmatmul.msk.f32.gmra.mxu3 %vm395_vm1, %v887_v41 }
  0x88   : > { %5632 = vmatmul.msk.f32.gmra.mxu0 %vm395_vm1, %v785_v40  ;;  %5660 = vmatmul.msk.f32.gmra.mxu2 %vm395_vm1, %v786_v43 }
  0x89   : > { %5642 = vmatmul.msk.f32.gmra.mxu1 %vm395_vm1, %v887_v41  ;;  %5678 = vmatmul.msk.f32.gmra.mxu3 %vm395_vm1, %v888_v44 }
  0x90   : > { %5633 = vmatmul.msk.f32.gmra.mxu0 %vm395_vm1, %v786_v43  ;;  %5661 = vmatmul.msk.f32.gmra.mxu2 %vm395_vm1, %v787_v46 }
  0x91   : > { %5643 = vmatmul.msk.f32.gmra.mxu1 %vm395_vm1, %v888_v44  ;;  %5679 = vmatmul.msk.f32.gmra.mxu3 %vm395_vm1, %v889_v47 }
  0x98   : > { %5634 = vmatmul.msk.f32.gmra.mxu0 %vm395_vm1, %v787_v46  ;;  %5662 = vmatmul.msk.f32.gmra.mxu2 %vm395_vm1, %v5652_v49  ;;  %v1194_v46 = vld [vmem:[%s6878_s10 + $0x50] sm:$0xff] }
  0x99   : > { %5644 = vmatmul.msk.f32.gmra.mxu1 %vm395_vm1, %v889_v47  ;;  %5680 = vmatmul.msk.f32.gmra.mxu3 %vm395_vm1, %v5670_v50  ;;  %v1296_v47 = vld [vmem:[%s6878_s10 + $0x51] sm:$0xff]  ;;  %v5793_v50 = vld [vmem:[%s8276_s3 + $0x40] sm:$0xf] }
  0x9d   : > { %v441_v52 = vpop.f32.mrf.mxu0 }
  0x9e   : > { %v527_v54 = vpop.f32.mrf.mxu1  ;;  %465 = vst.msk [vmem:[#allocation2] sm:$0xff] %vm395_vm1, %v441_v52 }
  0xa0   : > { %5683 = vmatmul.msk.f32.vlgmr.msra.gmra.mxu0 %vm395_vm1, %v1189_v53  ;;  %5711 = vmatmul.msk.f32.vlgmr.msra.gmra.mxu2 %vm395_vm1, %v1190_v56 }
  0xa1   : > { %5693 = vmatmul.msk.f32.vlgmr.msra.gmra.mxu1 %vm395_vm1, %v1291_v55  ;;  %5729 = vmatmul.msk.f32.vlgmr.msra.gmra.mxu3 %vm395_vm1, %v1292_v57 }
  0xa2   : > { %5794 = vmatpush.msk.msra.mxu0 %vm420_vm0, %v5793_v50 }
  0xa3   : > { %v630_v58 = vpop.f32.mrf.mxu2 }
  0xa4   : > { %v732_v59 = vpop.f32.mrf.mxu3 }
  0xa5   : > { %v444_v60 = vpop.f32.mrf.mxu0  ;;  %v551_v61 = vld [vmem:[#allocation2] sm:$0xff] }
  0xa6   : > { %v530_v62 = vpop.f32.mrf.mxu1  ;;  %466 = vst.msk [vmem:[#allocation2 + $0x8] sm:$0xff] %vm395_vm1, %v444_v60  ;;  %v559_v63 = vadd.f32 %v551_v61, %v527_v54  ;;  %v1297_v60 = vld [vmem:[%s6878_s10 + $0x61] sm:$0xff] }
  0xa8   : > { %567 = vst.msk [vmem:[#allocation2] sm:$0xff] %vm395_vm1, %v559_v63  ;;  %5684 = vmatmul.msk.f32.gmra.mxu0 %vm395_vm1, %v1190_v56  ;;  %5712 = vmatmul.msk.f32.gmra.mxu2 %vm395_vm1, %v1191_v0 }
  0xa9   : > { %5694 = vmatmul.msk.f32.gmra.mxu1 %vm395_vm1, %v1292_v57  ;;  %5730 = vmatmul.msk.f32.gmra.mxu3 %vm395_vm1, %v1293_v1 }
  0xab   : > { %v633_v2 = vpop.f32.mrf.mxu2 }
  0xac   : > { %v735_v3 = vpop.f32.mrf.mxu3 }
  0xad   : > { %v447_v4 = vpop.f32.mrf.mxu0  ;;  %v552_v5 = vld [vmem:[#allocation2 + $0x8] sm:$0xff] }
  0xae   : > { %v533_v6 = vpop.f32.mrf.mxu1  ;;  %467 = vst.msk [vmem:[#allocation2 + $0x10] sm:$0xff] %vm395_vm1, %v447_v4  ;;  %v560_v7 = vadd.f32 %v552_v5, %v530_v62 }
  0xaf   : > { %v654_v8 = vld [vmem:[#allocation2] sm:$0xff] }
  0xb0   : > { %568 = vst.msk [vmem:[#allocation2 + $0x8] sm:$0xff] %vm395_vm1, %v560_v7  ;;  %v662_v10 = vadd.f32 %v654_v8, %v630_v58  ;;  %5685 = vmatmul.msk.f32.gmra.mxu0 %vm395_vm1, %v1191_v0  ;;  %5713 = vmatmul.msk.f32.gmra.mxu2 %vm395_vm1, %v1192_v12  ;;  %v1196_v8 = vld [vmem:[%s6878_s10 + $0x70] sm:$0xff] }
  0xb1   : > { %5695 = vmatmul.msk.f32.gmra.mxu1 %vm395_vm1, %v1293_v1  ;;  %5731 = vmatmul.msk.f32.gmra.mxu3 %vm395_vm1, %v1294_v14  ;;  %v5803_v1 = vld [vmem:[%s8276_s3 + $0x44] sm:$0xf] }
  0xb2   : > { %670 = vst.msk [vmem:[#allocation2] sm:$0xff] %vm395_vm1, %v662_v10  ;;  %5804 = vmatpush.msk.msra.mxu1 %vm420_vm0, %v5803_v1  ;;  %v1298_v10 = vld [vmem:[%s6878_s10 + $0x71] sm:$0xff] }
  0xb3   : > { %v636_v16 = vpop.f32.mrf.mxu2 }
  0xb4   : > { %v738_v18 = vpop.f32.mrf.mxu3 }
  0xb5   : > { %v450_v20 = vpop.f32.mrf.mxu0  ;;  %v553_v21 = vld [vmem:[#allocation2 + $0x10] sm:$0xff] }
  0xb6   : > { %v536_v23 = vpop.f32.mrf.mxu1  ;;  %468 = vst.msk [vmem:[#allocation2 + $0x18] sm:$0xff] %vm395_vm1, %v450_v20  ;;  %v561_v24 = vadd.f32 %v553_v21, %v533_v6 }
  0xb7   : > { %v655_v25 = vld [vmem:[#allocation2 + $0x8] sm:$0xff] }
  0xb8   : > { %569 = vst.msk [vmem:[#allocation2 + $0x10] sm:$0xff] %vm395_vm1, %v561_v24  ;;  %v663_v27 = vadd.f32 %v655_v25, %v633_v2  ;;  %5686 = vmatmul.msk.f32.gmra.mxu0 %vm395_vm1, %v1192_v12  ;;  %5714 = vmatmul.msk.f32.gmra.mxu2 %vm395_vm1, %v1193_v29 }
  0xb9   : > { %5696 = vmatmul.msk.f32.gmra.mxu1 %vm395_vm1, %v1294_v14  ;;  %v756_v32 = vld [vmem:[#allocation2] sm:$0xff]  ;;  %5732 = vmatmul.msk.f32.gmra.mxu3 %vm395_vm1, %v1295_v30 }
  0xba   : > { %671 = vst.msk [vmem:[#allocation2 + $0x8] sm:$0xff] %vm395_vm1, %v663_v27  ;;  %v764_v34 = vadd.f32 %v756_v32, %v732_v59  ;;  %v1195_v59 = vld [vmem:[%s6878_s10 + $0x60] sm:$0xff] }
  0xbb   : > { %v639_v36 = vpop.f32.mrf.mxu2  ;;  %v5708_v27 = vld [vmem:[%s6878_s10 + $0x80] sm:$0xff] }
  0xbc   : > { %772 = vst.msk [vmem:[#allocation2] sm:$0xff] %vm395_vm1, %v764_v34  ;;  %v741_v38 = vpop.f32.mrf.mxu3 }
  0xbd   : > { %v453_v40 = vpop.f32.mrf.mxu0  ;;  %v554_v41 = vld [vmem:[#allocation2 + $0x18] sm:$0xff] }
  0xbe   : > { %v539_v42 = vpop.f32.mrf.mxu1  ;;  %469 = vst.msk [vmem:[#allocation2 + $0x20] sm:$0xff] %vm395_vm1, %v453_v40  ;;  %v562_v43 = vadd.f32 %v554_v41, %v536_v23  ;;  %v5839_v41 = vld [vmem:[%s8276_s3 + $0x4c] sm:$0xf] }
  0xbf   : > { %v656_v44 = vld [vmem:[#allocation2 + $0x10] sm:$0xff]  ;;  %5840 = vmatpush.msk.msra.mxu3 %vm420_vm0, %v5839_v41 }
  0xc0   : > { %570 = vst.msk [vmem:[#allocation2 + $0x18] sm:$0xff] %vm395_vm1, %v562_v43  ;;  %v664_v45 = vadd.f32 %v656_v44, %v636_v16  ;;  %5687 = vmatmul.msk.f32.gmra.mxu0 %vm395_vm1, %v1193_v29  ;;  %5715 = vmatmul.msk.f32.gmra.mxu2 %vm395_vm1, %v1194_v46  ;;  %v5821_v16 = vld [vmem:[%s8276_s3 + $0x48] sm:$0xf] }
  0xc1   : > { %5697 = vmatmul.msk.f32.gmra.mxu1 %vm395_vm1, %v1295_v30  ;;  %v757_v48 = vld [vmem:[#allocation2 + $0x8] sm:$0xff]  ;;  %5733 = vmatmul.msk.f32.gmra.mxu3 %vm395_vm1, %v1296_v47 }
  0xc2   : > { %672 = vst.msk [vmem:[#allocation2 + $0x10] sm:$0xff] %vm395_vm1, %v664_v45  ;;  %v765_v49 = vadd.f32 %v757_v48, %v735_v3  ;;  %5822 = vmatpush.msk.msra.mxu2 %vm420_vm0, %v5821_v16  ;;  %v5726_v29 = vld [vmem:[%s6878_s10 + $0x81] sm:$0xff] }
  0xc3   : > { %v642_v51 = vpop.f32.mrf.mxu2  ;;  %v858_v44 = vld [vmem:[#allocation2] sm:$0xff] }
  0xc4   : > { %773 = vst.msk [vmem:[#allocation2 + $0x8] sm:$0xff] %vm395_vm1, %v765_v49  ;;  %v744_v52 = vpop.f32.mrf.mxu3 }
  0xc5   : > { %v456_v53 = vpop.f32.mrf.mxu0  ;;  %v555_v54 = vld [vmem:[#allocation2 + $0x20] sm:$0xff] }
  0xc6   : > { %v542_v55 = vpop.f32.mrf.mxu1  ;;  %470 = vst.msk [vmem:[#allocation2 + $0x28] sm:$0xff] %vm395_vm1, %v456_v53  ;;  %v563_v56 = vadd.f32 %v555_v54, %v539_v42 }
  0xc7   : > { %v657_v57 = vld [vmem:[#allocation2 + $0x18] sm:$0xff] }
  0xc8   : > { %571 = vst.msk [vmem:[#allocation2 + $0x20] sm:$0xff] %vm395_vm1, %v563_v56  ;;  %v665_v58 = vadd.f32 %v657_v57, %v639_v36  ;;  %5688 = vmatmul.msk.f32.gmra.mxu0 %vm395_vm1, %v1194_v46  ;;  %5716 = vmatmul.msk.f32.gmra.mxu2 %vm395_vm1, %v1195_v59  ;;  %v1711_v46 = vld [vmem:[%s6683_s14 + $0x2] sm:$0xff] }
  0xc9   : > { %5698 = vmatmul.msk.f32.gmra.mxu1 %vm395_vm1, %v1296_v47  ;;  %v758_v61 = vld [vmem:[#allocation2 + $0x10] sm:$0xff]  ;;  %5734 = vmatmul.msk.f32.gmra.mxu3 %vm395_vm1, %v1297_v60 }
  0xca   : > { %673 = vst.msk [vmem:[#allocation2 + $0x18] sm:$0xff] %vm395_vm1, %v665_v58  ;;  %v766_v62 = vadd.f32 %v758_v61, %v738_v18 }
  0xcb   : > { %v645_v63 = vpop.f32.mrf.mxu2  ;;  %v859_v56 = vld [vmem:[#allocation2 + $0x8] sm:$0xff] }
  0xcc   : > { %774 = vst.msk [vmem:[#allocation2 + $0x10] sm:$0xff] %vm395_vm1, %v766_v62  ;;  %v6944_v0 = vpop.f32.mrf.mxu3  ;;  %v1713_v62 = vld [vmem:[%s6683_s14 + $0x22] sm:$0xff] }
  0xcd   : > { %v459_v2 = vpop.f32.mrf.mxu0  ;;  %v556_v3 = vld [vmem:[#allocation2 + $0x28] sm:$0xff] }
  0xce   : > { %v545_v4 = vpop.f32.mrf.mxu1  ;;  %471 = vst.msk [vmem:[#allocation2 + $0x30] sm:$0xff] %vm395_vm1, %v459_v2  ;;  %v564_v5 = vadd.f32 %v556_v3, %v542_v55 }
  0xcf   : > { %v658_v6 = vld [vmem:[#allocation2 + $0x20] sm:$0xff] }
  0xd0   : > { %572 = vst.msk [vmem:[#allocation2 + $0x28] sm:$0xff] %vm395_vm1, %v564_v5  ;;  %v666_v7 = vadd.f32 %v658_v6, %v642_v51  ;;  %5689 = vmatmul.msk.f32.gmra.mxu0 %vm395_vm1, %v1195_v59  ;;  %5717 = vmatmul.msk.f32.gmra.mxu2 %vm395_vm1, %v1196_v8  ;;  %v1712_v51 = vld [vmem:[%s6683_s14 + $0x12] sm:$0xff] }
  0xd1   : > { %5699 = vmatmul.msk.f32.gmra.mxu1 %vm395_vm1, %v1297_v60  ;;  %v759_v12 = vld [vmem:[#allocation2 + $0x18] sm:$0xff]  ;;  %5735 = vmatmul.msk.f32.gmra.mxu3 %vm395_vm1, %v1298_v10 }
  0xd2   : > { %674 = vst.msk [vmem:[#allocation2 + $0x20] sm:$0xff] %vm395_vm1, %v666_v7  ;;  %v767_v14 = vadd.f32 %v759_v12, %v741_v38 }
  0xd3   : > { %v648_v18 = vpop.f32.mrf.mxu2 }
  0xd4   : > { %775 = vst.msk [vmem:[#allocation2 + $0x18] sm:$0xff] %vm395_vm1, %v767_v14  ;;  %v750_v20 = vpop.f32.mrf.mxu3 }
  0xd5   : > { %v462_v21 = vpop.f32.mrf.mxu0  ;;  %v557_v23 = vld [vmem:[#allocation2 + $0x30] sm:$0xff] }
  0xd6   : > { %v548_v24 = vpop.f32.mrf.mxu1  ;;  %472 = vst.msk [vmem:[#allocation2 + $0x38] sm:$0xff] %vm395_vm1, %v462_v21  ;;  %v565_v25 = vadd.f32 %v557_v23, %v545_v4  ;;  %v860_v4 = vld [vmem:[#allocation2 + $0x10] sm:$0xff] }
  0xd7   : > { %v659_v30 = vld [vmem:[#allocation2 + $0x28] sm:$0xff] }
  0xd8   : > { %573 = vst.msk [vmem:[#allocation2 + $0x30] sm:$0xff] %vm395_vm1, %v565_v25  ;;  %v667_v32 = vadd.f32 %v659_v30, %v645_v63  ;;  %5690 = vmatmul.msk.f32.gmra.mxu0 %vm395_vm1, %v1196_v8  ;;  %5718 = vmatmul.msk.f32.gmra.mxu2 %vm395_vm1, %v5708_v27  ;;  %v1715_v30 = vld [vmem:[%s6683_s14 + $0x42] sm:$0xff] }
  0xd9   : > { %5700 = vmatmul.msk.f32.gmra.mxu1 %vm395_vm1, %v1298_v10  ;;  %v760_v34 = vld [vmem:[#allocation2 + $0x20] sm:$0xff]  ;;  %5736 = vmatmul.msk.f32.gmra.mxu3 %vm395_vm1, %v5726_v29  ;;  %v1714_v10 = vld [vmem:[%s6683_s14 + $0x32] sm:$0xff] }
  0xda   : > { %675 = vst.msk [vmem:[#allocation2 + $0x28] sm:$0xff] %vm395_vm1, %v667_v32  ;;  %v768_v36 = vadd.f32 %v760_v34, %v744_v52 }
  0xdb   : > { %v651_v38 = vpop.f32.mrf.mxu2  ;;  %v861_v23 = vld [vmem:[#allocation2 + $0x18] sm:$0xff] }
  0xdc   : > { %776 = vst.msk [vmem:[#allocation2 + $0x20] sm:$0xff] %vm395_vm1, %v768_v36  ;;  %v753_v40 = vpop.f32.mrf.mxu3 }
  0xdd   : > { %v558_v42 = vld [vmem:[#allocation2 + $0x38] sm:$0xff]  ;;  %v834_v43 = vpop.f32.mrf.mxu0 }
  0xde   : > { %v936_v45 = vpop.f32.mrf.mxu1  ;;  %v566_v47 = vadd.f32 %v558_v42, %v548_v24  ;;  %v866_v48 = vadd.f32 %v858_v44, %v834_v43 }
  0xdf   : > { %v660_v49 = vld [vmem:[#allocation2 + $0x30] sm:$0xff] }
  0xe0   : > { %574 = vst.msk [vmem:[#allocation2 + $0x38] sm:$0xff] %vm395_vm1, %v566_v47  ;;  %v668_v50 = vadd.f32 %v660_v49, %v648_v18  ;;  %5739 = vmatmul.msk.f32.vlgmr.msrb.gmra.mxu0 %vm395_vm1, %v6687_v9  ;;  %5767 = vmatmul.msk.f32.vlgmr.msrb.gmra.mxu2 %vm395_vm1, %v6694_v11  ;;  %v1716_v47 = vld [vmem:[%s6683_s14 + $0x52] sm:$0xff] }
  0xe1   : > { %5749 = vmatmul.msk.f32.vlgmr.msrb.gmra.mxu1 %vm395_vm1, %v1711_v46  ;;  %874 = vst.msk [vmem:[#allocation2] sm:$0xff] %vm395_vm1, %v866_v48  ;;  %v761_v52 = vld [vmem:[#allocation2 + $0x28] sm:$0xff]  ;;  %5785 = vmatmul.msk.f32.vlgmr.msrb.gmra.mxu3 %vm395_vm1, %v1712_v51 }
  0xe2   : > { %676 = vst.msk [vmem:[#allocation2 + $0x30] sm:$0xff] %vm395_vm1, %v668_v50  ;;  %v769_v53 = vadd.f32 %v761_v52, %v6944_v0 }
  0xe3   : > { %v1039_v54 = vpop.f32.mrf.mxu2  ;;  %v862_v42 = vld [vmem:[#allocation2 + $0x20] sm:$0xff] }
  0xe4   : > { %777 = vst.msk [vmem:[#allocation2 + $0x28] sm:$0xff] %vm395_vm1, %v769_v53  ;;  %v1141_v9 = vpop.f32.mrf.mxu3 }
  0xe5   : > { %v837_v55 = vpop.f32.mrf.mxu0 }
  0xe6   : > { %v939_v57 = vpop.f32.mrf.mxu1  ;;  %v867_v58 = vadd.f32 %v859_v56, %v837_v55 }
  0xe7   : > { %v661_v59 = vld [vmem:[#allocation2 + $0x38] sm:$0xff] }
  0xe8   : > { %875 = vst.msk [vmem:[#allocation2 + $0x8] sm:$0xff] %vm395_vm1, %v867_v58  ;;  %v960_v60 = vld [vmem:[#allocation2] sm:$0xff]  ;;  %v669_v61 = vadd.f32 %v661_v59, %v651_v38  ;;  %5740 = vmatmul.msk.f32.gmra.mxu0 %vm395_vm1, %v6694_v11  ;;  %5768 = vmatmul.msk.f32.gmra.mxu2 %vm395_vm1, %v6704_v13 }
  0xe9   : > { %5750 = vmatmul.msk.f32.gmra.mxu1 %vm395_vm1, %v1712_v51  ;;  %v968_v63 = vadd.f32 %v960_v60, %v936_v45  ;;  %v762_v0 = vld [vmem:[#allocation2 + $0x30] sm:$0xff]  ;;  %5786 = vmatmul.msk.f32.gmra.mxu3 %vm395_vm1, %v1713_v62  ;;  %v1717_v59 = vld [vmem:[%s6683_s14 + $0x62] sm:$0xff] }
  0xea   : > { %677 = vst.msk [vmem:[#allocation2 + $0x38] sm:$0xff] %vm395_vm1, %v669_v61  ;;  %v770_v1 = vadd.f32 %v762_v0, %v750_v20 }
  0xeb   : > { %976 = vst.msk [vmem:[#allocation2] sm:$0xff] %vm395_vm1, %v968_v63  ;;  %v1042_v2 = vpop.f32.mrf.mxu2 }
  0xec   : > { %778 = vst.msk [vmem:[#allocation2 + $0x30] sm:$0xff] %vm395_vm1, %v770_v1  ;;  %v1144_v11 = vpop.f32.mrf.mxu3 }
  0xed   : > { %v840_v3 = vpop.f32.mrf.mxu0 }
  0xee   : > { %v942_v5 = vpop.f32.mrf.mxu1  ;;  %v868_v6 = vadd.f32 %v860_v4, %v840_v3  ;;  %v5859_v4 = vld [vmem:[%s8276_s3 + $0x54] sm:$0xf] }
  0xef   : > { %v961_v7 = vld [vmem:[#allocation2 + $0x8] sm:$0xff]  ;;  %5860 = vmatpush.msk.msrb.mxu1 %vm420_vm0, %v5859_v4 }
  0xf0   : > { %876 = vst.msk [vmem:[#allocation2 + $0x10] sm:$0xff] %vm395_vm1, %v868_v6  ;;  %v969_v8 = vadd.f32 %v961_v7, %v939_v57  ;;  %5741 = vmatmul.msk.f32.gmra.mxu0 %vm395_vm1, %v6704_v13  ;;  %5769 = vmatmul.msk.f32.gmra.mxu2 %vm395_vm1, %v6714_v15  ;;  %v1718_v7 = vld [vmem:[%s6683_s14 + $0x72] sm:$0xff] }
  0xf1   : > { %5751 = vmatmul.msk.f32.gmra.mxu1 %vm395_vm1, %v1713_v62  ;;  %v763_v12 = vld [vmem:[#allocation2 + $0x38] sm:$0xff]  ;;  %5787 = vmatmul.msk.f32.gmra.mxu3 %vm395_vm1, %v1714_v10 }
  0xf2   : > { %977 = vst.msk [vmem:[#allocation2 + $0x8] sm:$0xff] %vm395_vm1, %v969_v8  ;;  %v1063_v14 = vld [vmem:[#allocation2] sm:$0xff]  ;;  %v771_v16 = vadd.f32 %v763_v12, %v753_v40  ;;  %v5877_v12 = vld [vmem:[%s8276_s3 + $0x58] sm:$0xf] }
  0xf3   : > { %v1071_v18 = vadd.f32 %v1063_v14, %v1039_v54  ;;  %v1045_v20 = vpop.f32.mrf.mxu2  ;;  %5878 = vmatpush.msk.msrb.mxu2 %vm420_vm0, %v5877_v12 }
  0xf4   : > { %779 = vst.msk [vmem:[#allocation2 + $0x38] sm:$0xff] %vm395_vm1, %v771_v16  ;;  %v7012_v21 = vpop.f32.mrf.mxu3 }
  0xf5   : > { %1079 = vst.msk [vmem:[#allocation2] sm:$0xff] %vm395_vm1, %v1071_v18  ;;  %v843_v13 = vpop.f32.mrf.mxu0 }
  0xf6   : > { %v945_v24 = vpop.f32.mrf.mxu1  ;;  %v869_v25 = vadd.f32 %v861_v23, %v843_v13 }
  0xf7   : > { %v962_v27 = vld [vmem:[#allocation2 + $0x10] sm:$0xff] }
  0xf8   : > { %877 = vst.msk [vmem:[#allocation2 + $0x18] sm:$0xff] %vm395_vm1, %v869_v25  ;;  %v970_v29 = vadd.f32 %v962_v27, %v942_v5  ;;  %5742 = vmatmul.msk.f32.gmra.mxu0 %vm395_vm1, %v6714_v15  ;;  %5770 = vmatmul.msk.f32.gmra.mxu2 %vm395_vm1, %v6724_v17 }
  0xf9   : > { %5752 = vmatmul.msk.f32.gmra.mxu1 %vm395_vm1, %v1714_v10  ;;  %v1064_v32 = vld [vmem:[#allocation2 + $0x8] sm:$0xff]  ;;  %5788 = vmatmul.msk.f32.gmra.mxu3 %vm395_vm1, %v1715_v30 }
  0xfa   : > { %978 = vst.msk [vmem:[#allocation2 + $0x10] sm:$0xff] %vm395_vm1, %v970_v29  ;;  %v1072_v34 = vadd.f32 %v1064_v32, %v1042_v2  ;;  %v864_v2 = vld [vmem:[#allocation2 + $0x30] sm:$0xff] }
  0xfb   : > { %v1048_v38 = vpop.f32.mrf.mxu2 }
  0xfc   : > { %1080 = vst.msk [vmem:[#allocation2 + $0x8] sm:$0xff] %vm395_vm1, %v1072_v34  ;;  %v1165_v36 = vld [vmem:[#allocation2] sm:$0xff]  ;;  %v7025_v40 = vpop.f32.mrf.mxu3 }
  0xfd   : > { %v1173_v15 = vadd.f32 %v1165_v36, %v1141_v9  ;;  %v846_v41 = vpop.f32.mrf.mxu0  ;;  %v863_v9 = vld [vmem:[#allocation2 + $0x28] sm:$0xff] }
  0xfe   : > { %v948_v43 = vpop.f32.mrf.mxu1  ;;  %v870_v44 = vadd.f32 %v862_v42, %v846_v41  ;;  %v2119_v41 = vld [vmem:[%s6789_s17 + $0x2] sm:$0xff] }
  0xff   : > { %1181 = vst.msk [vmem:[#allocation2] sm:$0xff] %vm395_vm1, %v1173_v15  ;;  %v963_v45 = vld [vmem:[#allocation2 + $0x18] sm:$0xff] }
 0x100   : > { %878 = vst.msk [vmem:[#allocation2 + $0x20] sm:$0xff] %vm395_vm1, %v870_v44  ;;  %v971_v46 = vadd.f32 %v963_v45, %v945_v24  ;;  %5743 = vmatmul.msk.f32.gmra.mxu0 %vm395_vm1, %v6724_v17  ;;  %5771 = vmatmul.msk.f32.gmra.mxu2 %vm395_vm1, %v6734_v19  ;;  %v5849_v17 = vld [vmem:[%s8276_s3 + $0x50] sm:$0xf]  ;;  %v5782_v24 = vld [vmem:[%s6683_s14 + $0x82] sm:$0xff] }
 0x101   : > { %5753 = vmatmul.msk.f32.gmra.mxu1 %vm395_vm1, %v1715_v30  ;;  %v1065_v48 = vld [vmem:[#allocation2 + $0x10] sm:$0xff]  ;;  %5789 = vmatmul.msk.f32.gmra.mxu3 %vm395_vm1, %v1716_v47 }
 0x102   : > { %979 = vst.msk [vmem:[#allocation2 + $0x18] sm:$0xff] %vm395_vm1, %v971_v46  ;;  %v1073_v49 = vadd.f32 %v1065_v48, %v1045_v20  ;;  %5850 = vmatpush.msk.msrb.mxu0 %vm420_vm0, %v5849_v17  ;;  %v2120_v45 = vld [vmem:[%s6789_s17 + $0x12] sm:$0xff] }
 0x103   : > { %v1166_v50 = vld [vmem:[#allocation2 + $0x8] sm:$0xff]  ;;  %v1051_v52 = vpop.f32.mrf.mxu2 }
 0x104   : > { %1081 = vst.msk [vmem:[#allocation2 + $0x10] sm:$0xff] %vm395_vm1, %v1073_v49  ;;  %v1174_v51 = vadd.f32 %v1166_v50, %v1144_v11  ;;  %v7038_v53 = vpop.f32.mrf.mxu3 }
 0x105   : > { %v849_v54 = vpop.f32.mrf.mxu0 }
 0x106   : > { %v951_v55 = vpop.f32.mrf.mxu1  ;;  %1182 = vst.msk [vmem:[#allocation2 + $0x8] sm:$0xff] %vm395_vm1, %v1174_v51  ;;  %v871_v56 = vadd.f32 %v863_v9, %v849_v54 }
 0x107   : > { %v964_v57 = vld [vmem:[#allocation2 + $0x20] sm:$0xff] }
 0x108   : > { %879 = vst.msk [vmem:[#allocation2 + $0x28] sm:$0xff] %vm395_vm1, %v871_v56  ;;  %v972_v58 = vadd.f32 %v964_v57, %v948_v43  ;;  %5744 = vmatmul.msk.f32.gmra.mxu0 %vm395_vm1, %v6734_v19  ;;  %5772 = vmatmul.msk.f32.gmra.mxu2 %vm395_vm1, %v6749_v22 }
 0x109   : > { %5754 = vmatmul.msk.f32.gmra.mxu1 %vm395_vm1, %v1716_v47  ;;  %v1066_v60 = vld [vmem:[#allocation2 + $0x18] sm:$0xff]  ;;  %5790 = vmatmul.msk.f32.gmra.mxu3 %vm395_vm1, %v1717_v59 }
 0x10a   : > { %980 = vst.msk [vmem:[#allocation2 + $0x20] sm:$0xff] %vm395_vm1, %v972_v58  ;;  %v1074_v61 = vadd.f32 %v1066_v60, %v1048_v38  ;;  %v5895_v38 = vld [vmem:[%s8276_s3 + $0x5c] sm:$0xf] }
 0x10b   : > { %v1167_v62 = vld [vmem:[#allocation2 + $0x10] sm:$0xff]  ;;  %v1054_v0 = vpop.f32.mrf.mxu2  ;;  %5896 = vmatpush.msk.msrb.mxu3 %vm420_vm0, %v5895_v38 }
 0x10c   : > { %1082 = vst.msk [vmem:[#allocation2 + $0x18] sm:$0xff] %vm395_vm1, %v1074_v61  ;;  %v1175_v63 = vadd.f32 %v1167_v62, %v7012_v21  ;;  %v7056_v19 = vpop.f32.mrf.mxu3  ;;  %v865_v21 = vld [vmem:[#allocation2 + $0x38] sm:$0xff] }
 0x10d   : > { %v852_v1 = vpop.f32.mrf.mxu0 }
 0x10e   : > { %v954_v11 = vpop.f32.mrf.mxu1  ;;  %1183 = vst.msk [vmem:[#allocation2 + $0x10] sm:$0xff] %vm395_vm1, %v1175_v63  ;;  %v872_v3 = vadd.f32 %v864_v2, %v852_v1  ;;  %v2122_v2 = vld [vmem:[%s6789_s17 + $0x32] sm:$0xff] }
 0x10f   : > { %v965_v5 = vld [vmem:[#allocation2 + $0x28] sm:$0xff] }
 0x110   : > { %880 = vst.msk [vmem:[#allocation2 + $0x30] sm:$0xff] %vm395_vm1, %v872_v3  ;;  %v973_v6 = vadd.f32 %v965_v5, %v951_v55  ;;  %5745 = vmatmul.msk.f32.gmra.mxu0 %vm395_vm1, %v6749_v22  ;;  %5773 = vmatmul.msk.f32.gmra.mxu2 %vm395_vm1, %v6767_v26  ;;  %v2121_v55 = vld [vmem:[%s6789_s17 + $0x22] sm:$0xff] }
 0x111   : > { %5755 = vmatmul.msk.f32.gmra.mxu1 %vm395_vm1, %v1717_v59  ;;  %v1067_v8 = vld [vmem:[#allocation2 + $0x20] sm:$0xff]  ;;  %5791 = vmatmul.msk.f32.gmra.mxu3 %vm395_vm1, %v1718_v7 }
 0x112   : > { %981 = vst.msk [vmem:[#allocation2 + $0x28] sm:$0xff] %vm395_vm1, %v973_v6  ;;  %v1075_v10 = vadd.f32 %v1067_v8, %v1051_v52  ;;  %v1268_v52 = vld [vmem:[#allocation2 + $0x8] sm:$0xff] }
 0x113   : > { %v1168_v14 = vld [vmem:[#allocation2 + $0x18] sm:$0xff]  ;;  %v1057_v16 = vpop.f32.mrf.mxu2 }
 0x114   : > { %1083 = vst.msk [vmem:[#allocation2 + $0x20] sm:$0xff] %vm395_vm1, %v1075_v10  ;;  %v1176_v22 = vadd.f32 %v1168_v14, %v7025_v40  ;;  %v7078_v18 = vpop.f32.mrf.mxu3  ;;  %v5816_v14 = vld [vmem:[%s6789_s17 + $0x41] sm:$0xff] }
 0x115   : > { %v855_v20 = vpop.f32.mrf.mxu0  ;;  %v1269_v62 = vld [vmem:[#allocation2 + $0x10] sm:$0xff] }
 0x116   : > { %v957_v13 = vpop.f32.mrf.mxu1  ;;  %1184 = vst.msk [vmem:[#allocation2 + $0x18] sm:$0xff] %vm395_vm1, %v1176_v22  ;;  %v873_v23 = vadd.f32 %v865_v21, %v855_v20 }
 0x117   : > { %v966_v25 = vld [vmem:[#allocation2 + $0x30] sm:$0xff] }
 0x118   : > { %881 = vst.msk [vmem:[#allocation2 + $0x38] sm:$0xff] %vm395_vm1, %v873_v23  ;;  %v974_v27 = vadd.f32 %v966_v25, %v954_v11  ;;  %5746 = vmatmul.msk.f32.gmra.mxu0 %vm395_vm1, %v6767_v26  ;;  %5774 = vmatmul.msk.f32.gmra.mxu2 %vm395_vm1, %v6775_v28  ;;  %v1267_v28 = vld [vmem:[#allocation2] sm:$0xff] }
 0x119   : > { %5756 = vmatmul.msk.f32.gmra.mxu1 %vm395_vm1, %v1718_v7  ;;  %v1068_v29 = vld [vmem:[#allocation2 + $0x28] sm:$0xff]  ;;  %5792 = vmatmul.msk.f32.gmra.mxu3 %vm395_vm1, %v5782_v24 }
 0x11a   : > { %982 = vst.msk [vmem:[#allocation2 + $0x30] sm:$0xff] %vm395_vm1, %v974_v27  ;;  %v1076_v30 = vadd.f32 %v1068_v29, %v1054_v0 }
 0x11b   : > { %v1169_v32 = vld [vmem:[#allocation2 + $0x20] sm:$0xff]  ;;  %v1060_v36 = vpop.f32.mrf.mxu2 }
 0x11c   : > { %1084 = vst.msk [vmem:[#allocation2 + $0x28] sm:$0xff] %vm395_vm1, %v1076_v30  ;;  %v1177_v34 = vadd.f32 %v1169_v32, %v7038_v53  ;;  %v7092_v26 = vpop.f32.mrf.mxu3 }
 0x11d   : > { %v1243_v40 = vpop.f32.mrf.mxu0  ;;  %v1270_v8 = vld [vmem:[#allocation2 + $0x18] sm:$0xff] }
 0x11e   : > { %v1345_v15 = vpop.f32.mrf.mxu1  ;;  %1185 = vst.msk [vmem:[#allocation2 + $0x20] sm:$0xff] %vm395_vm1, %v1177_v34  ;;  %v1275_v42 = vadd.f32 %v1267_v28, %v1243_v40  ;;  %v7166_v28 = vld [vmem:[%s8277_s4] ss:$0 sm:$0xff] }
 0x11f   : > { %v967_v43 = vld [vmem:[#allocation2 + $0x38] sm:$0xff] }
 0x120   : > { %v975_v44 = vadd.f32 %v967_v43, %v957_v13  ;;  %1283 = vst.msk [vmem:[#allocation2] sm:$0xff] %vm395_vm1, %v1275_v42  ;;  %5795 = vmatmul.msk.f32.vlgmr.msra.gmra.mxu0 %vm395_vm1, %v6794_v31  ;;  %5823 = vmatmul.msk.f32.vlgmr.msra.gmra.mxu2 %vm395_vm1, %v6801_v33  ;;  %v5913_v43 = vld [vmem:[%s8276_s3 + $0x60] sm:$0xf] }
 0x121   : > { %5805 = vmatmul.msk.f32.vlgmr.msra.gmra.mxu1 %vm395_vm1, %v2119_v41  ;;  %v1069_v46 = vld [vmem:[#allocation2 + $0x30] sm:$0xff]  ;;  %5841 = vmatmul.msk.f32.vlgmr.msra.gmra.mxu3 %vm395_vm1, %v2120_v45 }
 0x122   : > { %983 = vst.msk [vmem:[#allocation2 + $0x38] sm:$0xff] %vm395_vm1, %v975_v44  ;;  %v1077_v47 = vadd.f32 %v1069_v46, %v1057_v16  ;;  %5914 = vmatpush.msk.msra.mxu0 %vm420_vm0, %v5913_v43 }
 0x123   : > { %v1170_v48 = vld [vmem:[#allocation2 + $0x28] sm:$0xff]  ;;  %v1448_v50 = vpop.f32.mrf.mxu2 }
 0x124   : > { %1085 = vst.msk [vmem:[#allocation2 + $0x30] sm:$0xff] %vm395_vm1, %v1077_v47  ;;  %v1178_v49 = vadd.f32 %v1170_v48, %v7056_v19  ;;  %v1550_v31 = vpop.f32.mrf.mxu3 }
 0x125   : > { %v1246_v51 = vpop.f32.mrf.mxu0  ;;  %v1271_v27 = vld [vmem:[#allocation2 + $0x20] sm:$0xff] }
 0x126   : > { %v1348_v53 = vpop.f32.mrf.mxu1  ;;  %1186 = vst.msk [vmem:[#allocation2 + $0x28] sm:$0xff] %vm395_vm1, %v1178_v49  ;;  %v1276_v17 = vadd.f32 %v1268_v52, %v1246_v51  ;;  %v2023_v51 = vld [vmem:[%s6789_s17 + $0x61] sm:$0xff] }
 0x127   : > { %v1369_v54 = vld [vmem:[#allocation2] sm:$0xff] }
 0x128   : > { %1284 = vst.msk [vmem:[#allocation2 + $0x8] sm:$0xff] %vm395_vm1, %v1276_v17  ;;  %v1377_v9 = vadd.f32 %v1369_v54, %v1345_v15  ;;  %5796 = vmatmul.msk.f32.gmra.mxu0 %vm395_vm1, %v6801_v33  ;;  %5824 = vmatmul.msk.f32.gmra.mxu2 %vm395_vm1, %v6811_v35  ;;  %v2125_v52 = vld [vmem:[%s6789_s17 + $0x62] sm:$0xff] }
 0x129   : > { %5806 = vmatmul.msk.f32.gmra.mxu1 %vm395_vm1, %v2120_v45  ;;  %v1070_v56 = vld [vmem:[#allocation2 + $0x38] sm:$0xff]  ;;  %5842 = vmatmul.msk.f32.gmra.mxu3 %vm395_vm1, %v2121_v55 }
 0x12a   : > { %1385 = vst.msk [vmem:[#allocation2] sm:$0xff] %vm395_vm1, %v1377_v9  ;;  %v1078_v57 = vadd.f32 %v1070_v56, %v1060_v36  ;;  %v2022_v36 = vld [vmem:[%s6789_s17 + $0x51] sm:$0xff] }
 0x12b   : > { %v1171_v58 = vld [vmem:[#allocation2 + $0x30] sm:$0xff]  ;;  %v1451_v60 = vpop.f32.mrf.mxu2 }
 0x12c   : > { %1086 = vst.msk [vmem:[#allocation2 + $0x38] sm:$0xff] %vm395_vm1, %v1078_v57  ;;  %v1179_v59 = vadd.f32 %v1171_v58, %v7078_v18  ;;  %v7123_v33 = vpop.f32.mrf.mxu3  ;;  %v2123_v18 = vld [vmem:[%s6789_s17 + $0x42] sm:$0xff] }
 0x12d   : > { %v1249_v61 = vpop.f32.mrf.mxu0  ;;  %v1272_v45 = vld [vmem:[#allocation2 + $0x28] sm:$0xff] }
 0x12e   : > { %v1351_v63 = vpop.f32.mrf.mxu1  ;;  %1187 = vst.msk [vmem:[#allocation2 + $0x30] sm:$0xff] %vm395_vm1, %v1179_v59  ;;  %v1277_v0 = vadd.f32 %v1269_v62, %v1249_v61  ;;  %v5931_v62 = vld [vmem:[%s8276_s3 + $0x64] sm:$0xf] }
 0x12f   : > { %v1370_v19 = vld [vmem:[#allocation2 + $0x8] sm:$0xff]  ;;  %5932 = vmatpush.msk.msra.mxu1 %vm420_vm0, %v5931_v62 }
 0x130   : > { %1285 = vst.msk [vmem:[#allocation2 + $0x10] sm:$0xff] %vm395_vm1, %v1277_v0  ;;  %v1378_v1 = vadd.f32 %v1370_v19, %v1348_v53  ;;  %5797 = vmatmul.msk.f32.gmra.mxu0 %vm395_vm1, %v6811_v35  ;;  %5825 = vmatmul.msk.f32.gmra.mxu2 %vm395_vm1, %v6821_v37  ;;  %v2024_v19 = vld [vmem:[%s6789_s17 + $0x71] sm:$0xff] }
 0x131   : > { %5807 = vmatmul.msk.f32.gmra.mxu1 %vm395_vm1, %v2121_v55  ;;  %v1472_v11 = vld [vmem:[#allocation2] sm:$0xff]  ;;  %5843 = vmatmul.msk.f32.gmra.mxu3 %vm395_vm1, %v2122_v2 }
 0x132   : > { %1386 = vst.msk [vmem:[#allocation2 + $0x8] sm:$0xff] %vm395_vm1, %v1378_v1  ;;  %v1480_v3 = vadd.f32 %v1472_v11, %v1448_v50  ;;  %v2126_v1 = vld [vmem:[%s6789_s17 + $0x72] sm:$0xff]  ;;  %v5949_v11 = vld [vmem:[%s8276_s3 + $0x68] sm:$0xf] }
 0x133   : > { %v1172_v4 = vld [vmem:[#allocation2 + $0x38] sm:$0xff]  ;;  %v1454_v35 = vpop.f32.mrf.mxu2  ;;  %5950 = vmatpush.msk.msra.mxu2 %vm420_vm0, %v5949_v11 }
 0x134   : > { %1488 = vst.msk [vmem:[#allocation2] sm:$0xff] %vm395_vm1, %v1480_v3  ;;  %v1180_v5 = vadd.f32 %v1172_v4, %v7092_v26  ;;  %v7137_v6 = vpop.f32.mrf.mxu3  ;;  %v2124_v26 = vld [vmem:[%s6789_s17 + $0x52] sm:$0xff] }
 0x135   : > { %v1252_v7 = vpop.f32.mrf.mxu0  ;;  %v1273_v58 = vld [vmem:[#allocation2 + $0x30] sm:$0xff] }
 0x136   : > { %v1354_v10 = vpop.f32.mrf.mxu1  ;;  %1188 = vst.msk [vmem:[#allocation2 + $0x38] sm:$0xff] %vm395_vm1, %v1180_v5  ;;  %v1278_v12 = vadd.f32 %v1270_v8, %v1252_v7 }
 0x137   : > { %v1371_v22 = vld [vmem:[#allocation2 + $0x10] sm:$0xff] }
 0x138   : > { %1286 = vst.msk [vmem:[#allocation2 + $0x18] sm:$0xff] %vm395_vm1, %v1278_v12  ;;  %v1379_v16 = vadd.f32 %v1371_v22, %v1351_v63  ;;  %5798 = vmatmul.msk.f32.gmra.mxu0 %vm395_vm1, %v6821_v37  ;;  %5826 = vmatmul.msk.f32.gmra.mxu2 %vm395_vm1, %v5816_v14  ;;  %v5820_v22 = vld [vmem:[%s6789_s17 + $0x81] sm:$0xff] }
 0x139   : > { %5808 = vmatmul.msk.f32.gmra.mxu1 %vm395_vm1, %v2122_v2  ;;  %v1473_v20 = vld [vmem:[#allocation2 + $0x8] sm:$0xff]  ;;  %5844 = vmatmul.msk.f32.gmra.mxu3 %vm395_vm1, %v2123_v18 }
 0x13a   : > { %1387 = vst.msk [vmem:[#allocation2 + $0x10] sm:$0xff] %vm395_vm1, %v1379_v16  ;;  %v1481_v21 = vadd.f32 %v1473_v20, %v1451_v60 }
 0x13b   : > { %v1574_v13 = vld [vmem:[#allocation2] sm:$0xff]  ;;  %v1457_v24 = vpop.f32.mrf.mxu2 }
 0x13c   : > { %1489 = vst.msk [vmem:[#allocation2 + $0x8] sm:$0xff] %vm395_vm1, %v1481_v21  ;;  %v1582_v23 = vadd.f32 %v1574_v13, %v1550_v31  ;;  %v7150_v37 = vpop.f32.mrf.mxu3 }
 0x13d   : > { %v1255_v25 = vpop.f32.mrf.mxu0  ;;  %v1274_v8 = vld [vmem:[#allocation2 + $0x38] sm:$0xff] }
 0x13e   : > { %v1357_v29 = vpop.f32.mrf.mxu1  ;;  %1590 = vst.msk [vmem:[#allocation2] sm:$0xff] %vm395_vm1, %v1582_v23  ;;  %v1279_v30 = vadd.f32 %v1271_v27, %v1255_v25 }
 0x13f   : > { %v1372_v32 = vld [vmem:[#allocation2 + $0x18] sm:$0xff] }
 0x140   : > { %1287 = vst.msk [vmem:[#allocation2 + $0x20] sm:$0xff] %vm395_vm1, %v1279_v30  ;;  %v1380_v34 = vadd.f32 %v1372_v32, %v1354_v10  ;;  %5799 = vmatmul.msk.f32.gmra.mxu0 %vm395_vm1, %v6831_v39  ;;  %5827 = vmatmul.msk.f32.gmra.mxu2 %vm395_vm1, %v2022_v36  ;;  %v2425_v32 = vld [vmem:[%s6878_s10 + $0x1] sm:$0xff] }
 0x141   : > { %5809 = vmatmul.msk.f32.gmra.mxu1 %vm395_vm1, %v2123_v18  ;;  %v1474_v38 = vld [vmem:[#allocation2 + $0x10] sm:$0xff]  ;;  %5845 = vmatmul.msk.f32.gmra.mxu3 %vm395_vm1, %v2124_v26  ;;  %v5838_v18 = vld [vmem:[%s6789_s17 + $0x82] sm:$0xff] }
 0x142   : > { %1388 = vst.msk [vmem:[#allocation2 + $0x18] sm:$0xff] %vm395_vm1, %v1380_v34  ;;  %v1482_v40 = vadd.f32 %v1474_v38, %v1454_v35 }
 0x143   : > { %v1575_v15 = vld [vmem:[#allocation2 + $0x8] sm:$0xff]  ;;  %v1460_v41 = vpop.f32.mrf.mxu2 }
 0x144   : > { %1490 = vst.msk [vmem:[#allocation2 + $0x10] sm:$0xff] %vm395_vm1, %v1482_v40  ;;  %v1583_v39 = vadd.f32 %v1575_v15, %v7123_v33  ;;  %v7172_v42 = vpop.f32.mrf.mxu3 }
 0x145   : > { %v1258_v44 = vpop.f32.mrf.mxu0  ;;  %v1598_v47 = vld [vmem:[#allocation2] sm:$0xff] }
 0x146   : > { %v1360_v46 = vpop.f32.mrf.mxu1  ;;  %1591 = vst.msk [vmem:[#allocation2 + $0x8] sm:$0xff] %vm395_vm1, %v1583_v39  ;;  %v1280_v48 = vadd.f32 %v1272_v45, %v1258_v44  ;;  %v1609_v49 = vadd.f32 %v7166_v28, %v1598_v47  ;;  %v2426_v39 = vld [vmem:[%s6878_s10 + $0x11] sm:$0xff] }
 0x147   : > { %v1373_v50 = vld [vmem:[#allocation2 + $0x20] sm:$0xff] }
 0x148   : > { %1288 = vst.msk [vmem:[#allocation2 + $0x28] sm:$0xff] %vm395_vm1, %v1280_v48  ;;  %v1381_v31 = vadd.f32 %v1373_v50, %v1357_v29  ;;  %5800 = vmatmul.msk.f32.gmra.mxu0 %vm395_vm1, %v2022_v36  ;;  %5828 = vmatmul.msk.f32.gmra.mxu2 %vm395_vm1, %v2023_v51  ;;  %v2527_v36 = vld [vmem:[%s6878_s10 + $0x2] sm:$0xff] }
 0x149   : > { %5810 = vmatmul.msk.f32.gmra.mxu1 %vm395_vm1, %v2124_v26  ;;  %v1475_v53 = vld [vmem:[#allocation2 + $0x18] sm:$0xff]  ;;  %5846 = vmatmul.msk.f32.gmra.mxu3 %vm395_vm1, %v2125_v52  ;;  %1617 = vst.msk [vmem:[%s7187_s27] sm:$0xff] %vm395_vm1, %v1609_v49 }
 0x14a   : > { %1389 = vst.msk [vmem:[#allocation2 + $0x20] sm:$0xff] %vm395_vm1, %v1381_v31  ;;  %v1483_v17 = vadd.f32 %v1475_v53, %v1457_v24  ;;  %v2427_v53 = vld [vmem:[%s6878_s10 + $0x21] sm:$0xff] }
 0x14b   : > { %v1576_v54 = vld [vmem:[#allocation2 + $0x10] sm:$0xff]  ;;  %v1463_v55 = vpop.f32.mrf.mxu2 }
 0x14c   : > { %1491 = vst.msk [vmem:[#allocation2 + $0x18] sm:$0xff] %vm395_vm1, %v1483_v17  ;;  %v1584_v9 = vadd.f32 %v1576_v54, %v7137_v6  ;;  %v7194_v56 = vpop.f32.mrf.mxu3  ;;  %v2529_v17 = vld [vmem:[%s6878_s10 + $0x22] sm:$0xff] }
 0x14d   : > { %v1261_v57 = vpop.f32.mrf.mxu0  ;;  %v1599_v60 = vld [vmem:[#allocation2 + $0x8] sm:$0xff] }
 0x14e   : > { %v1363_v59 = vpop.f32.mrf.mxu1  ;;  %1592 = vst.msk [vmem:[#allocation2 + $0x10] sm:$0xff] %vm395_vm1, %v1584_v9  ;;  %v1281_v33 = vadd.f32 %v1273_v58, %v1261_v57  ;;  %v1610_v61 = vadd.f32 %v7166_v28, %v1599_v60 }
 0x14f   : > { %v1374_v63 = vld [vmem:[#allocation2 + $0x28] sm:$0xff] }
 0x150   : > { %1289 = vst.msk [vmem:[#allocation2 + $0x30] sm:$0xff] %vm395_vm1, %v1281_v33  ;;  %v1382_v0 = vadd.f32 %v1374_v63, %v1360_v46  ;;  %5801 = vmatmul.msk.f32.gmra.mxu0 %vm395_vm1, %v2023_v51  ;;  %5829 = vmatmul.msk.f32.gmra.mxu2 %vm395_vm1, %v2024_v19 }
 0x151   : > { %5811 = vmatmul.msk.f32.gmra.mxu1 %vm395_vm1, %v2125_v52  ;;  %v1476_v2 = vld [vmem:[#allocation2 + $0x20] sm:$0xff]  ;;  %5847 = vmatmul.msk.f32.gmra.mxu3 %vm395_vm1, %v2126_v1  ;;  %1618 = vst.msk [vmem:[%s7187_s27 + $0x10] sm:$0xff] %vm395_vm1, %v1610_v61 }
 0x152   : > { %1390 = vst.msk [vmem:[#allocation2 + $0x28] sm:$0xff] %vm395_vm1, %v1382_v0  ;;  %v1484_v3 = vadd.f32 %v1476_v2, %v1460_v41  ;;  %v2528_v41 = vld [vmem:[%s6878_s10 + $0x12] sm:$0xff] }
 0x153   : > { %v1577_v4 = vld [vmem:[#allocation2 + $0x18] sm:$0xff]  ;;  %v1466_v35 = vpop.f32.mrf.mxu2 }
 0x154   : > { %1492 = vst.msk [vmem:[#allocation2 + $0x20] sm:$0xff] %vm395_vm1, %v1484_v3  ;;  %v1585_v5 = vadd.f32 %v1577_v4, %v7150_v37  ;;  %v7218_v6 = vpop.f32.mrf.mxu3  ;;  %v5967_v37 = vld [vmem:[%s8276_s3 + $0x6c] sm:$0xf] }
 0x155   : > { %v1264_v7 = vpop.f32.mrf.mxu0  ;;  %v1600_v12 = vld [vmem:[#allocation2 + $0x10] sm:$0xff]  ;;  %5968 = vmatpush.msk.msra.mxu3 %vm420_vm0, %v5967_v37 }
 0x156   : > { %v1366_v10 = vpop.f32.mrf.mxu1  ;;  %1593 = vst.msk [vmem:[#allocation2 + $0x18] sm:$0xff] %vm395_vm1, %v1585_v5  ;;  %v1282_v14 = vadd.f32 %v1274_v8, %v1264_v7  ;;  %v1611_v16 = vadd.f32 %v7166_v28, %v1600_v12 }
 0x157   : > { %v1375_v20 = vld [vmem:[#allocation2 + $0x30] sm:$0xff] }
 0x158   : > { %1290 = vst.msk [vmem:[#allocation2 + $0x38] sm:$0xff] %vm395_vm1, %v1282_v14  ;;  %v1383_v21 = vadd.f32 %v1375_v20, %v1363_v59  ;;  %5802 = vmatmul.msk.f32.gmra.mxu0 %vm395_vm1, %v2024_v19  ;;  %5830 = vmatmul.msk.f32.gmra.mxu2 %vm395_vm1, %v5820_v22  ;;  %v2428_v19 = vld [vmem:[%s6878_s10 + $0x31] sm:$0xff]  ;;  %v2429_v22 = vld [vmem:[%s6878_s10 + $0x41] sm:$0xff] }
 0x159   : > { %5812 = vmatmul.msk.f32.gmra.mxu1 %vm395_vm1, %v2126_v1  ;;  %v1477_v13 = vld [vmem:[#allocation2 + $0x28] sm:$0xff]  ;;  %5848 = vmatmul.msk.f32.gmra.mxu3 %vm395_vm1, %v5838_v18  ;;  %1619 = vst.msk [vmem:[%s7187_s27 + $0x20] sm:$0xff] %vm395_vm1, %v1611_v16  ;;  %v2530_v1 = vld [vmem:[%s6878_s10 + $0x32] sm:$0xff] }
 0x15a   : > { %1391 = vst.msk [vmem:[#allocation2 + $0x30] sm:$0xff] %vm395_vm1, %v1383_v21  ;;  %v1485_v23 = vadd.f32 %v1477_v13, %v1463_v55  ;;  %v2531_v16 = vld [vmem:[%s6878_s10 + $0x42] sm:$0xff] }
 0x15b   : > { %v1578_v24 = vld [vmem:[#allocation2 + $0x20] sm:$0xff]  ;;  %v1469_v27 = vpop.f32.mrf.mxu2 }
 0x15c   : > { %1493 = vst.msk [vmem:[#allocation2 + $0x28] sm:$0xff] %vm395_vm1, %v1485_v23  ;;  %v1586_v25 = vadd.f32 %v1578_v24, %v7172_v42  ;;  %v7237_v29 = vpop.f32.mrf.mxu3 }
 0x15d   : > { %v1679_v30 = vpop.f32.mrf.mxu0  ;;  %v1601_v26 = vld [vmem:[#allocation2 + $0x18] sm:$0xff] }
 0x15e   : > { %v1765_v34 = vpop.f32.mrf.mxu1  ;;  %1594 = vst.msk [vmem:[#allocation2 + $0x20] sm:$0xff] %vm395_vm1, %v1586_v25  ;;  %v1612_v38 = vadd.f32 %v7166_v28, %v1601_v26 }
 0x15f   : > { %v1376_v40 = vld [vmem:[#allocation2 + $0x38] sm:$0xff]  ;;  %1703 = vst.msk [vmem:[#allocation2] sm:$0xff] %vm395_vm1, %v1679_v30 }
 0x160   : > { %v1384_v15 = vadd.f32 %v1376_v40, %v1366_v10  ;;  %5851 = vmatmul.msk.f32.vlgmr.msrb.gmra.mxu0 %vm395_vm1, %v2425_v32  ;;  %1620 = vst.msk [vmem:[%s7187_s27 + $0x30] sm:$0xff] %vm395_vm1, %v1612_v38  ;;  %5879 = vmatmul.msk.f32.vlgmr.msrb.gmra.mxu2 %vm395_vm1, %v2426_v39 }
 0x161   : > { %5861 = vmatmul.msk.f32.vlgmr.msrb.gmra.mxu1 %vm395_vm1, %v2527_v36  ;;  %v1478_v42 = vld [vmem:[#allocation2 + $0x30] sm:$0xff]  ;;  %5897 = vmatmul.msk.f32.vlgmr.msrb.gmra.mxu3 %vm395_vm1, %v2528_v41 }
 0x162   : > { %1392 = vst.msk [vmem:[#allocation2 + $0x38] sm:$0xff] %vm395_vm1, %v1384_v15  ;;  %v1486_v43 = vadd.f32 %v1478_v42, %v1466_v35  ;;  %v2532_v36 = vld [vmem:[%s6878_s10 + $0x52] sm:$0xff] }
 0x163   : > { %v1579_v44 = vld [vmem:[#allocation2 + $0x28] sm:$0xff]  ;;  %v1867_v46 = vpop.f32.mrf.mxu2 }
 0x164   : > { %1494 = vst.msk [vmem:[#allocation2 + $0x30] sm:$0xff] %vm395_vm1, %v1486_v43  ;;  %v1587_v45 = vadd.f32 %v1579_v44, %v7194_v56  ;;  %v7256_v47 = vpop.f32.mrf.mxu3 }
 0x165   : > { %v1682_v48 = vpop.f32.mrf.mxu0  ;;  %v1602_v50 = vld [vmem:[#allocation2 + $0x20] sm:$0xff] }
 0x166   : > { %v1768_v49 = vpop.f32.mrf.mxu1  ;;  %1595 = vst.msk [vmem:[#allocation2 + $0x28] sm:$0xff] %vm395_vm1, %v1587_v45  ;;  %v1789_v31 = vld [vmem:[#allocation2] sm:$0xff]  ;;  %v1613_v51 = vadd.f32 %v7166_v28, %v1602_v50 }
 0x167   : > { %1704 = vst.msk [vmem:[#allocation2 + $0x8] sm:$0xff] %vm395_vm1, %v1682_v48  ;;  %v1797_v52 = vadd.f32 %v1789_v31, %v1765_v34  ;;  %v2430_v34 = vld [vmem:[%s6878_s10 + $0x51] sm:$0xff] }
 0x168   : > { %5852 = vmatmul.msk.f32.gmra.mxu0 %vm395_vm1, %v2426_v39  ;;  %1621 = vst.msk [vmem:[%s7187_s27 + $0x40] sm:$0xff] %vm395_vm1, %v1613_v51  ;;  %5880 = vmatmul.msk.f32.gmra.mxu2 %vm395_vm1, %v2427_v53 }
 0x169   : > { %5862 = vmatmul.msk.f32.gmra.mxu1 %vm395_vm1, %v2528_v41  ;;  %1805 = vst.msk [vmem:[#allocation2] sm:$0xff] %vm395_vm1, %v1797_v52  ;;  %v1479_v54 = vld [vmem:[#allocation2 + $0x38] sm:$0xff]  ;;  %5898 = vmatmul.msk.f32.gmra.mxu3 %vm395_vm1, %v2529_v17  ;;  %v6003_v52 = vld [vmem:[%s8276_s3 + $0x74] sm:$0xf] }
 0x16a   : > { %v1487_v9 = vadd.f32 %v1479_v54, %v1469_v27  ;;  %6004 = vmatpush.msk.msrb.mxu1 %vm420_vm0, %v6003_v52  ;;  %v5926_v52 = vld [vmem:[%s6683_s14 + $0x41] sm:$0xff] }
 0x16b   : > { %v1580_v55 = vld [vmem:[#allocation2 + $0x30] sm:$0xff]  ;;  %v1870_v57 = vpop.f32.mrf.mxu2 }
 0x16c   : > { %1495 = vst.msk [vmem:[#allocation2 + $0x38] sm:$0xff] %vm395_vm1, %v1487_v9  ;;  %v1588_v56 = vadd.f32 %v1580_v55, %v7218_v6  ;;  %v7272_v58 = vpop.f32.mrf.mxu3 }
 0x16d   : > { %v1685_v59 = vpop.f32.mrf.mxu0  ;;  %v1603_v33 = vld [vmem:[#allocation2 + $0x28] sm:$0xff] }
 0x16e   : > { %v1771_v60 = vpop.f32.mrf.mxu1  ;;  %1596 = vst.msk [vmem:[#allocation2 + $0x30] sm:$0xff] %vm395_vm1, %v1588_v56  ;;  %v1790_v61 = vld [vmem:[#allocation2 + $0x8] sm:$0xff]  ;;  %v1614_v62 = vadd.f32 %v7166_v28, %v1603_v33 }
 0x16f   : > { %1705 = vst.msk [vmem:[#allocation2 + $0x10] sm:$0xff] %vm395_vm1, %v1685_v59  ;;  %v1798_v63 = vadd.f32 %v1790_v61, %v1768_v49 }
 0x170   : > { %v1891_v0 = vld [vmem:[#allocation2] sm:$0xff]  ;;  %5853 = vmatmul.msk.f32.gmra.mxu0 %vm395_vm1, %v2427_v53  ;;  %1622 = vst.msk [vmem:[%s7187_s27 + $0x50] sm:$0xff] %vm395_vm1, %v1614_v62  ;;  %5881 = vmatmul.msk.f32.gmra.mxu2 %vm395_vm1, %v2428_v19 }
 0x171   : > { %5863 = vmatmul.msk.f32.gmra.mxu1 %vm395_vm1, %v2529_v17  ;;  %1806 = vst.msk [vmem:[#allocation2 + $0x8] sm:$0xff] %vm395_vm1, %v1798_v63  ;;  %v1899_v2 = vadd.f32 %v1891_v0, %v1867_v46  ;;  %5899 = vmatmul.msk.f32.gmra.mxu3 %vm395_vm1, %v2530_v1  ;;  %v2431_v46 = vld [vmem:[%s6878_s10 + $0x61] sm:$0xff] }
 0x173   : > { %1907 = vst.msk [vmem:[#allocation2] sm:$0xff] %vm395_vm1, %v1899_v2  ;;  %v1581_v11 = vld [vmem:[#allocation2 + $0x38] sm:$0xff]  ;;  %v1873_v4 = vpop.f32.mrf.mxu2  ;;  %v5876_v2 = vld [vmem:[%s6878_s10 + $0x81] sm:$0xff] }
 0x174   : > { %v1589_v3 = vadd.f32 %v1581_v11, %v7237_v29  ;;  %v7288_v5 = vpop.f32.mrf.mxu3  ;;  %v5894_v11 = vld [vmem:[%s6878_s10 + $0x82] sm:$0xff] }
 0x175   : > { %v1688_v35 = vpop.f32.mrf.mxu0  ;;  %v1604_v7 = vld [vmem:[#allocation2 + $0x30] sm:$0xff] }
 0x176   : > { %v1774_v6 = vpop.f32.mrf.mxu1  ;;  %1597 = vst.msk [vmem:[#allocation2 + $0x38] sm:$0xff] %vm395_vm1, %v1589_v3  ;;  %v1791_v8 = vld [vmem:[#allocation2 + $0x10] sm:$0xff]  ;;  %v1615_v10 = vadd.f32 %v7166_v28, %v1604_v7 }
 0x177   : > { %1706 = vst.msk [vmem:[#allocation2 + $0x18] sm:$0xff] %vm395_vm1, %v1688_v35  ;;  %v1799_v12 = vadd.f32 %v1791_v8, %v1771_v60  ;;  %v6021_v60 = vld [vmem:[%s8276_s3 + $0x78] sm:$0xf] }
 0x178   : > { %v1892_v14 = vld [vmem:[#allocation2 + $0x8] sm:$0xff]  ;;  %5854 = vmatmul.msk.f32.gmra.mxu0 %vm395_vm1, %v2428_v19  ;;  %1623 = vst.msk [vmem:[%s7187_s27 + $0x60] sm:$0xff] %vm395_vm1, %v1615_v10  ;;  %5882 = vmatmul.msk.f32.gmra.mxu2 %vm395_vm1, %v2429_v22  ;;  %v6039_v10 = vld [vmem:[%s8276_s3 + $0x7c] sm:$0xf] }
 0x179   : > { %5864 = vmatmul.msk.f32.gmra.mxu1 %vm395_vm1, %v2530_v1  ;;  %1807 = vst.msk [vmem:[#allocation2 + $0x10] sm:$0xff] %vm395_vm1, %v1799_v12  ;;  %v1900_v18 = vadd.f32 %v1892_v14, %v1870_v57  ;;  %5900 = vmatmul.msk.f32.gmra.mxu3 %vm395_vm1, %v2531_v16  ;;  %v2432_v57 = vld [vmem:[%s6878_s10 + $0x71] sm:$0xff] }
 0x17a   : > { %v1993_v20 = vld [vmem:[#allocation2] sm:$0xff]  ;;  %6022 = vmatpush.msk.msrb.mxu2 %vm420_vm0, %v6021_v60  ;;  %6040 = vmatpush.msk.msrb.mxu3 %vm420_vm0, %v6039_v10 }
 0x17b   : > { %1908 = vst.msk [vmem:[#allocation2 + $0x8] sm:$0xff] %vm395_vm1, %v1900_v18  ;;  %v2001_v21 = vadd.f32 %v1993_v20, %v7256_v47  ;;  %v1876_v13 = vpop.f32.mrf.mxu2  ;;  %v2533_v47 = vld [vmem:[%s6878_s10 + $0x62] sm:$0xff]  ;;  %v5923_v18 = vld [vmem:[%s6683_s14 + $0x11] sm:$0xff] }
 0x17c   : > { %v7304_v23 = vpop.f32.mrf.mxu3  ;;  %v5910_v10 = vld [vmem:[%s6683_s14 + $0x60] sm:$0xff] }
 0x17d   : > { %2009 = vst.msk [vmem:[#allocation2] sm:$0xff] %vm395_vm1, %v2001_v21  ;;  %v1691_v24 = vpop.f32.mrf.mxu0  ;;  %v1605_v25 = vld [vmem:[#allocation2 + $0x38] sm:$0xff] }
 0x17e   : > { %v1777_v37 = vpop.f32.mrf.mxu1  ;;  %1707 = vst.msk [vmem:[#allocation2 + $0x20] sm:$0xff] %vm395_vm1, %v1691_v24  ;;  %v1792_v27 = vld [vmem:[#allocation2 + $0x18] sm:$0xff]  ;;  %v1616_v29 = vadd.f32 %v7166_v28, %v1605_v25  ;;  %v5985_v28 = vld [vmem:[%s8276_s3 + $0x70] sm:$0xf]  ;;  %v5906_v24 = vld [vmem:[%s6683_s14 + $0x20] sm:$0xff] }
 0x17f   : > { %v1800_v30 = vadd.f32 %v1792_v27, %v1774_v6  ;;  %5986 = vmatpush.msk.msrb.mxu0 %vm420_vm0, %v5985_v28  ;;  %v5905_v6 = vld [vmem:[%s6683_s14 + $0x10] sm:$0xff] }
 0x180   : > { %v1893_v32 = vld [vmem:[#allocation2 + $0x10] sm:$0xff]  ;;  %5855 = vmatmul.msk.f32.gmra.mxu0 %vm395_vm1, %v2429_v22  ;;  %1624 = vst.msk [vmem:[%s7187_s27 + $0x70] sm:$0xff] %vm395_vm1, %v1616_v29  ;;  %5883 = vmatmul.msk.f32.gmra.mxu2 %vm395_vm1, %v2430_v34 }
 0x181   : > { %5865 = vmatmul.msk.f32.gmra.mxu1 %vm395_vm1, %v2531_v16  ;;  %1808 = vst.msk [vmem:[#allocation2 + $0x18] sm:$0xff] %vm395_vm1, %v1800_v30  ;;  %v1901_v26 = vadd.f32 %v1893_v32, %v1873_v4  ;;  %5901 = vmatmul.msk.f32.gmra.mxu3 %vm395_vm1, %v2532_v36 }
 0x182   : > { %v1994_v38 = vld [vmem:[#allocation2 + $0x8] sm:$0xff] }
 0x183   : > { %1909 = vst.msk [vmem:[#allocation2 + $0x10] sm:$0xff] %vm395_vm1, %v1901_v26  ;;  %v2002_v40 = vadd.f32 %v1994_v38, %v7272_v58  ;;  %v1879_v15 = vpop.f32.mrf.mxu2  ;;  %v2534_v58 = vld [vmem:[%s6878_s10 + $0x72] sm:$0xff] }
 0x184   : > { %v1981_v39 = vpop.f32.mrf.mxu3  ;;  %v2095_v22 = vld [vmem:[#allocation2] sm:$0xff] }
 0x185   : > { %2010 = vst.msk [vmem:[#allocation2 + $0x8] sm:$0xff] %vm395_vm1, %v2002_v40  ;;  %v1694_v41 = vpop.f32.mrf.mxu0  ;;  %v1793_v42 = vld [vmem:[#allocation2 + $0x20] sm:$0xff] }
 0x186   : > { %v1780_v43 = vpop.f32.mrf.mxu1  ;;  %1708 = vst.msk [vmem:[#allocation2 + $0x28] sm:$0xff] %vm395_vm1, %v1694_v41  ;;  %v1801_v44 = vadd.f32 %v1793_v42, %v1777_v37  ;;  %v5924_v37 = vld [vmem:[%s6683_s14 + $0x21] sm:$0xff] }
 0x188   : > { %1809 = vst.msk [vmem:[#allocation2 + $0x20] sm:$0xff] %vm395_vm1, %v1801_v44  ;;  %v1894_v45 = vld [vmem:[#allocation2 + $0x18] sm:$0xff]  ;;  %5856 = vmatmul.msk.f32.gmra.mxu0 %vm395_vm1, %v2430_v34  ;;  %5884 = vmatmul.msk.f32.gmra.mxu2 %vm395_vm1, %v2431_v46 }
 0x189   : > { %5866 = vmatmul.msk.f32.gmra.mxu1 %vm395_vm1, %v2532_v36  ;;  %v1902_v48 = vadd.f32 %v1894_v45, %v1876_v13  ;;  %5902 = vmatmul.msk.f32.gmra.mxu3 %vm395_vm1, %v2533_v47 }
 0x18a   : > { %v1995_v49 = vld [vmem:[#allocation2 + $0x10] sm:$0xff] }
 0x18b   : > { %1910 = vst.msk [vmem:[#allocation2 + $0x18] sm:$0xff] %vm395_vm1, %v1902_v48  ;;  %v2003_v50 = vadd.f32 %v1995_v49, %v7288_v5  ;;  %v1882_v31 = vpop.f32.mrf.mxu2 }
 0x18c   : > { %v7335_v51 = vpop.f32.mrf.mxu3  ;;  %v2096_v34 = vld [vmem:[#allocation2 + $0x8] sm:$0xff] }
 0x18d   : > { %2011 = vst.msk [vmem:[#allocation2 + $0x10] sm:$0xff] %vm395_vm1, %v2003_v50  ;;  %v1697_v53 = vpop.f32.mrf.mxu0  ;;  %v1794_v17 = vld [vmem:[#allocation2 + $0x28] sm:$0xff] }
 0x18e   : > { %v1783_v54 = vpop.f32.mrf.mxu1  ;;  %1709 = vst.msk [vmem:[#allocation2 + $0x30] sm:$0xff] %vm395_vm1, %v1697_v53  ;;  %v1802_v9 = vadd.f32 %v1794_v17, %v1780_v43 }
 0x18f   : > { %v1895_v55 = vld [vmem:[#allocation2 + $0x20] sm:$0xff] }
 0x190   : > { %1810 = vst.msk [vmem:[#allocation2 + $0x28] sm:$0xff] %vm395_vm1, %v1802_v9  ;;  %v1903_v56 = vadd.f32 %v1895_v55, %v1879_v15  ;;  %5857 = vmatmul.msk.f32.gmra.mxu0 %vm395_vm1, %v2431_v46  ;;  %5885 = vmatmul.msk.f32.gmra.mxu2 %vm395_vm1, %v2432_v57  ;;  %v5907_v15 = vld [vmem:[%s6683_s14 + $0x30] sm:$0xff] }
 0x191   : > { %5867 = vmatmul.msk.f32.gmra.mxu1 %vm395_vm1, %v2533_v47  ;;  %5903 = vmatmul.msk.f32.gmra.mxu3 %vm395_vm1, %v2534_v58 }
 0x192   : > { %1911 = vst.msk [vmem:[#allocation2 + $0x20] sm:$0xff] %vm395_vm1, %v1903_v56  ;;  %v1996_v59 = vld [vmem:[#allocation2 + $0x18] sm:$0xff] }
 0x193   : > { %v2004_v33 = vadd.f32 %v1996_v59, %v7304_v23  ;;  %v1885_v61 = vpop.f32.mrf.mxu2 }
 0x194   : > { %v7356_v62 = vpop.f32.mrf.mxu3  ;;  %v2097_v47 = vld [vmem:[#allocation2 + $0x10] sm:$0xff] }
 0x195   : > { %2012 = vst.msk [vmem:[#allocation2 + $0x18] sm:$0xff] %vm395_vm1, %v2004_v33  ;;  %v1700_v63 = vpop.f32.mrf.mxu0  ;;  %v1795_v0 = vld [vmem:[#allocation2 + $0x30] sm:$0xff] }
 0x196   : > { %v1786_v19 = vpop.f32.mrf.mxu1  ;;  %1710 = vst.msk [vmem:[#allocation2 + $0x38] sm:$0xff] %vm395_vm1, %v1700_v63  ;;  %v1803_v1 = vadd.f32 %v1795_v0, %v1783_v54  ;;  %v5927_v63 = vld [vmem:[%s6683_s14 + $0x51] sm:$0xff] }
 0x197   : > { %v1896_v3 = vld [vmem:[#allocation2 + $0x28] sm:$0xff] }
 0x198   : > { %1811 = vst.msk [vmem:[#allocation2 + $0x30] sm:$0xff] %vm395_vm1, %v1803_v1  ;;  %v1904_v4 = vadd.f32 %v1896_v3, %v1882_v31  ;;  %5858 = vmatmul.msk.f32.gmra.mxu0 %vm395_vm1, %v2432_v57  ;;  %5886 = vmatmul.msk.f32.gmra.mxu2 %vm395_vm1, %v5876_v2 }
 0x199   : > { %5868 = vmatmul.msk.f32.gmra.mxu1 %vm395_vm1, %v2534_v58  ;;  %v1997_v5 = vld [vmem:[#allocation2 + $0x20] sm:$0xff]  ;;  %5904 = vmatmul.msk.f32.gmra.mxu3 %vm395_vm1, %v5894_v11 }
 0x19a   : > { %1912 = vst.msk [vmem:[#allocation2 + $0x28] sm:$0xff] %vm395_vm1, %v1904_v4  ;;  %v2005_v35 = vadd.f32 %v1997_v5, %v1981_v39  ;;  %v5925_v39 = vld [vmem:[%s6683_s14 + $0x31] sm:$0xff] }
 0x19b   : > { %v1888_v7 = vpop.f32.mrf.mxu2 }
 0x19c   : > { %2013 = vst.msk [vmem:[#allocation2 + $0x20] sm:$0xff] %vm395_vm1, %v2005_v35  ;;  %v7370_v8 = vpop.f32.mrf.mxu3  ;;  %v2098_v58 = vld [vmem:[#allocation2 + $0x18] sm:$0xff] }
 0x19d   : > { %v1796_v12 = vld [vmem:[#allocation2 + $0x38] sm:$0xff]  ;;  %v2071_v14 = vpop.f32.mrf.mxu0 }
 0x19e   : > { %v2173_v16 = vpop.f32.mrf.mxu1  ;;  %v1804_v20 = vadd.f32 %v1796_v12, %v1786_v19  ;;  %v2103_v21 = vadd.f32 %v2095_v22, %v2071_v14  ;;  %v5928_v12 = vld [vmem:[%s6683_s14 + $0x61] sm:$0xff] }
 0x19f   : > { %v1897_v13 = vld [vmem:[#allocation2 + $0x30] sm:$0xff] }
 0x1a0   : > { %1812 = vst.msk [vmem:[#allocation2 + $0x38] sm:$0xff] %vm395_vm1, %v1804_v20  ;;  %v1905_v23 = vadd.f32 %v1897_v13, %v1885_v61  ;;  %5915 = vmatmul.msk.f32.vlgmr.msra.gmra.mxu0 %vm395_vm1, %v5905_v6  ;;  %5951 = vmatmul.msk.f32.vlgmr.msra.gmra.mxu2 %vm395_vm1, %v5906_v24  ;;  %v6057_v13 = vld [vmem:[%s8276_s3 + $0x80] sm:$0xf] }
 0x1a1   : > { %5933 = vmatmul.msk.f32.vlgmr.msra.gmra.mxu1 %vm395_vm1, %v5923_v18  ;;  %2111 = vst.msk [vmem:[#allocation2] sm:$0xff] %vm395_vm1, %v2103_v21  ;;  %v1998_v25 = vld [vmem:[#allocation2 + $0x28] sm:$0xff]  ;;  %5969 = vmatmul.msk.f32.vlgmr.msra.gmra.mxu3 %vm395_vm1, %v5924_v37 }
 0x1a2   : > { %1913 = vst.msk [vmem:[#allocation2 + $0x30] sm:$0xff] %vm395_vm1, %v1905_v23  ;;  %v2006_v27 = vadd.f32 %v1998_v25, %v7335_v51  ;;  %v5908_v51 = vld [vmem:[%s6683_s14 + $0x40] sm:$0xff]  ;;  %6058 = vmatpush.msk.msra.mxu0 %vm420_vm0, %v6057_v13 }
 0x1a3   : > { %v2275_v29 = vpop.f32.mrf.mxu2  ;;  %v2099_v5 = vld [vmem:[#allocation2 + $0x20] sm:$0xff] }
 0x1a4   : > { %2014 = vst.msk [vmem:[#allocation2 + $0x28] sm:$0xff] %vm395_vm1, %v2006_v27  ;;  %v7388_v30 = vpop.f32.mrf.mxu3 }
 0x1a5   : > { %v2074_v32 = vpop.f32.mrf.mxu0 }
 0x1a6   : > { %v2176_v36 = vpop.f32.mrf.mxu1  ;;  %v2104_v26 = vadd.f32 %v2096_v34, %v2074_v32  ;;  %v5929_v32 = vld [vmem:[%s6683_s14 + $0x71] sm:$0xff] }
 0x1a7   : > { %v1898_v38 = vld [vmem:[#allocation2 + $0x38] sm:$0xff] }
 0x1a8   : > { %2112 = vst.msk [vmem:[#allocation2 + $0x8] sm:$0xff] %vm395_vm1, %v2104_v26  ;;  %v2197_v28 = vld [vmem:[#allocation2] sm:$0xff]  ;;  %v1906_v40 = vadd.f32 %v1898_v38, %v1888_v7  ;;  %5916 = vmatmul.msk.f32.gmra.mxu0 %vm395_vm1, %v5906_v24  ;;  %5952 = vmatmul.msk.f32.gmra.mxu2 %vm395_vm1, %v5907_v15 }
 0x1a9   : > { %5934 = vmatmul.msk.f32.gmra.mxu1 %vm395_vm1, %v5924_v37  ;;  %v2205_v41 = vadd.f32 %v2197_v28, %v2173_v16  ;;  %v1999_v42 = vld [vmem:[#allocation2 + $0x30] sm:$0xff]  ;;  %5970 = vmatmul.msk.f32.gmra.mxu3 %vm395_vm1, %v5925_v39 }
 0x1aa   : > { %1914 = vst.msk [vmem:[#allocation2 + $0x38] sm:$0xff] %vm395_vm1, %v1906_v40  ;;  %v2007_v43 = vadd.f32 %v1999_v42, %v7356_v62  ;;  %v5909_v62 = vld [vmem:[%s6683_s14 + $0x50] sm:$0xff] }
 0x1ab   : > { %2213 = vst.msk [vmem:[#allocation2] sm:$0xff] %vm395_vm1, %v2205_v41  ;;  %v2278_v44 = vpop.f32.mrf.mxu2  ;;  %v2100_v24 = vld [vmem:[#allocation2 + $0x28] sm:$0xff] }
 0x1ac   : > { %2015 = vst.msk [vmem:[#allocation2 + $0x30] sm:$0xff] %vm395_vm1, %v2007_v43  ;;  %v7401_v45 = vpop.f32.mrf.mxu3  ;;  %v6075_v43 = vld [vmem:[%s8276_s3 + $0x84] sm:$0xf] }
 0x1ad   : > { %v2077_v46 = vpop.f32.mrf.mxu0  ;;  %6076 = vmatpush.msk.msra.mxu1 %vm420_vm0, %v6075_v43  ;;  %v5998_v43 = vld [vmem:[%s6789_s17 + $0x41] sm:$0xff] }
 0x1ae   : > { %v2179_v48 = vpop.f32.mrf.mxu1  ;;  %v2105_v49 = vadd.f32 %v2097_v47, %v2077_v46  ;;  %v5912_v46 = vld [vmem:[%s6683_s14 + $0x80] sm:$0xff] }
 0x1af   : > { %v2198_v50 = vld [vmem:[#allocation2 + $0x8] sm:$0xff] }
 0x1b0   : > { %2113 = vst.msk [vmem:[#allocation2 + $0x10] sm:$0xff] %vm395_vm1, %v2105_v49  ;;  %v2206_v31 = vadd.f32 %v2198_v50, %v2176_v36  ;;  %5917 = vmatmul.msk.f32.gmra.mxu0 %vm395_vm1, %v5907_v15  ;;  %5953 = vmatmul.msk.f32.gmra.mxu2 %vm395_vm1, %v5908_v51  ;;  %v5930_v47 = vld [vmem:[%s6683_s14 + $0x81] sm:$0xff] }
 0x1b1   : > { %5935 = vmatmul.msk.f32.gmra.mxu1 %vm395_vm1, %v5925_v39  ;;  %v2000_v53 = vld [vmem:[#allocation2 + $0x38] sm:$0xff]  ;;  %5971 = vmatmul.msk.f32.gmra.mxu3 %vm395_vm1, %v5926_v52  ;;  %v6093_v50 = vld [vmem:[%s8276_s3 + $0x88] sm:$0xf] }
 0x1b2   : > { %2214 = vst.msk [vmem:[#allocation2 + $0x8] sm:$0xff] %vm395_vm1, %v2206_v31  ;;  %v2299_v17 = vld [vmem:[#allocation2] sm:$0xff]  ;;  %v2008_v54 = vadd.f32 %v2000_v53, %v7370_v8  ;;  %6094 = vmatpush.msk.msra.mxu2 %vm420_vm0, %v6093_v50 }
 0x1b3   : > { %v2307_v9 = vadd.f32 %v2299_v17, %v2275_v29  ;;  %v2281_v55 = vpop.f32.mrf.mxu2  ;;  %v2101_v39 = vld [vmem:[#allocation2 + $0x30] sm:$0xff] }
 0x1b4   : > { %2016 = vst.msk [vmem:[#allocation2 + $0x38] sm:$0xff] %vm395_vm1, %v2008_v54  ;;  %v7413_v56 = vpop.f32.mrf.mxu3 }
 0x1b5   : > { %2315 = vst.msk [vmem:[#allocation2] sm:$0xff] %vm395_vm1, %v2307_v9  ;;  %v2080_v57 = vpop.f32.mrf.mxu0 }
 0x1b6   : > { %v2182_v59 = vpop.f32.mrf.mxu1  ;;  %v2106_v60 = vadd.f32 %v2098_v58, %v2080_v57  ;;  %v5966_v57 = vld [vmem:[%s6683_s14 + $0x91] sm:$0xff] }
 0x1b7   : > { %v2199_v33 = vld [vmem:[#allocation2 + $0x10] sm:$0xff] }
 0x1b8   : > { %2114 = vst.msk [vmem:[#allocation2 + $0x18] sm:$0xff] %vm395_vm1, %v2106_v60  ;;  %v2207_v61 = vadd.f32 %v2199_v33, %v2179_v48  ;;  %5918 = vmatmul.msk.f32.gmra.mxu0 %vm395_vm1, %v5908_v51  ;;  %5954 = vmatmul.msk.f32.gmra.mxu2 %vm395_vm1, %v5909_v62 }
 0x1b9   : > { %5936 = vmatmul.msk.f32.gmra.mxu1 %vm395_vm1, %v5926_v52  ;;  %v2300_v0 = vld [vmem:[#allocation2 + $0x8] sm:$0xff]  ;;  %5972 = vmatmul.msk.f32.gmra.mxu3 %vm395_vm1, %v5927_v63 }
 0x1ba   : > { %2215 = vst.msk [vmem:[#allocation2 + $0x10] sm:$0xff] %vm395_vm1, %v2207_v61  ;;  %v2308_v19 = vadd.f32 %v2300_v0, %v2278_v44 }
 0x1bb   : > { %v2284_v2 = vpop.f32.mrf.mxu2  ;;  %v2102_v54 = vld [vmem:[#allocation2 + $0x38] sm:$0xff] }
 0x1bc   : > { %2316 = vst.msk [vmem:[#allocation2 + $0x8] sm:$0xff] %vm395_vm1, %v2308_v19  ;;  %v2401_v1 = vld [vmem:[#allocation2] sm:$0xff]  ;;  %v7425_v11 = vpop.f32.mrf.mxu3  ;;  %v6111_v19 = vld [vmem:[%s8276_s3 + $0x8c] sm:$0xf] }
 0x1bd   : > { %v2409_v3 = vadd.f32 %v2401_v1, %v7388_v30  ;;  %v2083_v4 = vpop.f32.mrf.mxu0  ;;  %v5911_v30 = vld [vmem:[%s6683_s14 + $0x70] sm:$0xff]  ;;  %6112 = vmatpush.msk.msra.mxu3 %vm420_vm0, %v6111_v19 }
 0x1be   : > { %v2185_v35 = vpop.f32.mrf.mxu1  ;;  %v2107_v6 = vadd.f32 %v2099_v5, %v2083_v4  ;;  %v5995_v4 = vld [vmem:[%s6789_s17 + $0x11] sm:$0xff] }
 0x1bf   : > { %2417 = vst.msk [vmem:[#allocation2] sm:$0xff] %vm395_vm1, %v2409_v3  ;;  %v2200_v7 = vld [vmem:[#allocation2 + $0x18] sm:$0xff] }
 0x1c0   : > { %2115 = vst.msk [vmem:[#allocation2 + $0x20] sm:$0xff] %vm395_vm1, %v2107_v6  ;;  %v2208_v8 = vadd.f32 %v2200_v7, %v2182_v59  ;;  %5919 = vmatmul.msk.f32.gmra.mxu0 %vm395_vm1, %v5909_v62  ;;  %5955 = vmatmul.msk.f32.gmra.mxu2 %vm395_vm1, %v5910_v10  ;;  %v5978_v7 = vld [vmem:[%s6789_s17 + $0x20] sm:$0xff] }
 0x1c1   : > { %5937 = vmatmul.msk.f32.gmra.mxu1 %vm395_vm1, %v5927_v63  ;;  %v2301_v14 = vld [vmem:[#allocation2 + $0x10] sm:$0xff]  ;;  %5973 = vmatmul.msk.f32.gmra.mxu3 %vm395_vm1, %v5928_v12 }
 0x1c2   : > { %2216 = vst.msk [vmem:[#allocation2 + $0x18] sm:$0xff] %vm395_vm1, %v2208_v8  ;;  %v2309_v22 = vadd.f32 %v2301_v14, %v2281_v55  ;;  %v5996_v8 = vld [vmem:[%s6789_s17 + $0x21] sm:$0xff] }
 0x1c3   : > { %v2402_v16 = vld [vmem:[#allocation2 + $0x8] sm:$0xff]  ;;  %v2287_v20 = vpop.f32.mrf.mxu2 }
 0x1c4   : > { %2317 = vst.msk [vmem:[#allocation2 + $0x10] sm:$0xff] %vm395_vm1, %v2309_v22  ;;  %v2410_v18 = vadd.f32 %v2402_v16, %v7401_v45  ;;  %v7439_v21 = vpop.f32.mrf.mxu3 }
 0x1c5   : > { %v2086_v23 = vpop.f32.mrf.mxu0 }
 0x1c6   : > { %v2188_v37 = vpop.f32.mrf.mxu1  ;;  %2418 = vst.msk [vmem:[#allocation2 + $0x8] sm:$0xff] %vm395_vm1, %v2410_v18  ;;  %v2108_v25 = vadd.f32 %v2100_v24, %v2086_v23 }
 0x1c7   : > { %v2201_v27 = vld [vmem:[#allocation2 + $0x20] sm:$0xff] }
 0x1c8   : > { %2116 = vst.msk [vmem:[#allocation2 + $0x28] sm:$0xff] %vm395_vm1, %v2108_v25  ;;  %v2209_v29 = vadd.f32 %v2201_v27, %v2185_v35  ;;  %5920 = vmatmul.msk.f32.gmra.mxu0 %vm395_vm1, %v5910_v10  ;;  %5956 = vmatmul.msk.f32.gmra.mxu2 %vm395_vm1, %v5911_v30  ;;  %v5979_v25 = vld [vmem:[%s6789_s17 + $0x30] sm:$0xff] }
 0x1c9   : > { %5938 = vmatmul.msk.f32.gmra.mxu1 %vm395_vm1, %v5928_v12  ;;  %v2302_v34 = vld [vmem:[#allocation2 + $0x18] sm:$0xff]  ;;  %5974 = vmatmul.msk.f32.gmra.mxu3 %vm395_vm1, %v5929_v32 }
 0x1ca   : > { %2217 = vst.msk [vmem:[#allocation2 + $0x20] sm:$0xff] %vm395_vm1, %v2209_v29  ;;  %v2310_v36 = vadd.f32 %v2302_v34, %v2284_v2  ;;  %v2503_v2 = vld [vmem:[#allocation2] sm:$0xff]  ;;  %v5997_v27 = vld [vmem:[%s6789_s17 + $0x31] sm:$0xff] }
 0x1cb   : > { %v2403_v26 = vld [vmem:[#allocation2 + $0x10] sm:$0xff]  ;;  %v2290_v28 = vpop.f32.mrf.mxu2 }
 0x1cc   : > { %2318 = vst.msk [vmem:[#allocation2 + $0x18] sm:$0xff] %vm395_vm1, %v2310_v36  ;;  %v2411_v38 = vadd.f32 %v2403_v26, %v7413_v56  ;;  %v7456_v40 = vpop.f32.mrf.mxu3  ;;  %v5948_v56 = vld [vmem:[%s6683_s14 + $0x90] sm:$0xff] }
 0x1cd   : > { %v2089_v15 = vpop.f32.mrf.mxu0 }
 0x1ce   : > { %v2191_v41 = vpop.f32.mrf.mxu1  ;;  %2419 = vst.msk [vmem:[#allocation2 + $0x10] sm:$0xff] %vm395_vm1, %v2411_v38  ;;  %v2109_v42 = vadd.f32 %v2101_v39, %v2089_v15 }
 0x1cf   : > { %v2202_v44 = vld [vmem:[#allocation2 + $0x28] sm:$0xff] }
 0x1d0   : > { %2117 = vst.msk [vmem:[#allocation2 + $0x30] sm:$0xff] %vm395_vm1, %v2109_v42  ;;  %v2210_v45 = vadd.f32 %v2202_v44, %v2188_v37  ;;  %5921 = vmatmul.msk.f32.gmra.mxu0 %vm395_vm1, %v5911_v30  ;;  %5957 = vmatmul.msk.f32.gmra.mxu2 %vm395_vm1, %v5912_v46  ;;  %v5980_v42 = vld [vmem:[%s6789_s17 + $0x40] sm:$0xff] }
 0x1d1   : > { %5939 = vmatmul.msk.f32.gmra.mxu1 %vm395_vm1, %v5929_v32  ;;  %v2303_v48 = vld [vmem:[#allocation2 + $0x20] sm:$0xff]  ;;  %5975 = vmatmul.msk.f32.gmra.mxu3 %vm395_vm1, %v5930_v47 }
 0x1d2   : > { %2218 = vst.msk [vmem:[#allocation2 + $0x28] sm:$0xff] %vm395_vm1, %v2210_v45  ;;  %v2311_v49 = vadd.f32 %v2303_v48, %v2287_v20 }
 0x1d3   : > { %v2404_v31 = vld [vmem:[#allocation2 + $0x18] sm:$0xff]  ;;  %v2293_v52 = vpop.f32.mrf.mxu2 }
 0x1d4   : > { %2319 = vst.msk [vmem:[#allocation2 + $0x20] sm:$0xff] %vm395_vm1, %v2311_v49  ;;  %v2412_v51 = vadd.f32 %v2404_v31, %v7425_v11  ;;  %v7477_v53 = vpop.f32.mrf.mxu3  ;;  %v5977_v11 = vld [vmem:[%s6789_s17 + $0x10] sm:$0xff] }
 0x1d5   : > { %v2092_v17 = vpop.f32.mrf.mxu0 }
 0x1d6   : > { %v2194_v9 = vpop.f32.mrf.mxu1  ;;  %2420 = vst.msk [vmem:[#allocation2 + $0x18] sm:$0xff] %vm395_vm1, %v2412_v51  ;;  %v2110_v55 = vadd.f32 %v2102_v54, %v2092_v17  ;;  %v5981_v54 = vld [vmem:[%s6789_s17 + $0x50] sm:$0xff] }
 0x1d7   : > { %v2203_v58 = vld [vmem:[#allocation2 + $0x30] sm:$0xff] }
 0x1d8   : > { %2118 = vst.msk [vmem:[#allocation2 + $0x38] sm:$0xff] %vm395_vm1, %v2110_v55  ;;  %v2211_v59 = vadd.f32 %v2203_v58, %v2191_v41  ;;  %5922 = vmatmul.msk.f32.gmra.mxu0 %vm395_vm1, %v5912_v46  ;;  %5958 = vmatmul.msk.f32.gmra.mxu2 %vm395_vm1, %v5948_v56 }
 0x1d9   : > { %5940 = vmatmul.msk.f32.gmra.mxu1 %vm395_vm1, %v5930_v47  ;;  %v2304_v60 = vld [vmem:[#allocation2 + $0x28] sm:$0xff]  ;;  %5976 = vmatmul.msk.f32.gmra.mxu3 %vm395_vm1, %v5966_v57 }
 0x1da   : > { %2219 = vst.msk [vmem:[#allocation2 + $0x30] sm:$0xff] %vm395_vm1, %v2211_v59  ;;  %v2312_v33 = vadd.f32 %v2304_v60, %v2290_v28  ;;  %v2505_v28 = vld [vmem:[#allocation2 + $0x10] sm:$0xff] }
 0x1db   : > { %v2405_v61 = vld [vmem:[#allocation2 + $0x20] sm:$0xff]  ;;  %v2296_v63 = vpop.f32.mrf.mxu2 }
 0x1dc   : > { %2320 = vst.msk [vmem:[#allocation2 + $0x28] sm:$0xff] %vm395_vm1, %v2312_v33  ;;  %v2413_v62 = vadd.f32 %v2405_v61, %v7439_v21  ;;  %v7490_v0 = vpop.f32.mrf.mxu3  ;;  %v2504_v21 = vld [vmem:[#allocation2 + $0x8] sm:$0xff] }
 0x1dd   : > { %v2479_v1 = vpop.f32.mrf.mxu0  ;;  %v2506_v31 = vld [vmem:[#allocation2 + $0x18] sm:$0xff] }
 0x1de   : > { %v2581_v3 = vpop.f32.mrf.mxu1  ;;  %2421 = vst.msk [vmem:[#allocation2 + $0x20] sm:$0xff] %vm395_vm1, %v2413_v62  ;;  %v2511_v5 = vadd.f32 %v2503_v2, %v2479_v1  ;;  %v5982_v1 = vld [vmem:[%s6789_s17 + $0x60] sm:$0xff] }
 0x1df   : > { %v2204_v35 = vld [vmem:[#allocation2 + $0x38] sm:$0xff]  ;;  %v6000_v2 = vld [vmem:[%s6789_s17 + $0x61] sm:$0xff] }
 0x1e0   : > { %v2212_v6 = vadd.f32 %v2204_v35, %v2194_v9  ;;  %2519 = vst.msk [vmem:[#allocation2] sm:$0xff] %vm395_vm1, %v2511_v5  ;;  %5987 = vmatmul.msk.f32.vlgmr.msrb.gmra.mxu0 %vm395_vm1, %v5977_v11  ;;  %6023 = vmatmul.msk.f32.vlgmr.msrb.gmra.mxu2 %vm395_vm1, %v5978_v7  ;;  %v5999_v9 = vld [vmem:[%s6789_s17 + $0x51] sm:$0xff] }
 0x1e1   : > { %6005 = vmatmul.msk.f32.vlgmr.msrb.gmra.mxu1 %vm395_vm1, %v5995_v4  ;;  %v2305_v10 = vld [vmem:[#allocation2 + $0x30] sm:$0xff]  ;;  %6041 = vmatmul.msk.f32.vlgmr.msrb.gmra.mxu3 %vm395_vm1, %v5996_v8 }
 0x1e2   : > { %2220 = vst.msk [vmem:[#allocation2 + $0x38] sm:$0xff] %vm395_vm1, %v2212_v6  ;;  %v2313_v12 = vadd.f32 %v2305_v10, %v2293_v52 }
 0x1e3   : > { %v2406_v14 = vld [vmem:[#allocation2 + $0x28] sm:$0xff]  ;;  %v2683_v16 = vpop.f32.mrf.mxu2 }
 0x1e4   : > { %2321 = vst.msk [vmem:[#allocation2 + $0x30] sm:$0xff] %vm395_vm1, %v2313_v12  ;;  %v2414_v22 = vadd.f32 %v2406_v14, %v7456_v40  ;;  %v7509_v18 = vpop.f32.mrf.mxu3 }
 0x1e5   : > { %v2482_v20 = vpop.f32.mrf.mxu0  ;;  %v2507_v61 = vld [vmem:[#allocation2 + $0x20] sm:$0xff] }
 0x1e6   : > { %v2584_v13 = vpop.f32.mrf.mxu1  ;;  %2422 = vst.msk [vmem:[#allocation2 + $0x28] sm:$0xff] %vm395_vm1, %v2414_v22  ;;  %v2512_v23 = vadd.f32 %v2504_v21, %v2482_v20 }
 0x1e7   : > { %v2605_v24 = vld [vmem:[#allocation2] sm:$0xff] }
 0x1e8   : > { %2520 = vst.msk [vmem:[#allocation2 + $0x8] sm:$0xff] %vm395_vm1, %v2512_v23  ;;  %v2613_v37 = vadd.f32 %v2605_v24, %v2581_v3  ;;  %5988 = vmatmul.msk.f32.gmra.mxu0 %vm395_vm1, %v5978_v7  ;;  %6024 = vmatmul.msk.f32.gmra.mxu2 %vm395_vm1, %v5979_v25  ;;  %v6137_v7 = vld [vmem:[%s8276_s3 + $0x90] sm:$0xf] }
 0x1e9   : > { %6006 = vmatmul.msk.f32.gmra.mxu1 %vm395_vm1, %v5996_v8  ;;  %v2306_v29 = vld [vmem:[#allocation2 + $0x38] sm:$0xff]  ;;  %6042 = vmatmul.msk.f32.gmra.mxu3 %vm395_vm1, %v5997_v27 }
 0x1ea   : > { %2621 = vst.msk [vmem:[#allocation2] sm:$0xff] %vm395_vm1, %v2613_v37  ;;  %v2314_v30 = vadd.f32 %v2306_v29, %v2296_v63  ;;  %6138 = vmatpush.msk.msrb.mxu0 %vm420_vm0, %v6137_v7  ;;  %v6001_v24 = vld [vmem:[%s6789_s17 + $0x71] sm:$0xff] }
 0x1eb   : > { %v2407_v32 = vld [vmem:[#allocation2 + $0x30] sm:$0xff]  ;;  %v2686_v36 = vpop.f32.mrf.mxu2 }
 0x1ec   : > { %2322 = vst.msk [vmem:[#allocation2 + $0x38] sm:$0xff] %vm395_vm1, %v2314_v30  ;;  %v2415_v34 = vadd.f32 %v2407_v32, %v7477_v53  ;;  %v7522_v26 = vpop.f32.mrf.mxu3 }
 0x1ed   : > { %v2485_v38 = vpop.f32.mrf.mxu0  ;;  %v2508_v10 = vld [vmem:[#allocation2 + $0x28] sm:$0xff] }
 0x1ee   : > { %v2587_v40 = vpop.f32.mrf.mxu1  ;;  %2423 = vst.msk [vmem:[#allocation2 + $0x30] sm:$0xff] %vm395_vm1, %v2415_v34  ;;  %v2513_v15 = vadd.f32 %v2505_v28, %v2485_v38 }
 0x1ef   : > { %v2606_v39 = vld [vmem:[#allocation2 + $0x8] sm:$0xff] }
 0x1f0   : > { %2521 = vst.msk [vmem:[#allocation2 + $0x10] sm:$0xff] %vm395_vm1, %v2513_v15  ;;  %v2614_v41 = vadd.f32 %v2606_v39, %v2584_v13  ;;  %5989 = vmatmul.msk.f32.gmra.mxu0 %vm395_vm1, %v5979_v25  ;;  %6025 = vmatmul.msk.f32.gmra.mxu2 %vm395_vm1, %v5980_v42  ;;  %v5983_v13 = vld [vmem:[%s6789_s17 + $0x70] sm:$0xff] }
 0x1f1   : > { %6007 = vmatmul.msk.f32.gmra.mxu1 %vm395_vm1, %v5997_v27  ;;  %v2707_v44 = vld [vmem:[#allocation2] sm:$0xff]  ;;  %6043 = vmatmul.msk.f32.gmra.mxu3 %vm395_vm1, %v5998_v43 }
 0x1f2   : > { %2622 = vst.msk [vmem:[#allocation2 + $0x8] sm:$0xff] %vm395_vm1, %v2614_v41  ;;  %v2715_v45 = vadd.f32 %v2707_v44, %v2683_v16  ;;  %v7571_v16 = vld [vmem:[%s8277_s4] ss:$0 sm:$0xff]  ;;  %v6173_v44 = vld [vmem:[%s8276_s3 + $0x98] sm:$0xf] }
 0x1f3   : > { %v2408_v46 = vld [vmem:[#allocation2 + $0x38] sm:$0xff]  ;;  %v2689_v48 = vpop.f32.mrf.mxu2  ;;  %v5984_v41 = vld [vmem:[%s6789_s17 + $0x80] sm:$0xff]  ;;  %6174 = vmatpush.msk.msrb.mxu2 %vm420_vm0, %v6173_v44 }
 0x1f4   : > { %2723 = vst.msk [vmem:[#allocation2] sm:$0xff] %vm395_vm1, %v2715_v45  ;;  %v2416_v47 = vadd.f32 %v2408_v46, %v7490_v0  ;;  %v7535_v49 = vpop.f32.mrf.mxu3 }
 0x1f5   : > { %v2488_v50 = vpop.f32.mrf.mxu0  ;;  %v2509_v34 = vld [vmem:[#allocation2 + $0x30] sm:$0xff] }
 0x1f6   : > { %v2590_v51 = vpop.f32.mrf.mxu1  ;;  %2424 = vst.msk [vmem:[#allocation2 + $0x38] sm:$0xff] %vm395_vm1, %v2416_v47  ;;  %v2514_v52 = vadd.f32 %v2506_v31, %v2488_v50 }
 0x1f7   : > { %v2607_v53 = vld [vmem:[#allocation2 + $0x10] sm:$0xff] }
 0x1f8   : > { %2522 = vst.msk [vmem:[#allocation2 + $0x18] sm:$0xff] %vm395_vm1, %v2514_v52  ;;  %v2615_v17 = vadd.f32 %v2607_v53, %v2587_v40  ;;  %5990 = vmatmul.msk.f32.gmra.mxu0 %vm395_vm1, %v5980_v42  ;;  %6026 = vmatmul.msk.f32.gmra.mxu2 %vm395_vm1, %v5981_v54  ;;  %v6155_v40 = vld [vmem:[%s8276_s3 + $0x94] sm:$0xf] }
 0x1f9   : > { %6008 = vmatmul.msk.f32.gmra.mxu1 %vm395_vm1, %v5998_v43  ;;  %v2708_v55 = vld [vmem:[#allocation2 + $0x8] sm:$0xff]  ;;  %6044 = vmatmul.msk.f32.gmra.mxu3 %vm395_vm1, %v5999_v9 }
 0x1fa   : > { %2623 = vst.msk [vmem:[#allocation2 + $0x10] sm:$0xff] %vm395_vm1, %v2615_v17  ;;  %v2716_v56 = vadd.f32 %v2708_v55, %v2686_v36  ;;  %6156 = vmatpush.msk.msrb.mxu1 %vm420_vm0, %v6155_v40  ;;  %v6002_v43 = vld [vmem:[%s6789_s17 + $0x81] sm:$0xff]  ;;  %v6038_v55 = vld [vmem:[%s6789_s17 + $0x91] sm:$0xff] }
 0x1fb   : > { %v2809_v57 = vld [vmem:[#allocation2] sm:$0xff]  ;;  %v2692_v59 = vpop.f32.mrf.mxu2 }
 0x1fc   : > { %2724 = vst.msk [vmem:[#allocation2 + $0x8] sm:$0xff] %vm395_vm1, %v2716_v56  ;;  %v2817_v58 = vadd.f32 %v2809_v57, %v7509_v18  ;;  %v7548_v60 = vpop.f32.mrf.mxu3 }
 0x1fd   : > { %v2491_v33 = vpop.f32.mrf.mxu0  ;;  %v2510_v31 = vld [vmem:[#allocation2 + $0x38] sm:$0xff] }
 0x1fe   : > { %v2593_v62 = vpop.f32.mrf.mxu1  ;;  %2825 = vst.msk [vmem:[#allocation2] sm:$0xff] %vm395_vm1, %v2817_v58  ;;  %v2515_v63 = vadd.f32 %v2507_v61, %v2491_v33 }
 0x1ff   : > { %v2608_v0 = vld [vmem:[#allocation2 + $0x18] sm:$0xff] }
 0x200   : > { %2523 = vst.msk [vmem:[#allocation2 + $0x20] sm:$0xff] %vm395_vm1, %v2515_v63  ;;  %v2616_v19 = vadd.f32 %v2608_v0, %v2590_v51  ;;  %5991 = vmatmul.msk.f32.gmra.mxu0 %vm395_vm1, %v5981_v54  ;;  %6027 = vmatmul.msk.f32.gmra.mxu2 %vm395_vm1, %v5982_v1  ;;  %v6020_v54 = vld [vmem:[%s6789_s17 + $0x90] sm:$0xff] }
 0x201   : > { %6009 = vmatmul.msk.f32.gmra.mxu1 %vm395_vm1, %v5999_v9  ;;  %v2709_v11 = vld [vmem:[#allocation2 + $0x10] sm:$0xff]  ;;  %6045 = vmatmul.msk.f32.gmra.mxu3 %vm395_vm1, %v6000_v2 }
 0x202   : > { %2624 = vst.msk [vmem:[#allocation2 + $0x18] sm:$0xff] %vm395_vm1, %v2616_v19  ;;  %v2717_v3 = vadd.f32 %v2709_v11, %v2689_v48  ;;  %v6049_v0 = vld [vmem:[%s6878_s10 + $0x10] sm:$0xff] }
 0x203   : > { %v2810_v4 = vld [vmem:[#allocation2 + $0x8] sm:$0xff]  ;;  %v2695_v35 = vpop.f32.mrf.mxu2  ;;  %v6067_v11 = vld [vmem:[%s6878_s10 + $0x11] sm:$0xff] }
 0x204   : > { %2725 = vst.msk [vmem:[#allocation2 + $0x10] sm:$0xff] %vm395_vm1, %v2717_v3  ;;  %v2818_v5 = vadd.f32 %v2810_v4, %v7522_v26  ;;  %v7561_v6 = vpop.f32.mrf.mxu3 }
 0x205   : > { %v2494_v8 = vpop.f32.mrf.mxu0  ;;  %v2833_v12 = vld [vmem:[#allocation2] sm:$0xff] }
 0x206   : > { %v2596_v14 = vpop.f32.mrf.mxu1  ;;  %2826 = vst.msk [vmem:[#allocation2 + $0x8] sm:$0xff] %vm395_vm1, %v2818_v5  ;;  %v2516_v22 = vadd.f32 %v2508_v10, %v2494_v8  ;;  %v2841_v18 = vadd.f32 %v7571_v16, %v2833_v12  ;;  %v6050_v5 = vld [vmem:[%s6878_s10 + $0x20] sm:$0xff] }
 0x207   : > { %v2609_v20 = vld [vmem:[#allocation2 + $0x20] sm:$0xff] }
 0x208   : > { %2524 = vst.msk [vmem:[#allocation2 + $0x28] sm:$0xff] %vm395_vm1, %v2516_v22  ;;  %v2617_v21 = vadd.f32 %v2609_v20, %v2593_v62  ;;  %5992 = vmatmul.msk.f32.gmra.mxu0 %vm395_vm1, %v5982_v1  ;;  %2857 = vrot.lane.b32.xlu0 %v2841_v18, %s6537_s15 }
 0x209   : > { %v2710_v23 = vld [vmem:[#allocation2 + $0x18] sm:$0xff]  ;;  %6010 = vmatmul.msk.f32.gmra.mxu1 %vm395_vm1, %v6000_v2  ;;  %6028 = vmatmul.msk.f32.gmra.mxu2 %vm395_vm1, %v5983_v13 }
 0x20a   : > { %2625 = vst.msk [vmem:[#allocation2 + $0x20] sm:$0xff] %vm395_vm1, %v2617_v21  ;;  %v2718_v37 = vadd.f32 %v2710_v23, %v2692_v59  ;;  %6046 = vmatmul.msk.f32.gmra.mxu3 %vm395_vm1, %v6001_v24 }
 0x20b   : > { %v2811_v25 = vld [vmem:[#allocation2 + $0x10] sm:$0xff]  ;;  %v2698_v29 = vpop.f32.mrf.mxu2 }
 0x20c   : > { %2726 = vst.msk [vmem:[#allocation2 + $0x18] sm:$0xff] %vm395_vm1, %v2718_v37  ;;  %v2819_v27 = vadd.f32 %v2811_v25, %v7535_v49  ;;  %v7585_v30 = vpop.f32.mrf.mxu3  ;;  %v6069_v25 = vld [vmem:[%s6878_s10 + $0x31] sm:$0xff] }
 0x20d   : > { %v2497_v32 = vpop.f32.mrf.mxu0  ;;  %v2834_v36 = vld [vmem:[#allocation2 + $0x8] sm:$0xff] }
 0x20e   : > { %v2599_v26 = vpop.f32.mrf.mxu1  ;;  %2827 = vst.msk [vmem:[#allocation2 + $0x10] sm:$0xff] %vm395_vm1, %v2819_v27  ;;  %v2517_v38 = vadd.f32 %v2509_v34, %v2497_v32  ;;  %v2842_v28 = vadd.f32 %v7571_v16, %v2834_v36 }
 0x20f   : > { %v2610_v15 = vld [vmem:[#allocation2 + $0x28] sm:$0xff] }
 0x210   : > { %2525 = vst.msk [vmem:[#allocation2 + $0x30] sm:$0xff] %vm395_vm1, %v2517_v38  ;;  %v2618_v39 = vadd.f32 %v2610_v15, %v2596_v14  ;;  %5993 = vmatmul.msk.f32.gmra.mxu0 %vm395_vm1, %v5983_v13  ;;  %2859 = vrot.lane.b32.xlu0 %v2842_v28, %s6537_s15 }
 0x211   : > { %v2711_v42 = vld [vmem:[#allocation2 + $0x20] sm:$0xff]  ;;  %6011 = vmatmul.msk.f32.gmra.mxu1 %vm395_vm1, %v6001_v24  ;;  %6029 = vmatmul.msk.f32.gmra.mxu2 %vm395_vm1, %v5984_v41  ;;  %v6051_v24 = vld [vmem:[%s6878_s10 + $0x30] sm:$0xff] }
 0x212   : > { %2626 = vst.msk [vmem:[#allocation2 + $0x28] sm:$0xff] %vm395_vm1, %v2618_v39  ;;  %v2719_v45 = vadd.f32 %v2711_v42, %v2695_v35  ;;  %6047 = vmatmul.msk.f32.gmra.mxu3 %vm395_vm1, %v6002_v43 }
 0x213   : > { %v2812_v46 = vld [vmem:[#allocation2 + $0x18] sm:$0xff]  ;;  %v2701_v48 = vpop.f32.mrf.mxu2 }
 0x214   : > { %2727 = vst.msk [vmem:[#allocation2 + $0x20] sm:$0xff] %vm395_vm1, %v2719_v45  ;;  %v2820_v47 = vadd.f32 %v2812_v46, %v7548_v60  ;;  %v7608_v49 = vpop.f32.mrf.mxu3  ;;  %v6191_v60 = vld [vmem:[%s8276_s3 + $0x9c] sm:$0xf] }
 0x215   : > { %v2500_v50 = vpop.f32.mrf.mxu0  ;;  %v2835_v51 = vld [vmem:[#allocation2 + $0x10] sm:$0xff]  ;;  %6192 = vmatpush.msk.msrb.mxu3 %vm420_vm0, %v6191_v60 }
 0x216   : > { %v2602_v52 = vpop.f32.mrf.mxu1  ;;  %2828 = vst.msk [vmem:[#allocation2 + $0x18] sm:$0xff] %vm395_vm1, %v2820_v47  ;;  %v2518_v53 = vadd.f32 %v2510_v31, %v2500_v50  ;;  %v2843_v17 = vadd.f32 %v7571_v16, %v2835_v51 }
 0x217   : > { %v2611_v9 = vld [vmem:[#allocation2 + $0x30] sm:$0xff] }
 0x218   : > { %2526 = vst.msk [vmem:[#allocation2 + $0x38] sm:$0xff] %vm395_vm1, %v2518_v53  ;;  %v2619_v56 = vadd.f32 %v2611_v9, %v2599_v26  ;;  %5994 = vmatmul.msk.f32.gmra.mxu0 %vm395_vm1, %v5984_v41  ;;  %2861 = vrot.lane.b32.xlu1 %v2843_v17, %s6537_s15  ;;  %v6052_v41 = vld [vmem:[%s6878_s10 + $0x40] sm:$0xff]  ;;  %v6053_v17 = vld [vmem:[%s6878_s10 + $0x50] sm:$0xff] }
 0x219   : > { %v2712_v57 = vld [vmem:[#allocation2 + $0x28] sm:$0xff]  ;;  %6012 = vmatmul.msk.f32.gmra.mxu1 %vm395_vm1, %v6002_v43  ;;  %6030 = vmatmul.msk.f32.gmra.mxu2 %vm395_vm1, %v6020_v54  ;;  %v6071_v9 = vld [vmem:[%s6878_s10 + $0x51] sm:$0xff] }
 0x21a   : > { %2627 = vst.msk [vmem:[#allocation2 + $0x30] sm:$0xff] %vm395_vm1, %v2619_v56  ;;  %v2720_v58 = vadd.f32 %v2712_v57, %v2698_v29  ;;  %6048 = vmatmul.msk.f32.gmra.mxu3 %vm395_vm1, %v6038_v55  ;;  %v6070_v43 = vld [vmem:[%s6878_s10 + $0x41] sm:$0xff] }
 0x21b   : > { %v2813_v59 = vld [vmem:[#allocation2 + $0x20] sm:$0xff]  ;;  %v2704_v61 = vpop.f32.mrf.mxu2 }
 0x21c   : > { %2728 = vst.msk [vmem:[#allocation2 + $0x28] sm:$0xff] %vm395_vm1, %v2720_v58  ;;  %v2821_v33 = vadd.f32 %v2813_v59, %v7561_v6  ;;  %v7626_v62 = vpop.f32.mrf.mxu3  ;;  %v6068_v6 = vld [vmem:[%s6878_s10 + $0x21] sm:$0xff] }
 0x21d   : > { %v2944_v63 = vpop.f32.mrf.mxu0  ;;  %v2836_v19 = vld [vmem:[#allocation2 + $0x18] sm:$0xff] }
 0x21e   : > { %v3030_v1 = vpop.f32.mrf.mxu1  ;;  %2829 = vst.msk [vmem:[#allocation2 + $0x20] sm:$0xff] %vm395_vm1, %v2821_v33  ;;  %v2844_v2 = vadd.f32 %v7571_v16, %v2836_v19  ;;  %v6054_v19 = vld [vmem:[%s6878_s10 + $0x60] sm:$0xff] }
 0x21f   : > { %v2612_v3 = vld [vmem:[#allocation2 + $0x38] sm:$0xff]  ;;  %2968 = vst.msk [vmem:[#allocation2] sm:$0xff] %vm395_vm1, %v2944_v63 }
 0x220   : > { %v2620_v4 = vadd.f32 %v2612_v3, %v2602_v52  ;;  %6059 = vmatmul.msk.f32.vlgmr.msra.gmra.mxu0 %vm395_vm1, %v6049_v0  ;;  %2863 = vrot.lane.b32.xlu1 %v2844_v2, %s6537_s15  ;;  %v6072_v2 = vld [vmem:[%s6878_s10 + $0x61] sm:$0xff] }
 0x221   : > { %v2713_v35 = vld [vmem:[#allocation2 + $0x30] sm:$0xff]  ;;  %6077 = vmatmul.msk.f32.vlgmr.msra.gmra.mxu1 %vm395_vm1, %v6067_v11  ;;  %6095 = vmatmul.msk.f32.vlgmr.msra.gmra.mxu2 %vm395_vm1, %v6050_v5 }
 0x222   : > { %2628 = vst.msk [vmem:[#allocation2 + $0x38] sm:$0xff] %vm395_vm1, %v2620_v4  ;;  %v2721_v7 = vadd.f32 %v2713_v35, %v2701_v48  ;;  %6113 = vmatmul.msk.f32.vlgmr.msra.gmra.mxu3 %vm395_vm1, %v6068_v6 }
 0x223   : > { %v2814_v8 = vld [vmem:[#allocation2 + $0x28] sm:$0xff]  ;;  %v3133_v12 = vpop.f32.mrf.mxu2 }
 0x224   : > { %2729 = vst.msk [vmem:[#allocation2 + $0x30] sm:$0xff] %vm395_vm1, %v2721_v7  ;;  %v2822_v10 = vadd.f32 %v2814_v8, %v7585_v30  ;;  %v7644_v14 = vpop.f32.mrf.mxu3 }
 0x225   : > { %v2947_v22 = vpop.f32.mrf.mxu0  ;;  %v2837_v18 = vld [vmem:[#allocation2 + $0x20] sm:$0xff] }
 0x226   : > { %v3033_v20 = vpop.f32.mrf.mxu1  ;;  %2830 = vst.msk [vmem:[#allocation2 + $0x28] sm:$0xff] %vm395_vm1, %v2822_v10  ;;  %v3054_v21 = vld [vmem:[#allocation2] sm:$0xff]  ;;  %v2845_v13 = vadd.f32 %v7571_v16, %v2837_v18 }
 0x227   : > { %2969 = vst.msk [vmem:[#allocation2 + $0x8] sm:$0xff] %vm395_vm1, %v2947_v22  ;;  %v3062_v23 = vadd.f32 %v3054_v21, %v3030_v1  ;;  %v6073_v22 = vld [vmem:[%s6878_s10 + $0x71] sm:$0xff] }
 0x228   : > { %6060 = vmatmul.msk.f32.gmra.mxu0 %vm395_vm1, %v6050_v5  ;;  %2865 = vrot.lane.b32.xlu2 %v2845_v13, %s6537_s15 }
 0x229   : > { %3070 = vst.msk [vmem:[#allocation2] sm:$0xff] %vm395_vm1, %v3062_v23  ;;  %v2714_v37 = vld [vmem:[#allocation2 + $0x38] sm:$0xff]  ;;  %6078 = vmatmul.msk.f32.gmra.mxu1 %vm395_vm1, %v6068_v6  ;;  %6096 = vmatmul.msk.f32.gmra.mxu2 %vm395_vm1, %v6051_v24  ;;  %v6227_v23 = vld [vmem:[%s8276_s3 + $0xa4] sm:$0xf] }
 0x22a   : > { %v2722_v27 = vadd.f32 %v2714_v37, %v2704_v61  ;;  %6114 = vmatmul.msk.f32.gmra.mxu3 %vm395_vm1, %v6069_v25  ;;  %6228 = vmatpush.msk.msra.mxu1 %vm420_vm0, %v6227_v23 }
 0x22b   : > { %v2815_v29 = vld [vmem:[#allocation2 + $0x30] sm:$0xff]  ;;  %v3136_v32 = vpop.f32.mrf.mxu2 }
 0x22c   : > { %2730 = vst.msk [vmem:[#allocation2 + $0x38] sm:$0xff] %vm395_vm1, %v2722_v27  ;;  %v2823_v30 = vadd.f32 %v2815_v29, %v7608_v49  ;;  %v7659_v34 = vpop.f32.mrf.mxu3 }
 0x22d   : > { %v2950_v36 = vpop.f32.mrf.mxu0  ;;  %v2838_v26 = vld [vmem:[#allocation2 + $0x28] sm:$0xff] }
 0x22e   : > { %v3036_v38 = vpop.f32.mrf.mxu1  ;;  %2831 = vst.msk [vmem:[#allocation2 + $0x30] sm:$0xff] %vm395_vm1, %v2823_v30  ;;  %v3055_v28 = vld [vmem:[#allocation2 + $0x8] sm:$0xff]  ;;  %v2846_v40 = vadd.f32 %v7571_v16, %v2838_v26 }
 0x22f   : > { %2970 = vst.msk [vmem:[#allocation2 + $0x10] sm:$0xff] %vm395_vm1, %v2950_v36  ;;  %v3063_v15 = vadd.f32 %v3055_v28, %v3033_v20  ;;  %v6245_v26 = vld [vmem:[%s8276_s3 + $0xa8] sm:$0xf] }
 0x230   : > { %v3157_v39 = vld [vmem:[#allocation2] sm:$0xff]  ;;  %6061 = vmatmul.msk.f32.gmra.mxu0 %vm395_vm1, %v6051_v24  ;;  %2867 = vrot.lane.b32.xlu2 %v2846_v40, %s6537_s15 }
 0x231   : > { %3071 = vst.msk [vmem:[#allocation2 + $0x8] sm:$0xff] %vm395_vm1, %v3063_v15  ;;  %v3165_v42 = vadd.f32 %v3157_v39, %v3133_v12  ;;  %6079 = vmatmul.msk.f32.gmra.mxu1 %vm395_vm1, %v6069_v25  ;;  %6097 = vmatmul.msk.f32.gmra.mxu2 %vm395_vm1, %v6052_v41  ;;  %v6055_v12 = vld [vmem:[%s6878_s10 + $0x70] sm:$0xff] }
 0x232   : > { %6115 = vmatmul.msk.f32.gmra.mxu3 %vm395_vm1, %v6070_v43  ;;  %6246 = vmatpush.msk.msra.mxu2 %vm420_vm0, %v6245_v26 }
 0x233   : > { %3173 = vst.msk [vmem:[#allocation2] sm:$0xff] %vm395_vm1, %v3165_v42  ;;  %v2816_v44 = vld [vmem:[#allocation2 + $0x38] sm:$0xff]  ;;  %v3139_v46 = vpop.f32.mrf.mxu2 }
 0x234   : > { %v2824_v45 = vadd.f32 %v2816_v44, %v7626_v62  ;;  %v7674_v47 = vpop.f32.mrf.mxu3 }
 0x235   : > { %v2953_v48 = vpop.f32.mrf.mxu0  ;;  %v2839_v49 = vld [vmem:[#allocation2 + $0x30] sm:$0xff] }
 0x236   : > { %v3039_v50 = vpop.f32.mrf.mxu1  ;;  %2832 = vst.msk [vmem:[#allocation2 + $0x38] sm:$0xff] %vm395_vm1, %v2824_v45  ;;  %v3056_v31 = vld [vmem:[#allocation2 + $0x10] sm:$0xff]  ;;  %v2847_v51 = vadd.f32 %v7571_v16, %v2839_v49 }
 0x237   : > { %2971 = vst.msk [vmem:[#allocation2 + $0x18] sm:$0xff] %vm395_vm1, %v2953_v48  ;;  %v3064_v52 = vadd.f32 %v3056_v31, %v3036_v38  ;;  %v6110_v45 = vld [vmem:[%s6878_s10 + $0x91] sm:$0xff]  ;;  %v6263_v31 = vld [vmem:[%s8276_s3 + $0xac] sm:$0xf] }
 0x238   : > { %v3158_v53 = vld [vmem:[#allocation2 + $0x8] sm:$0xff]  ;;  %6062 = vmatmul.msk.f32.gmra.mxu0 %vm395_vm1, %v6052_v41  ;;  %2869 = vrot.lane.b32.xlu0 %v2847_v51, %s6537_s15 }
 0x239   : > { %3072 = vst.msk [vmem:[#allocation2 + $0x10] sm:$0xff] %vm395_vm1, %v3064_v52  ;;  %v3166_v54 = vadd.f32 %v3158_v53, %v3136_v32  ;;  %6080 = vmatmul.msk.f32.gmra.mxu1 %vm395_vm1, %v6070_v43  ;;  %6098 = vmatmul.msk.f32.gmra.mxu2 %vm395_vm1, %v6053_v17  ;;  %v6056_v32 = vld [vmem:[%s6878_s10 + $0x80] sm:$0xff]  ;;  %v6092_v43 = vld [vmem:[%s6878_s10 + $0x90] sm:$0xff] }
 0x23a   : > { %v3259_v55 = vld [vmem:[#allocation2] sm:$0xff]  ;;  %6116 = vmatmul.msk.f32.gmra.mxu3 %vm395_vm1, %v6071_v9 }
 0x23b   : > { %3174 = vst.msk [vmem:[#allocation2 + $0x8] sm:$0xff] %vm395_vm1, %v3166_v54  ;;  %v3267_v56 = vadd.f32 %v3259_v55, %v7644_v14  ;;  %v3142_v57 = vpop.f32.mrf.mxu2  ;;  %6264 = vmatpush.msk.msra.mxu3 %vm420_vm0, %v6263_v31 }
 0x23c   : > { %v7689_v58 = vpop.f32.mrf.mxu3 }
 0x23d   : > { %3275 = vst.msk [vmem:[#allocation2] sm:$0xff] %vm395_vm1, %v3267_v56  ;;  %v2956_v59 = vpop.f32.mrf.mxu0  ;;  %v2840_v60 = vld [vmem:[#allocation2 + $0x38] sm:$0xff] }
 0x23e   : > { %v3042_v33 = vpop.f32.mrf.mxu1  ;;  %2972 = vst.msk [vmem:[#allocation2 + $0x20] sm:$0xff] %vm395_vm1, %v2956_v59  ;;  %v3057_v61 = vld [vmem:[#allocation2 + $0x18] sm:$0xff]  ;;  %v2848_v62 = vadd.f32 %v7571_v16, %v2840_v60  ;;  %v6209_v16 = vld [vmem:[%s8276_s3 + $0xa0] sm:$0xf] }
 0x23f   : > { %v3065_v63 = vadd.f32 %v3057_v61, %v3039_v50  ;;  %6210 = vmatpush.msk.msra.mxu0 %vm420_vm0, %v6209_v16  ;;  %v6147_v56 = vld [vmem:[%s6683_s14 + $0x12] sm:$0xff]  ;;  %v6130_v59 = vld [vmem:[%s6683_s14 + $0x21] sm:$0xff] }
 0x240   : > { %v3159_v0 = vld [vmem:[#allocation2 + $0x10] sm:$0xff]  ;;  %6063 = vmatmul.msk.f32.gmra.mxu0 %vm395_vm1, %v6053_v17  ;;  %2871 = vrot.lane.b32.xlu1 %v2848_v62, %s6537_s15 }
 0x241   : > { %3073 = vst.msk [vmem:[#allocation2 + $0x18] sm:$0xff] %vm395_vm1, %v3065_v63  ;;  %v3167_v1 = vadd.f32 %v3159_v0, %v3139_v46  ;;  %6081 = vmatmul.msk.f32.gmra.mxu1 %vm395_vm1, %v6071_v9  ;;  %6099 = vmatmul.msk.f32.gmra.mxu2 %vm395_vm1, %v6054_v19  ;;  %v6129_v17 = vld [vmem:[%s6683_s14 + $0x11] sm:$0xff] }
 0x242   : > { %v3260_v11 = vld [vmem:[#allocation2 + $0x8] sm:$0xff]  ;;  %6117 = vmatmul.msk.f32.gmra.mxu3 %vm395_vm1, %v6072_v2 }
 0x243   : > { %3175 = vst.msk [vmem:[#allocation2 + $0x10] sm:$0xff] %vm395_vm1, %v3167_v1  ;;  %v3268_v3 = vadd.f32 %v3260_v11, %v7659_v34  ;;  %v3145_v4 = vpop.f32.mrf.mxu2  ;;  %v6074_v34 = vld [vmem:[%s6878_s10 + $0x81] sm:$0xff] }
 0x244   : > { %v3247_v5 = vpop.f32.mrf.mxu3  ;;  %v3361_v53 = vld [vmem:[#allocation2] sm:$0xff] }
 0x245   : > { %3276 = vst.msk [vmem:[#allocation2 + $0x8] sm:$0xff] %vm395_vm1, %v3268_v3  ;;  %v2959_v35 = vpop.f32.mrf.mxu0  ;;  %v3058_v6 = vld [vmem:[#allocation2 + $0x20] sm:$0xff] }
 0x246   : > { %v3045_v7 = vpop.f32.mrf.mxu1  ;;  %2973 = vst.msk [vmem:[#allocation2 + $0x28] sm:$0xff] %vm395_vm1, %v2959_v35  ;;  %v3066_v8 = vadd.f32 %v3058_v6, %v3042_v33  ;;  %v6148_v33 = vld [vmem:[%s6683_s14 + $0x22] sm:$0xff]  ;;  %v6149_v6 = vld [vmem:[%s6683_s14 + $0x32] sm:$0xff] }
 0x248   : > { %3074 = vst.msk [vmem:[#allocation2 + $0x20] sm:$0xff] %vm395_vm1, %v3066_v8  ;;  %v3160_v10 = vld [vmem:[#allocation2 + $0x18] sm:$0xff]  ;;  %6064 = vmatmul.msk.f32.gmra.mxu0 %vm395_vm1, %v6054_v19 }
 0x249   : > { %v3168_v14 = vadd.f32 %v3160_v10, %v3142_v57  ;;  %6082 = vmatmul.msk.f32.gmra.mxu1 %vm395_vm1, %v6072_v2  ;;  %6100 = vmatmul.msk.f32.gmra.mxu2 %vm395_vm1, %v6055_v12 }
 0x24a   : > { %v3261_v18 = vld [vmem:[#allocation2 + $0x10] sm:$0xff]  ;;  %6118 = vmatmul.msk.f32.gmra.mxu3 %vm395_vm1, %v6073_v22 }
 0x24b   : > { %3176 = vst.msk [vmem:[#allocation2 + $0x18] sm:$0xff] %vm395_vm1, %v3168_v14  ;;  %v3269_v20 = vadd.f32 %v3261_v18, %v7674_v47  ;;  %v3148_v21 = vpop.f32.mrf.mxu2 }
 0x24c   : > { %v7719_v13 = vpop.f32.mrf.mxu3  ;;  %v3362_v19 = vld [vmem:[#allocation2 + $0x8] sm:$0xff] }
 0x24d   : > { %3277 = vst.msk [vmem:[#allocation2 + $0x10] sm:$0xff] %vm395_vm1, %v3269_v20  ;;  %v2962_v24 = vpop.f32.mrf.mxu0  ;;  %v3059_v37 = vld [vmem:[#allocation2 + $0x28] sm:$0xff] }
 0x24e   : > { %v3048_v25 = vpop.f32.mrf.mxu1  ;;  %2974 = vst.msk [vmem:[#allocation2 + $0x30] sm:$0xff] %vm395_vm1, %v2962_v24  ;;  %v3067_v27 = vadd.f32 %v3059_v37, %v3045_v7  ;;  %v6150_v24 = vld [vmem:[%s6683_s14 + $0x42] sm:$0xff] }
 0x24f   : > { %v3161_v29 = vld [vmem:[#allocation2 + $0x20] sm:$0xff] }
 0x250   : > { %3075 = vst.msk [vmem:[#allocation2 + $0x28] sm:$0xff] %vm395_vm1, %v3067_v27  ;;  %v3169_v30 = vadd.f32 %v3161_v29, %v3145_v4  ;;  %6065 = vmatmul.msk.f32.gmra.mxu0 %vm395_vm1, %v6055_v12  ;;  %v6131_v4 = vld [vmem:[%s6683_s14 + $0x31] sm:$0xff] }
 0x251   : > { %6083 = vmatmul.msk.f32.gmra.mxu1 %vm395_vm1, %v6073_v22  ;;  %6101 = vmatmul.msk.f32.gmra.mxu2 %vm395_vm1, %v6056_v32 }
 0x252   : > { %3177 = vst.msk [vmem:[#allocation2 + $0x20] sm:$0xff] %vm395_vm1, %v3169_v30  ;;  %v3262_v36 = vld [vmem:[#allocation2 + $0x18] sm:$0xff]  ;;  %6119 = vmatmul.msk.f32.gmra.mxu3 %vm395_vm1, %v6074_v34 }
 0x253   : > { %v3270_v38 = vadd.f32 %v3262_v36, %v7689_v58  ;;  %v3151_v28 = vpop.f32.mrf.mxu2 }
 0x254   : > { %v7740_v40 = vpop.f32.mrf.mxu3  ;;  %v3363_v14 = vld [vmem:[#allocation2 + $0x10] sm:$0xff] }
 0x255   : > { %3278 = vst.msk [vmem:[#allocation2 + $0x18] sm:$0xff] %vm395_vm1, %v3270_v38  ;;  %v2965_v15 = vpop.f32.mrf.mxu0  ;;  %v3060_v39 = vld [vmem:[#allocation2 + $0x30] sm:$0xff] }
 0x256   : > { %v3051_v41 = vpop.f32.mrf.mxu1  ;;  %2975 = vst.msk [vmem:[#allocation2 + $0x38] sm:$0xff] %vm395_vm1, %v2965_v15  ;;  %v3068_v42 = vadd.f32 %v3060_v39, %v3048_v25  ;;  %v6151_v39 = vld [vmem:[%s6683_s14 + $0x52] sm:$0xff] }
 0x257   : > { %v3162_v44 = vld [vmem:[#allocation2 + $0x28] sm:$0xff] }
 0x258   : > { %3076 = vst.msk [vmem:[#allocation2 + $0x30] sm:$0xff] %vm395_vm1, %v3068_v42  ;;  %v3170_v46 = vadd.f32 %v3162_v44, %v3148_v21  ;;  %6066 = vmatmul.msk.f32.gmra.mxu0 %vm395_vm1, %v6056_v32 }
 0x259   : > { %v3263_v47 = vld [vmem:[#allocation2 + $0x20] sm:$0xff]  ;;  %6084 = vmatmul.msk.f32.gmra.mxu1 %vm395_vm1, %v6074_v34  ;;  %6102 = vmatmul.msk.f32.gmra.mxu2 %vm395_vm1, %v6092_v43 }
 0x25a   : > { %3178 = vst.msk [vmem:[#allocation2 + $0x28] sm:$0xff] %vm395_vm1, %v3170_v46  ;;  %v3271_v48 = vadd.f32 %v3263_v47, %v3247_v5  ;;  %6120 = vmatmul.msk.f32.gmra.mxu3 %vm395_vm1, %v6110_v45 }
 0x25b   : > { %v3154_v49 = vpop.f32.mrf.mxu2 }
 0x25c   : > { %3279 = vst.msk [vmem:[#allocation2 + $0x20] sm:$0xff] %vm395_vm1, %v3271_v48  ;;  %v7753_v50 = vpop.f32.mrf.mxu3  ;;  %v3364_v34 = vld [vmem:[#allocation2 + $0x18] sm:$0xff] }
 0x25d   : > { %v3061_v51 = vld [vmem:[#allocation2 + $0x38] sm:$0xff]  ;;  %v3337_v52 = vpop.f32.mrf.mxu0 }
 0x25e   : > { %v3439_v54 = vpop.f32.mrf.mxu1  ;;  %v3069_v9 = vadd.f32 %v3061_v51, %v3051_v41  ;;  %v3369_v55 = vadd.f32 %v3361_v53, %v3337_v52  ;;  %v6134_v52 = vld [vmem:[%s6683_s14 + $0x61] sm:$0xff] }
 0x25f   : > { %v3163_v57 = vld [vmem:[#allocation2 + $0x30] sm:$0xff] }
 0x260   : > { %3077 = vst.msk [vmem:[#allocation2 + $0x38] sm:$0xff] %vm395_vm1, %v3069_v9  ;;  %v3171_v58 = vadd.f32 %v3163_v57, %v3151_v28  ;;  %6139 = vmatmul.msk.f32.vlgmr.msrb.gmra.mxu0 %vm395_vm1, %v6129_v17  ;;  %v6152_v17 = vld [vmem:[%s6683_s14 + $0x62] sm:$0xff] }
 0x261   : > { %3377 = vst.msk [vmem:[#allocation2] sm:$0xff] %vm395_vm1, %v3369_v55  ;;  %v3264_v60 = vld [vmem:[#allocation2 + $0x28] sm:$0xff]  ;;  %6157 = vmatmul.msk.f32.vlgmr.msrb.gmra.mxu1 %vm395_vm1, %v6147_v56  ;;  %6175 = vmatmul.msk.f32.vlgmr.msrb.gmra.mxu2 %vm395_vm1, %v6130_v59 }
 0x262   : > { %3179 = vst.msk [vmem:[#allocation2 + $0x30] sm:$0xff] %vm395_vm1, %v3171_v58  ;;  %v3272_v61 = vadd.f32 %v3264_v60, %v7719_v13  ;;  %6193 = vmatmul.msk.f32.vlgmr.msrb.gmra.mxu3 %vm395_vm1, %v6148_v33  ;;  %v6132_v13 = vld [vmem:[%s6683_s14 + $0x41] sm:$0xff]  ;;  %v6281_v60 = vld [vmem:[%s8276_s3 + $0xb0] sm:$0xf] }
 0x263   : > { %v3542_v62 = vpop.f32.mrf.mxu2  ;;  %v3365_v48 = vld [vmem:[#allocation2 + $0x20] sm:$0xff]  ;;  %6282 = vmatpush.msk.msrb.mxu0 %vm420_vm0, %v6281_v60 }
 0x264   : > { %3280 = vst.msk [vmem:[#allocation2 + $0x28] sm:$0xff] %vm395_vm1, %v3272_v61  ;;  %v7772_v63 = vpop.f32.mrf.mxu3 }
 0x265   : > { %v3340_v0 = vpop.f32.mrf.mxu0 }
 0x266   : > { %v3442_v1 = vpop.f32.mrf.mxu1  ;;  %v3370_v2 = vadd.f32 %v3362_v19, %v3340_v0 }
 0x267   : > { %v3164_v11 = vld [vmem:[#allocation2 + $0x38] sm:$0xff] }
 0x268   : > { %3378 = vst.msk [vmem:[#allocation2 + $0x8] sm:$0xff] %vm395_vm1, %v3370_v2  ;;  %v3463_v16 = vld [vmem:[#allocation2] sm:$0xff]  ;;  %v3172_v3 = vadd.f32 %v3164_v11, %v3154_v49  ;;  %6140 = vmatmul.msk.f32.gmra.mxu0 %vm395_vm1, %v6130_v59  ;;  %v6153_v11 = vld [vmem:[%s6683_s14 + $0x72] sm:$0xff] }
 0x269   : > { %v3471_v5 = vadd.f32 %v3463_v16, %v3439_v54  ;;  %v3265_v35 = vld [vmem:[#allocation2 + $0x30] sm:$0xff]  ;;  %6158 = vmatmul.msk.f32.gmra.mxu1 %vm395_vm1, %v6148_v33  ;;  %6176 = vmatmul.msk.f32.gmra.mxu2 %vm395_vm1, %v6131_v4 }
 0x26a   : > { %3180 = vst.msk [vmem:[#allocation2 + $0x38] sm:$0xff] %vm395_vm1, %v3172_v3  ;;  %v3273_v7 = vadd.f32 %v3265_v35, %v7740_v40  ;;  %6194 = vmatmul.msk.f32.gmra.mxu3 %vm395_vm1, %v6149_v6  ;;  %v6133_v40 = vld [vmem:[%s6683_s14 + $0x51] sm:$0xff] }
 0x26b   : > { %3479 = vst.msk [vmem:[#allocation2] sm:$0xff] %vm395_vm1, %v3471_v5  ;;  %v3545_v8 = vpop.f32.mrf.mxu2  ;;  %v3366_v61 = vld [vmem:[#allocation2 + $0x28] sm:$0xff] }
 0x26c   : > { %3281 = vst.msk [vmem:[#allocation2 + $0x30] sm:$0xff] %vm395_vm1, %v3273_v7  ;;  %v7785_v10 = vpop.f32.mrf.mxu3 }
 0x26d   : > { %v3343_v12 = vpop.f32.mrf.mxu0 }
 0x26e   : > { %v3445_v22 = vpop.f32.mrf.mxu1  ;;  %v3371_v18 = vadd.f32 %v3363_v14, %v3343_v12 }
 0x26f   : > { %v3464_v20 = vld [vmem:[#allocation2 + $0x8] sm:$0xff] }
 0x270   : > { %3379 = vst.msk [vmem:[#allocation2 + $0x10] sm:$0xff] %vm395_vm1, %v3371_v18  ;;  %v3472_v21 = vadd.f32 %v3464_v20, %v3442_v1  ;;  %6141 = vmatmul.msk.f32.gmra.mxu0 %vm395_vm1, %v6131_v4  ;;  %v6135_v1 = vld [vmem:[%s6683_s14 + $0x71] sm:$0xff] }
 0x271   : > { %v3266_v23 = vld [vmem:[#allocation2 + $0x38] sm:$0xff]  ;;  %6159 = vmatmul.msk.f32.gmra.mxu1 %vm395_vm1, %v6149_v6  ;;  %6177 = vmatmul.msk.f32.gmra.mxu2 %vm395_vm1, %v6132_v13 }
 0x272   : > { %3480 = vst.msk [vmem:[#allocation2 + $0x8] sm:$0xff] %vm395_vm1, %v3472_v21  ;;  %v3566_v37 = vld [vmem:[#allocation2] sm:$0xff]  ;;  %v3274_v25 = vadd.f32 %v3266_v23, %v7753_v50  ;;  %6195 = vmatmul.msk.f32.gmra.mxu3 %vm395_vm1, %v6150_v24 }
 0x273   : > { %v3574_v27 = vadd.f32 %v3566_v37, %v3542_v62  ;;  %v3548_v29 = vpop.f32.mrf.mxu2  ;;  %v6136_v21 = vld [vmem:[%s6683_s14 + $0x81] sm:$0xff] }
 0x274   : > { %3282 = vst.msk [vmem:[#allocation2 + $0x38] sm:$0xff] %vm395_vm1, %v3274_v25  ;;  %v7797_v30 = vpop.f32.mrf.mxu3  ;;  %v6154_v23 = vld [vmem:[%s6683_s14 + $0x82] sm:$0xff]  ;;  %v6317_v25 = vld [vmem:[%s8276_s3 + $0xb8] sm:$0xf] }
 0x275   : > { %3582 = vst.msk [vmem:[#allocation2] sm:$0xff] %vm395_vm1, %v3574_v27  ;;  %v3346_v32 = vpop.f32.mrf.mxu0  ;;  %6318 = vmatpush.msk.msrb.mxu2 %vm420_vm0, %v6317_v25 }
 0x276   : > { %v3448_v36 = vpop.f32.mrf.mxu1  ;;  %v3372_v26 = vadd.f32 %v3364_v34, %v3346_v32 }
 0x277   : > { %v3465_v38 = vld [vmem:[#allocation2 + $0x10] sm:$0xff] }
 0x278   : > { %3380 = vst.msk [vmem:[#allocation2 + $0x18] sm:$0xff] %vm395_vm1, %v3372_v26  ;;  %v3473_v28 = vadd.f32 %v3465_v38, %v3445_v22  ;;  %6142 = vmatmul.msk.f32.gmra.mxu0 %vm395_vm1, %v6132_v13  ;;  %v6299_v22 = vld [vmem:[%s8276_s3 + $0xb4] sm:$0xf] }
 0x279   : > { %v3567_v15 = vld [vmem:[#allocation2 + $0x8] sm:$0xff]  ;;  %6160 = vmatmul.msk.f32.gmra.mxu1 %vm395_vm1, %v6150_v24  ;;  %6178 = vmatmul.msk.f32.gmra.mxu2 %vm395_vm1, %v6133_v40 }
 0x27a   : > { %3481 = vst.msk [vmem:[#allocation2 + $0x10] sm:$0xff] %vm395_vm1, %v3473_v28  ;;  %v3575_v41 = vadd.f32 %v3567_v15, %v3545_v8  ;;  %v2858_v42 = vpop.permute.xlu0 %2857  ;;  %6196 = vmatmul.msk.f32.gmra.mxu3 %vm395_vm1, %v6151_v39  ;;  %v3367_v8 = vld [vmem:[#allocation2 + $0x30] sm:$0xff]  ;;  %6300 = vmatpush.msk.msrb.mxu1 %vm420_vm0, %v6299_v22 }
 0x27b   : > { %2882 = vst.msk [vmem:[%s7187_s27] sm:$0xff] %vm2881_vm2, %v2858_v42  ;;  %v3551_v44 = vpop.f32.mrf.mxu2  ;;  %v3368_v34 = vld [vmem:[#allocation2 + $0x38] sm:$0xff] }
 0x27c   : > { %3583 = vst.msk [vmem:[#allocation2 + $0x8] sm:$0xff] %vm395_vm1, %v3575_v41  ;;  %v3668_v43 = vld [vmem:[#allocation2] sm:$0xff]  ;;  %v7811_v45 = vpop.f32.mrf.mxu3  ;;  %v6172_v28 = vld [vmem:[%s6683_s14 + $0x91] sm:$0xff] }
 0x27d   : > { %v3676_v46 = vadd.f32 %v3668_v43, %v7772_v63  ;;  %v3349_v47 = vpop.f32.mrf.mxu0  ;;  %v6190_v15 = vld [vmem:[%s6683_s14 + $0x92] sm:$0xff] }
 0x27e   : > { %v3451_v49 = vpop.f32.mrf.mxu1  ;;  %v3373_v50 = vadd.f32 %v3365_v48, %v3349_v47 }
 0x27f   : > { %3684 = vst.msk [vmem:[#allocation2] sm:$0xff] %vm395_vm1, %v3676_v46  ;;  %v3466_v31 = vld [vmem:[#allocation2 + $0x18] sm:$0xff] }
 0x280   : > { %3381 = vst.msk [vmem:[#allocation2 + $0x20] sm:$0xff] %vm395_vm1, %v3373_v50  ;;  %v3474_v51 = vadd.f32 %v3466_v31, %v3448_v36  ;;  %6143 = vmatmul.msk.f32.gmra.mxu0 %vm395_vm1, %v6133_v40  ;;  %v6335_v46 = vld [vmem:[%s8276_s3 + $0xbc] sm:$0xf] }
 0x281   : > { %v3568_v53 = vld [vmem:[#allocation2 + $0x10] sm:$0xff]  ;;  %6161 = vmatmul.msk.f32.gmra.mxu1 %vm395_vm1, %v6151_v39  ;;  %6179 = vmatmul.msk.f32.gmra.mxu2 %vm395_vm1, %v6134_v52 }
 0x282   : > { %3482 = vst.msk [vmem:[#allocation2 + $0x18] sm:$0xff] %vm395_vm1, %v3474_v51  ;;  %v3576_v54 = vadd.f32 %v3568_v53, %v3548_v29  ;;  %v2860_v9 = vpop.permute.xlu0 %2859  ;;  %v2866_v55 = vpop.permute.xlu2 %2865  ;;  %6197 = vmatmul.msk.f32.gmra.mxu3 %vm395_vm1, %v6152_v17 }
 0x283   : > { %v3669_v56 = vld [vmem:[#allocation2 + $0x8] sm:$0xff]  ;;  %2883 = vst.msk [vmem:[%s7187_s27 + $0x10] sm:$0xff] %vm2881_vm2, %v2860_v9  ;;  %v3554_v58 = vpop.f32.mrf.mxu2  ;;  %6336 = vmatpush.msk.msrb.mxu3 %vm420_vm0, %v6335_v46 }
 0x284   : > { %3584 = vst.msk [vmem:[#allocation2 + $0x10] sm:$0xff] %vm395_vm1, %v3576_v54  ;;  %v3677_v57 = vadd.f32 %v3669_v56, %v7785_v10  ;;  %v7827_v59 = vpop.f32.mrf.mxu3  ;;  %v6202_v54 = vld [vmem:[%s6789_s17 + $0x21] sm:$0xff] }
 0x285   : > { %2886 = vst.msk [vmem:[%s7187_s27 + $0x40] sm:$0xff] %vm2881_vm2, %v2866_v55  ;;  %v3352_v33 = vpop.f32.mrf.mxu0  ;;  %v6220_v55 = vld [vmem:[%s6789_s17 + $0x22] sm:$0xff] }
 0x286   : > { %3685 = vst.msk [vmem:[#allocation2 + $0x8] sm:$0xff] %vm395_vm1, %v3677_v57  ;;  %v3374_v62 = vadd.f32 %v3366_v61, %v3352_v33  ;;  %v3454_v63 = vpop.f32.mrf.mxu1  ;;  %v3770_v48 = vld [vmem:[#allocation2] sm:$0xff] }
 0x287   : > { %v3467_v0 = vld [vmem:[#allocation2 + $0x20] sm:$0xff] }
 0x288   : > { %3382 = vst.msk [vmem:[#allocation2 + $0x28] sm:$0xff] %vm395_vm1, %v3374_v62  ;;  %v3475_v19 = vadd.f32 %v3467_v0, %v3451_v49  ;;  %6144 = vmatmul.msk.f32.gmra.mxu0 %vm395_vm1, %v6134_v52  ;;  %v6201_v49 = vld [vmem:[%s6789_s17 + $0x11] sm:$0xff] }
 0x289   : > { %v3569_v2 = vld [vmem:[#allocation2 + $0x18] sm:$0xff]  ;;  %6162 = vmatmul.msk.f32.gmra.mxu1 %vm395_vm1, %v6152_v17  ;;  %6180 = vmatmul.msk.f32.gmra.mxu2 %vm395_vm1, %v6135_v1 }
 0x28a   : > { %3483 = vst.msk [vmem:[#allocation2 + $0x20] sm:$0xff] %vm395_vm1, %v3475_v19  ;;  %v3577_v16 = vadd.f32 %v3569_v2, %v3551_v44  ;;  %v2862_v3 = vpop.permute.xlu1 %2861  ;;  %v2868_v4 = vpop.permute.xlu2 %2867  ;;  %6198 = vmatmul.msk.f32.gmra.mxu3 %vm395_vm1, %v6153_v11  ;;  %v6219_v52 = vld [vmem:[%s6789_s17 + $0x12] sm:$0xff] }
 0x28b   : > { %v3670_v5 = vld [vmem:[#allocation2 + $0x10] sm:$0xff]  ;;  %2884 = vst.msk [vmem:[%s7187_s27 + $0x20] sm:$0xff] %vm2881_vm2, %v2862_v3 }
 0x28c   : > { %3585 = vst.msk [vmem:[#allocation2 + $0x18] sm:$0xff] %vm395_vm1, %v3577_v16  ;;  %v3678_v35 = vadd.f32 %v3670_v5, %v7797_v30  ;;  %v3557_v6 = vpop.f32.mrf.mxu2 }
 0x28d   : > { %2887 = vst.msk [vmem:[%s7187_s27 + $0x50] sm:$0xff] %vm2881_vm2, %v2868_v4  ;;  %v3355_v7 = vpop.f32.mrf.mxu0  ;;  %v7850_v10 = vpop.f32.mrf.mxu3  ;;  %v3771_v33 = vld [vmem:[#allocation2 + $0x8] sm:$0xff] }
 0x28e   : > { %3686 = vst.msk [vmem:[#allocation2 + $0x10] sm:$0xff] %vm395_vm1, %v3678_v35  ;;  %v3375_v12 = vadd.f32 %v3367_v8, %v3355_v7  ;;  %v3457_v14 = vpop.f32.mrf.mxu1 }
 0x28f   : > { %v3468_v18 = vld [vmem:[#allocation2 + $0x28] sm:$0xff] }
 0x290   : > { %3383 = vst.msk [vmem:[#allocation2 + $0x30] sm:$0xff] %vm395_vm1, %v3375_v12  ;;  %v3476_v20 = vadd.f32 %v3468_v18, %v3454_v63  ;;  %6145 = vmatmul.msk.f32.gmra.mxu0 %vm395_vm1, %v6135_v1  ;;  %v6203_v1 = vld [vmem:[%s6789_s17 + $0x31] sm:$0xff]  ;;  %v6204_v18 = vld [vmem:[%s6789_s17 + $0x41] sm:$0xff] }
 0x291   : > { %v3570_v13 = vld [vmem:[#allocation2 + $0x20] sm:$0xff]  ;;  %6163 = vmatmul.msk.f32.gmra.mxu1 %vm395_vm1, %v6153_v11  ;;  %6181 = vmatmul.msk.f32.gmra.mxu2 %vm395_vm1, %v6136_v21  ;;  %v6221_v11 = vld [vmem:[%s6789_s17 + $0x32] sm:$0xff] }
 0x292   : > { %3484 = vst.msk [vmem:[#allocation2 + $0x28] sm:$0xff] %vm395_vm1, %v3476_v20  ;;  %v3578_v24 = vadd.f32 %v3570_v13, %v3554_v58  ;;  %v2864_v37 = vpop.permute.xlu1 %2863  ;;  %6199 = vmatmul.msk.f32.gmra.mxu3 %vm395_vm1, %v6154_v23 }
 0x293   : > { %v3671_v27 = vld [vmem:[#allocation2 + $0x18] sm:$0xff]  ;;  %2885 = vst.msk [vmem:[%s7187_s27 + $0x30] sm:$0xff] %vm2881_vm2, %v2864_v37 }
 0x294   : > { %3586 = vst.msk [vmem:[#allocation2 + $0x20] sm:$0xff] %vm395_vm1, %v3578_v24  ;;  %v3679_v29 = vadd.f32 %v3671_v27, %v7811_v45  ;;  %v3560_v30 = vpop.f32.mrf.mxu2 }
 0x295   : > { %v3358_v32 = vpop.f32.mrf.mxu0  ;;  %v7873_v36 = vpop.f32.mrf.mxu3  ;;  %v3772_v7 = vld [vmem:[#allocation2 + $0x10] sm:$0xff] }
 0x296   : > { %3687 = vst.msk [vmem:[#allocation2 + $0x18] sm:$0xff] %vm395_vm1, %v3679_v29  ;;  %v3376_v26 = vadd.f32 %v3368_v34, %v3358_v32  ;;  %v3460_v38 = vpop.f32.mrf.mxu1 }
 0x297   : > { %v3469_v40 = vld [vmem:[#allocation2 + $0x30] sm:$0xff] }
 0x298   : > { %3384 = vst.msk [vmem:[#allocation2 + $0x38] sm:$0xff] %vm395_vm1, %v3376_v26  ;;  %v3477_v39 = vadd.f32 %v3469_v40, %v3457_v14  ;;  %6146 = vmatmul.msk.f32.gmra.mxu0 %vm395_vm1, %v6136_v21  ;;  %v6222_v21 = vld [vmem:[%s6789_s17 + $0x42] sm:$0xff]  ;;  %v6223_v40 = vld [vmem:[%s6789_s17 + $0x52] sm:$0xff] }
 0x299   : > { %v3571_v41 = vld [vmem:[#allocation2 + $0x28] sm:$0xff]  ;;  %6164 = vmatmul.msk.f32.gmra.mxu1 %vm395_vm1, %v6154_v23  ;;  %6182 = vmatmul.msk.f32.gmra.mxu2 %vm395_vm1, %v6172_v28 }
 0x29a   : > { %3485 = vst.msk [vmem:[#allocation2 + $0x30] sm:$0xff] %vm395_vm1, %v3477_v39  ;;  %v3579_v42 = vadd.f32 %v3571_v41, %v3557_v6  ;;  %6200 = vmatmul.msk.f32.gmra.mxu3 %vm395_vm1, %v6190_v15 }
 0x29b   : > { %v3672_v43 = vld [vmem:[#allocation2 + $0x20] sm:$0xff] }
 0x29c   : > { %3587 = vst.msk [vmem:[#allocation2 + $0x28] sm:$0xff] %vm395_vm1, %v3579_v42  ;;  %v3680_v44 = vadd.f32 %v3672_v43, %v7827_v59  ;;  %v3563_v45 = vpop.f32.mrf.mxu2 }
 0x29d   : > { %v3746_v47 = vpop.f32.mrf.mxu0  ;;  %v7890_v50 = vpop.f32.mrf.mxu3  ;;  %v3773_v29 = vld [vmem:[#allocation2 + $0x18] sm:$0xff] }
 0x29e   : > { %3688 = vst.msk [vmem:[#allocation2 + $0x20] sm:$0xff] %vm395_vm1, %v3680_v44  ;;  %v3778_v31 = vadd.f32 %v3770_v48, %v3746_v47  ;;  %v3848_v51 = vpop.f32.mrf.mxu1 }
 0x29f   : > { %v3470_v53 = vld [vmem:[#allocation2 + $0x38] sm:$0xff] }
 0x2a0   : > { %v3478_v17 = vadd.f32 %v3470_v53, %v3460_v38  ;;  %3786 = vst.msk [vmem:[#allocation2] sm:$0xff] %vm395_vm1, %v3778_v31  ;;  %6211 = vmatmul.msk.f32.vlgmr.msra.gmra.mxu0 %vm395_vm1, %v6201_v49  ;;  %v6205_v38 = vld [vmem:[%s6789_s17 + $0x51] sm:$0xff] }
 0x2a1   : > { %v3572_v9 = vld [vmem:[#allocation2 + $0x30] sm:$0xff]  ;;  %6229 = vmatmul.msk.f32.vlgmr.msra.gmra.mxu1 %vm395_vm1, %v6219_v52  ;;  %6247 = vmatmul.msk.f32.vlgmr.msra.gmra.mxu2 %vm395_vm1, %v6202_v54 }
 0x2a2   : > { %3486 = vst.msk [vmem:[#allocation2 + $0x38] sm:$0xff] %vm395_vm1, %v3478_v17  ;;  %v3580_v56 = vadd.f32 %v3572_v9, %v3560_v30  ;;  %6265 = vmatmul.msk.f32.vlgmr.msra.gmra.mxu3 %vm395_vm1, %v6220_v55 }
 0x2a3   : > { %v3673_v57 = vld [vmem:[#allocation2 + $0x28] sm:$0xff] }
 0x2a4   : > { %3588 = vst.msk [vmem:[#allocation2 + $0x30] sm:$0xff] %vm395_vm1, %v3580_v56  ;;  %v3681_v58 = vadd.f32 %v3673_v57, %v7850_v10  ;;  %v3951_v59 = vpop.f32.mrf.mxu2 }
 0x2a5   : > { %v3749_v60 = vpop.f32.mrf.mxu0  ;;  %v7905_v61 = vpop.f32.mrf.mxu3  ;;  %v3774_v44 = vld [vmem:[#allocation2 + $0x20] sm:$0xff] }
 0x2a6   : > { %3689 = vst.msk [vmem:[#allocation2 + $0x28] sm:$0xff] %vm395_vm1, %v3681_v58  ;;  %v3779_v62 = vadd.f32 %v3771_v33, %v3749_v60  ;;  %v3851_v63 = vpop.f32.mrf.mxu1  ;;  %v7967_v60 = vld [vmem:[%s8277_s4] ss:$0 sm:$0xff] }
 0x2a7   : > { %v3872_v0 = vld [vmem:[#allocation2] sm:$0xff] }
 0x2a8   : > { %3787 = vst.msk [vmem:[#allocation2 + $0x8] sm:$0xff] %vm395_vm1, %v3779_v62  ;;  %v3880_v19 = vadd.f32 %v3872_v0, %v3848_v51  ;;  %6212 = vmatmul.msk.f32.gmra.mxu0 %vm395_vm1, %v6202_v54  ;;  %v6224_v51 = vld [vmem:[%s6789_s17 + $0x62] sm:$0xff] }
 0x2a9   : > { %v3573_v2 = vld [vmem:[#allocation2 + $0x38] sm:$0xff]  ;;  %6230 = vmatmul.msk.f32.gmra.mxu1 %vm395_vm1, %v6220_v55  ;;  %6248 = vmatmul.msk.f32.gmra.mxu2 %vm395_vm1, %v6203_v1 }
 0x2aa   : > { %3888 = vst.msk [vmem:[#allocation2] sm:$0xff] %vm395_vm1, %v3880_v19  ;;  %v3581_v16 = vadd.f32 %v3573_v2, %v3563_v45  ;;  %v2870_v3 = vpop.permute.xlu0 %2869  ;;  %6266 = vmatmul.msk.f32.gmra.mxu3 %vm395_vm1, %v6221_v11  ;;  %v6225_v19 = vld [vmem:[%s6789_s17 + $0x72] sm:$0xff] }
 0x2ab   : > { %v3674_v4 = vld [vmem:[#allocation2 + $0x30] sm:$0xff]  ;;  %2888 = vst.msk [vmem:[%s7187_s27 + $0x60] sm:$0xff] %vm2881_vm2, %v2870_v3 }
 0x2ac   : > { %3589 = vst.msk [vmem:[#allocation2 + $0x38] sm:$0xff] %vm395_vm1, %v3581_v16  ;;  %v3682_v5 = vadd.f32 %v3674_v4, %v7873_v36  ;;  %v3954_v35 = vpop.f32.mrf.mxu2 }
 0x2ad   : > { %v3752_v6 = vpop.f32.mrf.mxu0  ;;  %v7920_v8 = vpop.f32.mrf.mxu3  ;;  %v3775_v55 = vld [vmem:[#allocation2 + $0x28] sm:$0xff] }
 0x2ae   : > { %3690 = vst.msk [vmem:[#allocation2 + $0x30] sm:$0xff] %vm395_vm1, %v3682_v5  ;;  %v3780_v10 = vadd.f32 %v3772_v7, %v3752_v6  ;;  %v3854_v12 = vpop.f32.mrf.mxu1 }
 0x2af   : > { %v3873_v14 = vld [vmem:[#allocation2 + $0x8] sm:$0xff] }
 0x2b0   : > { %3788 = vst.msk [vmem:[#allocation2 + $0x10] sm:$0xff] %vm395_vm1, %v3780_v10  ;;  %v3881_v22 = vadd.f32 %v3873_v14, %v3851_v63  ;;  %6213 = vmatmul.msk.f32.gmra.mxu0 %vm395_vm1, %v6203_v1  ;;  %v6207_v63 = vld [vmem:[%s6789_s17 + $0x71] sm:$0xff]  ;;  %v6208_v14 = vld [vmem:[%s6789_s17 + $0x81] sm:$0xff] }
 0x2b1   : > { %v3975_v20 = vld [vmem:[#allocation2] sm:$0xff]  ;;  %6231 = vmatmul.msk.f32.gmra.mxu1 %vm395_vm1, %v6221_v11  ;;  %6249 = vmatmul.msk.f32.gmra.mxu2 %vm395_vm1, %v6204_v18 }
 0x2b2   : > { %3889 = vst.msk [vmem:[#allocation2 + $0x8] sm:$0xff] %vm395_vm1, %v3881_v22  ;;  %v3983_v13 = vadd.f32 %v3975_v20, %v3951_v59  ;;  %v2872_v23 = vpop.permute.xlu1 %2871  ;;  %6267 = vmatmul.msk.f32.gmra.mxu3 %vm395_vm1, %v6222_v21 }
 0x2b3   : > { %v3675_v24 = vld [vmem:[#allocation2 + $0x38] sm:$0xff]  ;;  %2889 = vst.msk [vmem:[%s7187_s27 + $0x70] sm:$0xff] %vm2881_vm2, %v2872_v23 }
 0x2b4   : > { %3991 = vst.msk [vmem:[#allocation2] sm:$0xff] %vm395_vm1, %v3983_v13  ;;  %v3683_v37 = vadd.f32 %v3675_v24, %v7890_v50  ;;  %v3957_v25 = vpop.f32.mrf.mxu2  ;;  %v6206_v50 = vld [vmem:[%s6789_s17 + $0x61] sm:$0xff] }
 0x2b5   : > { %v3755_v27 = vpop.f32.mrf.mxu0  ;;  %v7935_v30 = vpop.f32.mrf.mxu3  ;;  %v3776_v4 = vld [vmem:[#allocation2 + $0x30] sm:$0xff] }
 0x2b6   : > { %3691 = vst.msk [vmem:[#allocation2 + $0x38] sm:$0xff] %vm395_vm1, %v3683_v37  ;;  %v3781_v32 = vadd.f32 %v3773_v29, %v3755_v27  ;;  %v3857_v34 = vpop.f32.mrf.mxu1 }
 0x2b7   : > { %v3874_v36 = vld [vmem:[#allocation2 + $0x10] sm:$0xff] }
 0x2b8   : > { %3789 = vst.msk [vmem:[#allocation2 + $0x18] sm:$0xff] %vm395_vm1, %v3781_v32  ;;  %v3882_v26 = vadd.f32 %v3874_v36, %v3854_v12  ;;  %6214 = vmatmul.msk.f32.gmra.mxu0 %vm395_vm1, %v6204_v18  ;;  %v6226_v18 = vld [vmem:[%s6789_s17 + $0x82] sm:$0xff]  ;;  %v6244_v32 = vld [vmem:[%s6789_s17 + $0x91] sm:$0xff] }
 0x2b9   : > { %v3976_v28 = vld [vmem:[#allocation2 + $0x8] sm:$0xff]  ;;  %6232 = vmatmul.msk.f32.gmra.mxu1 %vm395_vm1, %v6222_v21  ;;  %6250 = vmatmul.msk.f32.gmra.mxu2 %vm395_vm1, %v6205_v38 }
 0x2ba   : > { %3890 = vst.msk [vmem:[#allocation2 + $0x10] sm:$0xff] %vm395_vm1, %v3882_v26  ;;  %v3984_v15 = vadd.f32 %v3976_v28, %v3954_v35  ;;  %6268 = vmatmul.msk.f32.gmra.mxu3 %vm395_vm1, %v6223_v40  ;;  %v6262_v26 = vld [vmem:[%s6789_s17 + $0x92] sm:$0xff] }
 0x2bb   : > { %v4077_v39 = vld [vmem:[#allocation2] sm:$0xff] }
 0x2bc   : > { %3992 = vst.msk [vmem:[#allocation2 + $0x8] sm:$0xff] %vm395_vm1, %v3984_v15  ;;  %v4085_v41 = vadd.f32 %v4077_v39, %v7905_v61  ;;  %v3960_v42 = vpop.f32.mrf.mxu2 }
 0x2bd   : > { %v3758_v43 = vpop.f32.mrf.mxu0  ;;  %v7948_v45 = vpop.f32.mrf.mxu3  ;;  %v3777_v37 = vld [vmem:[#allocation2 + $0x38] sm:$0xff] }
 0x2be   : > { %4093 = vst.msk [vmem:[#allocation2] sm:$0xff] %vm395_vm1, %v4085_v41  ;;  %v3782_v46 = vadd.f32 %v3774_v44, %v3758_v43  ;;  %v3860_v47 = vpop.f32.mrf.mxu1  ;;  %v6273_v43 = vld [vmem:[%s6878_s10 + $0x11] sm:$0xff] }
 0x2bf   : > { %v3875_v48 = vld [vmem:[#allocation2 + $0x18] sm:$0xff] }
 0x2c0   : > { %3790 = vst.msk [vmem:[#allocation2 + $0x20] sm:$0xff] %vm395_vm1, %v3782_v46  ;;  %v3883_v49 = vadd.f32 %v3875_v48, %v3857_v34  ;;  %6215 = vmatmul.msk.f32.gmra.mxu0 %vm395_vm1, %v6205_v38 }
 0x2c1   : > { %v3977_v31 = vld [vmem:[#allocation2 + $0x10] sm:$0xff]  ;;  %6233 = vmatmul.msk.f32.gmra.mxu1 %vm395_vm1, %v6223_v40  ;;  %6251 = vmatmul.msk.f32.gmra.mxu2 %vm395_vm1, %v6206_v50 }
 0x2c2   : > { %3891 = vst.msk [vmem:[#allocation2 + $0x18] sm:$0xff] %vm395_vm1, %v3883_v49  ;;  %v3985_v52 = vadd.f32 %v3977_v31, %v3957_v25  ;;  %6269 = vmatmul.msk.f32.gmra.mxu3 %vm395_vm1, %v6224_v51  ;;  %v6274_v31 = vld [vmem:[%s6878_s10 + $0x21] sm:$0xff] }
 0x2c3   : > { %v4078_v53 = vld [vmem:[#allocation2 + $0x8] sm:$0xff] }
 0x2c4   : > { %3993 = vst.msk [vmem:[#allocation2 + $0x10] sm:$0xff] %vm395_vm1, %v3985_v52  ;;  %v4086_v17 = vadd.f32 %v4078_v53, %v7920_v8  ;;  %v3963_v54 = vpop.f32.mrf.mxu2  ;;  %v6292_v52 = vld [vmem:[%s6878_s10 + $0x22] sm:$0xff] }
 0x2c5   : > { %v3761_v9 = vpop.f32.mrf.mxu0  ;;  %v7961_v56 = vpop.f32.mrf.mxu3  ;;  %v4101_v57 = vld [vmem:[#allocation2] sm:$0xff] }
 0x2c6   : > { %4094 = vst.msk [vmem:[#allocation2 + $0x8] sm:$0xff] %vm395_vm1, %v4086_v17  ;;  %v3783_v58 = vadd.f32 %v3775_v55, %v3761_v9  ;;  %v3863_v59 = vpop.f32.mrf.mxu1  ;;  %v4109_v33 = vadd.f32 %v7967_v60, %v4101_v57 }
 0x2c7   : > { %v3876_v61 = vld [vmem:[#allocation2 + $0x20] sm:$0xff] }
 0x2c8   : > { %3791 = vst.msk [vmem:[#allocation2 + $0x28] sm:$0xff] %vm395_vm1, %v3783_v58  ;;  %v3884_v62 = vadd.f32 %v3876_v61, %v3860_v47  ;;  %6216 = vmatmul.msk.f32.gmra.mxu0 %vm395_vm1, %v6206_v50  ;;  %v6291_v47 = vld [vmem:[%s6878_s10 + $0x12] sm:$0xff] }
 0x2c9   : > { %v3978_v0 = vld [vmem:[#allocation2 + $0x18] sm:$0xff]  ;;  %6234 = vmatmul.msk.f32.gmra.mxu1 %vm395_vm1, %v6224_v51  ;;  %6252 = vmatmul.msk.f32.gmra.mxu2 %vm395_vm1, %v6207_v63  ;;  %6121 = vst.msk [vmem:[%s7187_s27 + $0x8] sm:$0xff] %vm395_vm1, %v4109_v33 }
 0x2ca   : > { %3892 = vst.msk [vmem:[#allocation2 + $0x20] sm:$0xff] %vm395_vm1, %v3884_v62  ;;  %v3986_v1 = vadd.f32 %v3978_v0, %v3960_v42  ;;  %6270 = vmatmul.msk.f32.gmra.mxu3 %vm395_vm1, %v6225_v19  ;;  %v6275_v62 = vld [vmem:[%s6878_s10 + $0x31] sm:$0xff] }
 0x2cb   : > { %v4079_v2 = vld [vmem:[#allocation2 + $0x10] sm:$0xff] }
 0x2cc   : > { %3994 = vst.msk [vmem:[#allocation2 + $0x18] sm:$0xff] %vm395_vm1, %v3986_v1  ;;  %v4087_v11 = vadd.f32 %v4079_v2, %v7935_v30  ;;  %v3966_v16 = vpop.f32.mrf.mxu2  ;;  %v6293_v0 = vld [vmem:[%s6878_s10 + $0x32] sm:$0xff] }
 0x2cd   : > { %v3764_v3 = vpop.f32.mrf.mxu0  ;;  %v7982_v5 = vpop.f32.mrf.mxu3  ;;  %v4102_v35 = vld [vmem:[#allocation2 + $0x8] sm:$0xff] }
 0x2ce   : > { %4095 = vst.msk [vmem:[#allocation2 + $0x10] sm:$0xff] %vm395_vm1, %v4087_v11  ;;  %v3784_v6 = vadd.f32 %v3776_v4, %v3764_v3  ;;  %v3866_v7 = vpop.f32.mrf.mxu1  ;;  %v4110_v8 = vadd.f32 %v7967_v60, %v4102_v35 }
 0x2cf   : > { %v3877_v10 = vld [vmem:[#allocation2 + $0x28] sm:$0xff] }
 0x2d0   : > { %3792 = vst.msk [vmem:[#allocation2 + $0x30] sm:$0xff] %vm395_vm1, %v3784_v6  ;;  %v3885_v12 = vadd.f32 %v3877_v10, %v3863_v59  ;;  %6217 = vmatmul.msk.f32.gmra.mxu0 %vm395_vm1, %v6207_v63  ;;  %v6276_v10 = vld [vmem:[%s6878_s10 + $0x41] sm:$0xff] }
 0x2d1   : > { %v3979_v22 = vld [vmem:[#allocation2 + $0x20] sm:$0xff]  ;;  %6235 = vmatmul.msk.f32.gmra.mxu1 %vm395_vm1, %v6225_v19  ;;  %6253 = vmatmul.msk.f32.gmra.mxu2 %vm395_vm1, %v6208_v14  ;;  %6122 = vst.msk [vmem:[%s7187_s27 + $0x18] sm:$0xff] %vm395_vm1, %v4110_v8 }
 0x2d2   : > { %3893 = vst.msk [vmem:[#allocation2 + $0x28] sm:$0xff] %vm395_vm1, %v3885_v12  ;;  %v3987_v20 = vadd.f32 %v3979_v22, %v3963_v54  ;;  %6271 = vmatmul.msk.f32.gmra.mxu3 %vm395_vm1, %v6226_v18 }
 0x2d3   : > { %v4080_v21 = vld [vmem:[#allocation2 + $0x18] sm:$0xff] }
 0x2d4   : > { %3995 = vst.msk [vmem:[#allocation2 + $0x20] sm:$0xff] %vm395_vm1, %v3987_v20  ;;  %v4088_v13 = vadd.f32 %v4080_v21, %v7948_v45  ;;  %v3969_v23 = vpop.f32.mrf.mxu2 }
 0x2d5   : > { %v3767_v24 = vpop.f32.mrf.mxu0  ;;  %v7998_v25 = vpop.f32.mrf.mxu3  ;;  %v4103_v27 = vld [vmem:[#allocation2 + $0x10] sm:$0xff] }
 0x2d6   : > { %4096 = vst.msk [vmem:[#allocation2 + $0x18] sm:$0xff] %vm395_vm1, %v4088_v13  ;;  %v3785_v29 = vadd.f32 %v3777_v37, %v3767_v24  ;;  %v3869_v30 = vpop.f32.mrf.mxu1  ;;  %v4111_v34 = vadd.f32 %v7967_v60, %v4103_v27 }
 0x2d7   : > { %v3878_v36 = vld [vmem:[#allocation2 + $0x30] sm:$0xff] }
 0x2d8   : > { %3793 = vst.msk [vmem:[#allocation2 + $0x38] sm:$0xff] %vm395_vm1, %v3785_v29  ;;  %v3886_v38 = vadd.f32 %v3878_v36, %v3866_v7  ;;  %6218 = vmatmul.msk.f32.gmra.mxu0 %vm395_vm1, %v6208_v14  ;;  %v6294_v14 = vld [vmem:[%s6878_s10 + $0x42] sm:$0xff] }
 0x2d9   : > { %v3980_v28 = vld [vmem:[#allocation2 + $0x28] sm:$0xff]  ;;  %6236 = vmatmul.msk.f32.gmra.mxu1 %vm395_vm1, %v6226_v18  ;;  %6254 = vmatmul.msk.f32.gmra.mxu2 %vm395_vm1, %v6244_v32  ;;  %6123 = vst.msk [vmem:[%s7187_s27 + $0x28] sm:$0xff] %vm395_vm1, %v4111_v34  ;;  %v6295_v34 = vld [vmem:[%s6878_s10 + $0x52] sm:$0xff] }
 0x2da   : > { %3894 = vst.msk [vmem:[#allocation2 + $0x30] sm:$0xff] %vm395_vm1, %v3886_v38  ;;  %v3988_v40 = vadd.f32 %v3980_v28, %v3966_v16  ;;  %6272 = vmatmul.msk.f32.gmra.mxu3 %vm395_vm1, %v6262_v26 }
 0x2db   : > { %v4081_v15 = vld [vmem:[#allocation2 + $0x20] sm:$0xff] }
 0x2dc   : > { %3996 = vst.msk [vmem:[#allocation2 + $0x28] sm:$0xff] %vm395_vm1, %v3988_v40  ;;  %v4089_v39 = vadd.f32 %v4081_v15, %v7961_v56  ;;  %v3972_v41 = vpop.f32.mrf.mxu2 }
 0x2dd   : > { %v4180_v42 = vpop.f32.mrf.mxu0  ;;  %v8015_v44 = vpop.f32.mrf.mxu3  ;;  %v4104_v45 = vld [vmem:[#allocation2 + $0x18] sm:$0xff] }
 0x2de   : > { %4097 = vst.msk [vmem:[#allocation2 + $0x20] sm:$0xff] %vm395_vm1, %v4089_v39  ;;  %v4266_v46 = vpop.f32.mrf.mxu1  ;;  %v4112_v48 = vadd.f32 %v7967_v60, %v4104_v45  ;;  %v6278_v45 = vld [vmem:[%s6878_s10 + $0x61] sm:$0xff] }
 0x2df   : > { %v3879_v49 = vld [vmem:[#allocation2 + $0x38] sm:$0xff]  ;;  %4204 = vst.msk [vmem:[#allocation2] sm:$0xff] %vm395_vm1, %v4180_v42 }
 0x2e0   : > { %v3887_v50 = vadd.f32 %v3879_v49, %v3869_v30  ;;  %6283 = vmatmul.msk.f32.vlgmr.msrb.gmra.mxu0 %vm395_vm1, %v6273_v43  ;;  %6124 = vst.msk [vmem:[%s7187_s27 + $0x38] sm:$0xff] %vm395_vm1, %v4112_v48  ;;  %v6277_v30 = vld [vmem:[%s6878_s10 + $0x51] sm:$0xff] }
 0x2e1   : > { %v3981_v51 = vld [vmem:[#allocation2 + $0x30] sm:$0xff]  ;;  %6301 = vmatmul.msk.f32.vlgmr.msrb.gmra.mxu1 %vm395_vm1, %v6291_v47  ;;  %6319 = vmatmul.msk.f32.vlgmr.msrb.gmra.mxu2 %vm395_vm1, %v6274_v31  ;;  %v6296_v47 = vld [vmem:[%s6878_s10 + $0x62] sm:$0xff] }
 0x2e2   : > { %3895 = vst.msk [vmem:[#allocation2 + $0x38] sm:$0xff] %vm395_vm1, %v3887_v50  ;;  %v3989_v53 = vadd.f32 %v3981_v51, %v3969_v23  ;;  %6337 = vmatmul.msk.f32.vlgmr.msrb.gmra.mxu3 %vm395_vm1, %v6292_v52 }
 0x2e3   : > { %v4082_v17 = vld [vmem:[#allocation2 + $0x28] sm:$0xff] }
 0x2e4   : > { %3997 = vst.msk [vmem:[#allocation2 + $0x30] sm:$0xff] %vm395_vm1, %v3989_v53  ;;  %v4090_v54 = vadd.f32 %v4082_v17, %v7982_v5  ;;  %v4368_v9 = vpop.f32.mrf.mxu2 }
 0x2e5   : > { %v4183_v55 = vpop.f32.mrf.mxu0  ;;  %v8032_v56 = vpop.f32.mrf.mxu3  ;;  %v4105_v57 = vld [vmem:[#allocation2 + $0x20] sm:$0xff] }
 0x2e6   : > { %4098 = vst.msk [vmem:[#allocation2 + $0x28] sm:$0xff] %vm395_vm1, %v4090_v54  ;;  %v4290_v58 = vld [vmem:[#allocation2] sm:$0xff]  ;;  %v4269_v59 = vpop.f32.mrf.mxu1  ;;  %v4113_v33 = vadd.f32 %v7967_v60, %v4105_v57 }
 0x2e7   : > { %4205 = vst.msk [vmem:[#allocation2 + $0x8] sm:$0xff] %vm395_vm1, %v4183_v55  ;;  %v4298_v61 = vadd.f32 %v4290_v58, %v4266_v46 }
 0x2e8   : > { %6284 = vmatmul.msk.f32.gmra.mxu0 %vm395_vm1, %v6274_v31  ;;  %6125 = vst.msk [vmem:[%s7187_s27 + $0x48] sm:$0xff] %vm395_vm1, %v4113_v33 }
 0x2e9   : > { %4306 = vst.msk [vmem:[#allocation2] sm:$0xff] %vm395_vm1, %v4298_v61  ;;  %v3982_v63 = vld [vmem:[#allocation2 + $0x38] sm:$0xff]  ;;  %6302 = vmatmul.msk.f32.gmra.mxu1 %vm395_vm1, %v6292_v52  ;;  %6320 = vmatmul.msk.f32.gmra.mxu2 %vm395_vm1, %v6275_v62 }
 0x2ea   : > { %v3990_v19 = vadd.f32 %v3982_v63, %v3972_v41  ;;  %6338 = vmatmul.msk.f32.gmra.mxu3 %vm395_vm1, %v6293_v0 }
 0x2eb   : > { %v4083_v1 = vld [vmem:[#allocation2 + $0x30] sm:$0xff] }
 0x2ec   : > { %3998 = vst.msk [vmem:[#allocation2 + $0x38] sm:$0xff] %vm395_vm1, %v3990_v19  ;;  %v4091_v2 = vadd.f32 %v4083_v1, %v7998_v25  ;;  %v4371_v11 = vpop.f32.mrf.mxu2 }
 0x2ed   : > { %v4186_v16 = vpop.f32.mrf.mxu0  ;;  %v8048_v3 = vpop.f32.mrf.mxu3  ;;  %v4106_v4 = vld [vmem:[#allocation2 + $0x28] sm:$0xff] }
 0x2ee   : > { %4099 = vst.msk [vmem:[#allocation2 + $0x30] sm:$0xff] %vm395_vm1, %v4091_v2  ;;  %v4291_v5 = vld [vmem:[#allocation2 + $0x8] sm:$0xff]  ;;  %v4272_v35 = vpop.f32.mrf.mxu1  ;;  %v4114_v6 = vadd.f32 %v7967_v60, %v4106_v4 }
 0x2ef   : > { %4206 = vst.msk [vmem:[#allocation2 + $0x10] sm:$0xff] %vm395_vm1, %v4186_v16  ;;  %v4299_v7 = vadd.f32 %v4291_v5, %v4269_v59  ;;  %v6280_v2 = vld [vmem:[%s6878_s10 + $0x81] sm:$0xff] }
 0x2f0   : > { %v4392_v8 = vld [vmem:[#allocation2] sm:$0xff]  ;;  %6285 = vmatmul.msk.f32.gmra.mxu0 %vm395_vm1, %v6275_v62  ;;  %6126 = vst.msk [vmem:[%s7187_s27 + $0x58] sm:$0xff] %vm395_vm1, %v4114_v6 }
 0x2f1   : > { %4307 = vst.msk [vmem:[#allocation2 + $0x8] sm:$0xff] %vm395_vm1, %v4299_v7  ;;  %v4400_v12 = vadd.f32 %v4392_v8, %v4368_v9  ;;  %6303 = vmatmul.msk.f32.gmra.mxu1 %vm395_vm1, %v6293_v0  ;;  %6321 = vmatmul.msk.f32.gmra.mxu2 %vm395_vm1, %v6276_v10  ;;  %v6279_v9 = vld [vmem:[%s6878_s10 + $0x71] sm:$0xff] }
 0x2f2   : > { %6339 = vmatmul.msk.f32.gmra.mxu3 %vm395_vm1, %v6294_v14 }
 0x2f3   : > { %4408 = vst.msk [vmem:[#allocation2] sm:$0xff] %vm395_vm1, %v4400_v12  ;;  %v4084_v22 = vld [vmem:[#allocation2 + $0x38] sm:$0xff] }
 0x2f4   : > { %v4092_v18 = vadd.f32 %v4084_v22, %v8015_v44  ;;  %v4374_v20 = vpop.f32.mrf.mxu2 }
 0x2f5   : > { %v4189_v21 = vpop.f32.mrf.mxu0  ;;  %v8064_v13 = vpop.f32.mrf.mxu3  ;;  %v4107_v23 = vld [vmem:[#allocation2 + $0x30] sm:$0xff] }
 0x2f6   : > { %4100 = vst.msk [vmem:[#allocation2 + $0x38] sm:$0xff] %vm395_vm1, %v4092_v18  ;;  %v4292_v24 = vld [vmem:[#allocation2 + $0x10] sm:$0xff]  ;;  %v4275_v37 = vpop.f32.mrf.mxu1  ;;  %v4115_v25 = vadd.f32 %v7967_v60, %v4107_v23 }
 0x2f7   : > { %4207 = vst.msk [vmem:[#allocation2 + $0x18] sm:$0xff] %vm395_vm1, %v4189_v21  ;;  %v4300_v27 = vadd.f32 %v4292_v24, %v4272_v35 }
 0x2f8   : > { %v4393_v29 = vld [vmem:[#allocation2 + $0x8] sm:$0xff]  ;;  %6286 = vmatmul.msk.f32.gmra.mxu0 %vm395_vm1, %v6276_v10  ;;  %6127 = vst.msk [vmem:[%s7187_s27 + $0x68] sm:$0xff] %vm395_vm1, %v4115_v25  ;;  %v6316_v10 = vld [vmem:[%s6878_s10 + $0x91] sm:$0xff] }
 0x2f9   : > { %4308 = vst.msk [vmem:[#allocation2 + $0x10] sm:$0xff] %vm395_vm1, %v4300_v27  ;;  %v4401_v32 = vadd.f32 %v4393_v29, %v4371_v11  ;;  %6304 = vmatmul.msk.f32.gmra.mxu1 %vm395_vm1, %v6294_v14  ;;  %6322 = vmatmul.msk.f32.gmra.mxu2 %vm395_vm1, %v6277_v30  ;;  %v6298_v11 = vld [vmem:[%s6878_s10 + $0x82] sm:$0xff]  ;;  %v6334_v14 = vld [vmem:[%s6878_s10 + $0x92] sm:$0xff] }
 0x2fa   : > { %v4494_v36 = vld [vmem:[#allocation2] sm:$0xff]  ;;  %6340 = vmatmul.msk.f32.gmra.mxu3 %vm395_vm1, %v6295_v34 }
 0x2fb   : > { %4409 = vst.msk [vmem:[#allocation2 + $0x8] sm:$0xff] %vm395_vm1, %v4401_v32  ;;  %v4502_v26 = vadd.f32 %v4494_v36, %v8032_v56  ;;  %v6297_v56 = vld [vmem:[%s6878_s10 + $0x72] sm:$0xff] }
 0x2fc   : > { %v4377_v38 = vpop.f32.mrf.mxu2 }
 0x2fd   : > { %4510 = vst.msk [vmem:[#allocation2] sm:$0xff] %vm395_vm1, %v4502_v26  ;;  %v4192_v28 = vpop.f32.mrf.mxu0  ;;  %v4479_v40 = vpop.f32.mrf.mxu3  ;;  %v4108_v15 = vld [vmem:[#allocation2 + $0x38] sm:$0xff] }
 0x2fe   : > { %4208 = vst.msk [vmem:[#allocation2 + $0x20] sm:$0xff] %vm395_vm1, %v4192_v28  ;;  %v4293_v39 = vld [vmem:[#allocation2 + $0x18] sm:$0xff]  ;;  %v4278_v41 = vpop.f32.mrf.mxu1  ;;  %v4116_v42 = vadd.f32 %v7967_v60, %v4108_v15 }
 0x2ff   : > { %v4301_v43 = vadd.f32 %v4293_v39, %v4275_v37 }
 0x300   : > { %v4394_v44 = vld [vmem:[#allocation2 + $0x10] sm:$0xff]  ;;  %6287 = vmatmul.msk.f32.gmra.mxu0 %vm395_vm1, %v6277_v30  ;;  %6128 = vst.msk [vmem:[%s7187_s27 + $0x78] sm:$0xff] %vm395_vm1, %v4116_v42 }
 0x301   : > { %4309 = vst.msk [vmem:[#allocation2 + $0x18] sm:$0xff] %vm395_vm1, %v4301_v43  ;;  %v4402_v46 = vadd.f32 %v4394_v44, %v4374_v20  ;;  %6305 = vmatmul.msk.f32.gmra.mxu1 %vm395_vm1, %v6295_v34  ;;  %6323 = vmatmul.msk.f32.gmra.mxu2 %vm395_vm1, %v6278_v45 }
 0x302   : > { %v4495_v48 = vld [vmem:[#allocation2 + $0x8] sm:$0xff]  ;;  %6341 = vmatmul.msk.f32.gmra.mxu3 %vm395_vm1, %v6296_v47 }
 0x303   : > { %4410 = vst.msk [vmem:[#allocation2 + $0x10] sm:$0xff] %vm395_vm1, %v4402_v46  ;;  %v4503_v49 = vadd.f32 %v4495_v48, %v8048_v3 }
 0x304   : > { %v4380_v50 = vpop.f32.mrf.mxu2  ;;  %v4596_v24 = vld [vmem:[#allocation2] sm:$0xff] }
 0x305   : > { %4511 = vst.msk [vmem:[#allocation2 + $0x8] sm:$0xff] %vm395_vm1, %v4503_v49  ;;  %v4195_v31 = vpop.f32.mrf.mxu0  ;;  %v4294_v51 = vld [vmem:[#allocation2 + $0x20] sm:$0xff]  ;;  %v4482_v52 = vpop.f32.mrf.mxu3 }
 0x306   : > { %4209 = vst.msk [vmem:[#allocation2 + $0x28] sm:$0xff] %vm395_vm1, %v4195_v31  ;;  %v4302_v53 = vadd.f32 %v4294_v51, %v4278_v41  ;;  %v4281_v17 = vpop.f32.mrf.mxu1 }
 0x308   : > { %4310 = vst.msk [vmem:[#allocation2 + $0x20] sm:$0xff] %vm395_vm1, %v4302_v53  ;;  %v4395_v54 = vld [vmem:[#allocation2 + $0x18] sm:$0xff]  ;;  %6288 = vmatmul.msk.f32.gmra.mxu0 %vm395_vm1, %v6278_v45 }
 0x309   : > { %v4403_v55 = vadd.f32 %v4395_v54, %v4377_v38  ;;  %6306 = vmatmul.msk.f32.gmra.mxu1 %vm395_vm1, %v6296_v47  ;;  %6324 = vmatmul.msk.f32.gmra.mxu2 %vm395_vm1, %v6279_v9 }
 0x30a   : > { %v4496_v57 = vld [vmem:[#allocation2 + $0x10] sm:$0xff]  ;;  %6342 = vmatmul.msk.f32.gmra.mxu3 %vm395_vm1, %v6297_v56 }
 0x30b   : > { %4411 = vst.msk [vmem:[#allocation2 + $0x18] sm:$0xff] %vm395_vm1, %v4403_v55  ;;  %v4504_v58 = vadd.f32 %v4496_v57, %v8064_v13 }
 0x30c   : > { %v4383_v59 = vpop.f32.mrf.mxu2  ;;  %v4597_v28 = vld [vmem:[#allocation2 + $0x8] sm:$0xff] }
 0x30d   : > { %4512 = vst.msk [vmem:[#allocation2 + $0x10] sm:$0xff] %vm395_vm1, %v4504_v58  ;;  %v4198_v33 = vpop.f32.mrf.mxu0  ;;  %v4295_v61 = vld [vmem:[#allocation2 + $0x28] sm:$0xff]  ;;  %v4485_v62 = vpop.f32.mrf.mxu3 }
 0x30e   : > { %4210 = vst.msk [vmem:[#allocation2 + $0x30] sm:$0xff] %vm395_vm1, %v4198_v33  ;;  %v4303_v63 = vadd.f32 %v4295_v61, %v4281_v17  ;;  %v4284_v0 = vpop.f32.mrf.mxu1 }
 0x30f   : > { %v4396_v19 = vld [vmem:[#allocation2 + $0x20] sm:$0xff] }
 0x310   : > { %4311 = vst.msk [vmem:[#allocation2 + $0x28] sm:$0xff] %vm395_vm1, %v4303_v63  ;;  %v4404_v1 = vadd.f32 %v4396_v19, %v4380_v50  ;;  %6289 = vmatmul.msk.f32.gmra.mxu0 %vm395_vm1, %v6279_v9 }
 0x311   : > { %6307 = vmatmul.msk.f32.gmra.mxu1 %vm395_vm1, %v6297_v56  ;;  %6325 = vmatmul.msk.f32.gmra.mxu2 %vm395_vm1, %v6280_v2 }
 0x312   : > { %4412 = vst.msk [vmem:[#allocation2 + $0x20] sm:$0xff] %vm395_vm1, %v4404_v1  ;;  %v4497_v16 = vld [vmem:[#allocation2 + $0x18] sm:$0xff]  ;;  %6343 = vmatmul.msk.f32.gmra.mxu3 %vm395_vm1, %v6298_v11 }
 0x313   : > { %v4505_v3 = vadd.f32 %v4497_v16, %v4479_v40 }
 0x314   : > { %v4386_v4 = vpop.f32.mrf.mxu2  ;;  %v4598_v49 = vld [vmem:[#allocation2 + $0x10] sm:$0xff] }
 0x315   : > { %4513 = vst.msk [vmem:[#allocation2 + $0x18] sm:$0xff] %vm395_vm1, %v4505_v3  ;;  %v4201_v5 = vpop.f32.mrf.mxu0  ;;  %v4296_v35 = vld [vmem:[#allocation2 + $0x30] sm:$0xff]  ;;  %v4488_v6 = vpop.f32.mrf.mxu3 }
 0x316   : > { %4211 = vst.msk [vmem:[#allocation2 + $0x38] sm:$0xff] %vm395_vm1, %v4201_v5  ;;  %v4304_v7 = vadd.f32 %v4296_v35, %v4284_v0  ;;  %v4287_v8 = vpop.f32.mrf.mxu1 }
 0x317   : > { %v4397_v12 = vld [vmem:[#allocation2 + $0x28] sm:$0xff] }
 0x318   : > { %4312 = vst.msk [vmem:[#allocation2 + $0x30] sm:$0xff] %vm395_vm1, %v4304_v7  ;;  %v4405_v22 = vadd.f32 %v4397_v12, %v4383_v59  ;;  %6290 = vmatmul.msk.f32.gmra.mxu0 %vm395_vm1, %v6280_v2 }
 0x319   : > { %v4498_v18 = vld [vmem:[#allocation2 + $0x20] sm:$0xff]  ;;  %6308 = vmatmul.msk.f32.gmra.mxu1 %vm395_vm1, %v6298_v11  ;;  %6326 = vmatmul.msk.f32.gmra.mxu2 %vm395_vm1, %v6316_v10 }
 0x31a   : > { %4413 = vst.msk [vmem:[#allocation2 + $0x28] sm:$0xff] %vm395_vm1, %v4405_v22  ;;  %v4506_v20 = vadd.f32 %v4498_v18, %v4482_v52  ;;  %6344 = vmatmul.msk.f32.gmra.mxu3 %vm395_vm1, %v6334_v14 }
 0x31c   : > { %4514 = vst.msk [vmem:[#allocation2 + $0x20] sm:$0xff] %vm395_vm1, %v4506_v20  ;;  %v4389_v21 = vpop.f32.mrf.mxu2  ;;  %v4599_v58 = vld [vmem:[#allocation2 + $0x18] sm:$0xff] }
 0x31d   : > { %v4297_v13 = vld [vmem:[#allocation2 + $0x38] sm:$0xff]  ;;  %v4572_v23 = vpop.f32.mrf.mxu0  ;;  %v4491_v37 = vpop.f32.mrf.mxu3 }
 0x31e   : > { %v4305_v25 = vadd.f32 %v4297_v13, %v4287_v8  ;;  %v4604_v27 = vadd.f32 %v4596_v24, %v4572_v23  ;;  %v4674_v29 = vpop.f32.mrf.mxu1 }
 0x31f   : > { %v4398_v30 = vld [vmem:[#allocation2 + $0x30] sm:$0xff] }
 0x320   : > { %4313 = vst.msk [vmem:[#allocation2 + $0x38] sm:$0xff] %vm395_vm1, %v4305_v25  ;;  %v4406_v32 = vadd.f32 %v4398_v30, %v4386_v4 }
 0x321   : > { %4612 = vst.msk [vmem:[#allocation2] sm:$0xff] %vm395_vm1, %v4604_v27  ;;  %v4499_v34 = vld [vmem:[#allocation2 + $0x28] sm:$0xff] }
 0x322   : > { %4414 = vst.msk [vmem:[#allocation2 + $0x30] sm:$0xff] %vm395_vm1, %v4406_v32  ;;  %v4507_v36 = vadd.f32 %v4499_v34, %v4485_v62 }
 0x323   : > { %v4600_v3 = vld [vmem:[#allocation2 + $0x20] sm:$0xff] }
 0x324   : > { %4515 = vst.msk [vmem:[#allocation2 + $0x28] sm:$0xff] %vm395_vm1, %v4507_v36  ;;  %v4776_v26 = vpop.f32.mrf.mxu2 }
 0x325   : > { %v4575_v38 = vpop.f32.mrf.mxu0  ;;  %v4878_v40 = vpop.f32.mrf.mxu3 }
 0x326   : > { %v4605_v15 = vadd.f32 %v4597_v28, %v4575_v38  ;;  %v4677_v39 = vpop.f32.mrf.mxu1 }
 0x327   : > { %v4399_v41 = vld [vmem:[#allocation2 + $0x38] sm:$0xff] }
 0x328   : > { %4613 = vst.msk [vmem:[#allocation2 + $0x8] sm:$0xff] %vm395_vm1, %v4605_v15  ;;  %v4407_v42 = vadd.f32 %v4399_v41, %v4389_v21  ;;  %v4698_v43 = vld [vmem:[#allocation2] sm:$0xff] }
 0x329   : > { %v4706_v44 = vadd.f32 %v4698_v43, %v4674_v29  ;;  %v4500_v45 = vld [vmem:[#allocation2 + $0x30] sm:$0xff] }
 0x32a   : > { %4415 = vst.msk [vmem:[#allocation2 + $0x38] sm:$0xff] %vm395_vm1, %v4407_v42  ;;  %v4508_v46 = vadd.f32 %v4500_v45, %v4488_v6 }
 0x32b   : > { %4714 = vst.msk [vmem:[#allocation2] sm:$0xff] %vm395_vm1, %v4706_v44  ;;  %v4601_v20 = vld [vmem:[#allocation2 + $0x28] sm:$0xff] }
 0x32c   : > { %4516 = vst.msk [vmem:[#allocation2 + $0x30] sm:$0xff] %vm395_vm1, %v4508_v46  ;;  %v4779_v47 = vpop.f32.mrf.mxu2 }
 0x32d   : > { %v4578_v48 = vpop.f32.mrf.mxu0  ;;  %v4881_v50 = vpop.f32.mrf.mxu3 }
 0x32e   : > { %v4606_v31 = vadd.f32 %v4598_v49, %v4578_v48  ;;  %v4680_v51 = vpop.f32.mrf.mxu1 }
 0x32f   : > { %v4699_v52 = vld [vmem:[#allocation2 + $0x8] sm:$0xff] }
 0x330   : > { %4614 = vst.msk [vmem:[#allocation2 + $0x10] sm:$0xff] %vm395_vm1, %v4606_v31  ;;  %v4707_v53 = vadd.f32 %v4699_v52, %v4677_v39 }
 0x331   : > { %v4501_v17 = vld [vmem:[#allocation2 + $0x38] sm:$0xff] }
 0x332   : > { %4715 = vst.msk [vmem:[#allocation2 + $0x8] sm:$0xff] %vm395_vm1, %v4707_v53  ;;  %v4509_v54 = vadd.f32 %v4501_v17, %v4491_v37  ;;  %v4800_v9 = vld [vmem:[#allocation2] sm:$0xff] }
 0x333   : > { %v4808_v55 = vadd.f32 %v4800_v9, %v4776_v26  ;;  %v4602_v36 = vld [vmem:[#allocation2 + $0x30] sm:$0xff] }
 0x334   : > { %4517 = vst.msk [vmem:[#allocation2 + $0x38] sm:$0xff] %vm395_vm1, %v4509_v54  ;;  %v4782_v56 = vpop.f32.mrf.mxu2 }
 0x335   : > { %4816 = vst.msk [vmem:[#allocation2] sm:$0xff] %vm395_vm1, %v4808_v55  ;;  %v4581_v57 = vpop.f32.mrf.mxu0  ;;  %v4884_v59 = vpop.f32.mrf.mxu3 }
 0x336   : > { %v4607_v33 = vadd.f32 %v4599_v58, %v4581_v57  ;;  %v4683_v61 = vpop.f32.mrf.mxu1 }
 0x337   : > { %v4700_v62 = vld [vmem:[#allocation2 + $0x10] sm:$0xff] }
 0x338   : > { %4615 = vst.msk [vmem:[#allocation2 + $0x18] sm:$0xff] %vm395_vm1, %v4607_v33  ;;  %v4708_v63 = vadd.f32 %v4700_v62, %v4680_v51 }
 0x339   : > { %v4801_v0 = vld [vmem:[#allocation2 + $0x8] sm:$0xff] }
 0x33a   : > { %4716 = vst.msk [vmem:[#allocation2 + $0x10] sm:$0xff] %vm395_vm1, %v4708_v63  ;;  %v4809_v19 = vadd.f32 %v4801_v0, %v4779_v47 }
 0x33b   : > { %v4603_v46 = vld [vmem:[#allocation2 + $0x38] sm:$0xff] }
 0x33c   : > { %4817 = vst.msk [vmem:[#allocation2 + $0x8] sm:$0xff] %vm395_vm1, %v4809_v19  ;;  %v4902_v1 = vld [vmem:[#allocation2] sm:$0xff]  ;;  %v4785_v2 = vpop.f32.mrf.mxu2 }
 0x33d   : > { %v4910_v11 = vadd.f32 %v4902_v1, %v4878_v40  ;;  %v4584_v16 = vpop.f32.mrf.mxu0  ;;  %v4887_v4 = vpop.f32.mrf.mxu3 }
 0x33e   : > { %v4608_v5 = vadd.f32 %v4600_v3, %v4584_v16  ;;  %v4686_v35 = vpop.f32.mrf.mxu1 }
 0x33f   : > { %4918 = vst.msk [vmem:[#allocation2] sm:$0xff] %vm395_vm1, %v4910_v11  ;;  %v4701_v6 = vld [vmem:[#allocation2 + $0x18] sm:$0xff] }
 0x340   : > { %4616 = vst.msk [vmem:[#allocation2 + $0x20] sm:$0xff] %vm395_vm1, %v4608_v5  ;;  %v4709_v7 = vadd.f32 %v4701_v6, %v4683_v61 }
 0x341   : > { %v4802_v8 = vld [vmem:[#allocation2 + $0x10] sm:$0xff] }
 0x342   : > { %4717 = vst.msk [vmem:[#allocation2 + $0x18] sm:$0xff] %vm395_vm1, %v4709_v7  ;;  %v4810_v10 = vadd.f32 %v4802_v8, %v4782_v56 }
 0x343   : > { %v4903_v12 = vld [vmem:[#allocation2 + $0x8] sm:$0xff] }
 0x344   : > { %4818 = vst.msk [vmem:[#allocation2 + $0x10] sm:$0xff] %vm395_vm1, %v4810_v10  ;;  %v4911_v14 = vadd.f32 %v4903_v12, %v4881_v50  ;;  %v4788_v22 = vpop.f32.mrf.mxu2 }
 0x345   : > { %v4587_v18 = vpop.f32.mrf.mxu0  ;;  %v4890_v21 = vpop.f32.mrf.mxu3 }
 0x346   : > { %4919 = vst.msk [vmem:[#allocation2 + $0x8] sm:$0xff] %vm395_vm1, %v4911_v14  ;;  %v4609_v13 = vadd.f32 %v4601_v20, %v4587_v18  ;;  %v4689_v23 = vpop.f32.mrf.mxu1  ;;  %v5004_v55 = vld [vmem:[#allocation2] sm:$0xff] }
 0x347   : > { %v4702_v24 = vld [vmem:[#allocation2 + $0x20] sm:$0xff] }
 0x348   : > { %4617 = vst.msk [vmem:[#allocation2 + $0x28] sm:$0xff] %vm395_vm1, %v4609_v13  ;;  %v4710_v37 = vadd.f32 %v4702_v24, %v4686_v35 }
 0x349   : > { %v4803_v25 = vld [vmem:[#allocation2 + $0x18] sm:$0xff] }
 0x34a   : > { %4718 = vst.msk [vmem:[#allocation2 + $0x20] sm:$0xff] %vm395_vm1, %v4710_v37  ;;  %v4811_v27 = vadd.f32 %v4803_v25, %v4785_v2 }
 0x34b   : > { %v4904_v29 = vld [vmem:[#allocation2 + $0x10] sm:$0xff] }
 0x34c   : > { %4819 = vst.msk [vmem:[#allocation2 + $0x18] sm:$0xff] %vm395_vm1, %v4811_v27  ;;  %v4912_v30 = vadd.f32 %v4904_v29, %v4884_v59  ;;  %v4791_v32 = vpop.f32.mrf.mxu2 }
 0x34d   : > { %v4590_v34 = vpop.f32.mrf.mxu0  ;;  %v4893_v26 = vpop.f32.mrf.mxu3  ;;  %v5005_v2 = vld [vmem:[#allocation2 + $0x8] sm:$0xff] }
 0x34e   : > { %4920 = vst.msk [vmem:[#allocation2 + $0x10] sm:$0xff] %vm395_vm1, %v4912_v30  ;;  %v4610_v38 = vadd.f32 %v4602_v36, %v4590_v34  ;;  %v4692_v28 = vpop.f32.mrf.mxu1 }
 0x34f   : > { %v4703_v40 = vld [vmem:[#allocation2 + $0x28] sm:$0xff] }
 0x350   : > { %4618 = vst.msk [vmem:[#allocation2 + $0x30] sm:$0xff] %vm395_vm1, %v4610_v38  ;;  %v4711_v15 = vadd.f32 %v4703_v40, %v4689_v23 }
 0x351   : > { %v4804_v39 = vld [vmem:[#allocation2 + $0x20] sm:$0xff] }
 0x352   : > { %4719 = vst.msk [vmem:[#allocation2 + $0x28] sm:$0xff] %vm395_vm1, %v4711_v15  ;;  %v4812_v41 = vadd.f32 %v4804_v39, %v4788_v22 }
 0x353   : > { %v4905_v42 = vld [vmem:[#allocation2 + $0x18] sm:$0xff] }
 0x354   : > { %4820 = vst.msk [vmem:[#allocation2 + $0x20] sm:$0xff] %vm395_vm1, %v4812_v41  ;;  %v4913_v43 = vadd.f32 %v4905_v42, %v4887_v4  ;;  %v4794_v44 = vpop.f32.mrf.mxu2 }
 0x355   : > { %v4593_v45 = vpop.f32.mrf.mxu0  ;;  %v4896_v49 = vpop.f32.mrf.mxu3  ;;  %v5006_v14 = vld [vmem:[#allocation2 + $0x10] sm:$0xff] }
 0x356   : > { %4921 = vst.msk [vmem:[#allocation2 + $0x18] sm:$0xff] %vm395_vm1, %v4913_v43  ;;  %v4611_v47 = vadd.f32 %v4603_v46, %v4593_v45  ;;  %v4695_v48 = vpop.f32.mrf.mxu1 }
 0x357   : > { %v4704_v50 = vld [vmem:[#allocation2 + $0x30] sm:$0xff] }
 0x358   : > { %4619 = vst.msk [vmem:[#allocation2 + $0x38] sm:$0xff] %vm395_vm1, %v4611_v47  ;;  %v4712_v31 = vadd.f32 %v4704_v50, %v4692_v28 }
 0x359   : > { %v4805_v51 = vld [vmem:[#allocation2 + $0x28] sm:$0xff] }
 0x35a   : > { %4720 = vst.msk [vmem:[#allocation2 + $0x30] sm:$0xff] %vm395_vm1, %v4712_v31  ;;  %v4813_v52 = vadd.f32 %v4805_v51, %v4791_v32 }
 0x35b   : > { %v4906_v53 = vld [vmem:[#allocation2 + $0x20] sm:$0xff] }
 0x35c   : > { %4821 = vst.msk [vmem:[#allocation2 + $0x28] sm:$0xff] %vm395_vm1, %v4813_v52  ;;  %v4914_v17 = vadd.f32 %v4906_v53, %v4890_v21  ;;  %v4797_v54 = vpop.f32.mrf.mxu2 }
 0x35d   : > { %v4980_v9 = vpop.f32.mrf.mxu0  ;;  %v4899_v33 = vpop.f32.mrf.mxu3  ;;  %v5007_v29 = vld [vmem:[#allocation2 + $0x18] sm:$0xff] }
 0x35e   : > { %4922 = vst.msk [vmem:[#allocation2 + $0x20] sm:$0xff] %vm395_vm1, %v4914_v17  ;;  %v5012_v56 = vadd.f32 %v5004_v55, %v4980_v9  ;;  %v5082_v57 = vpop.f32.mrf.mxu1 }
 0x35f   : > { %v4705_v58 = vld [vmem:[#allocation2 + $0x38] sm:$0xff] }
 0x360   : > { %5020 = vst.msk [vmem:[#allocation2] sm:$0xff] %vm395_vm1, %v5012_v56  ;;  %v4713_v59 = vadd.f32 %v4705_v58, %v4695_v48 }
 0x361   : > { %v4806_v61 = vld [vmem:[#allocation2 + $0x30] sm:$0xff] }
 0x362   : > { %4721 = vst.msk [vmem:[#allocation2 + $0x38] sm:$0xff] %vm395_vm1, %v4713_v59  ;;  %v4814_v62 = vadd.f32 %v4806_v61, %v4794_v44 }
 0x363   : > { %v4907_v63 = vld [vmem:[#allocation2 + $0x28] sm:$0xff] }
 0x364   : > { %4822 = vst.msk [vmem:[#allocation2 + $0x30] sm:$0xff] %vm395_vm1, %v4814_v62  ;;  %v4915_v0 = vadd.f32 %v4907_v63, %v4893_v26  ;;  %v5184_v19 = vpop.f32.mrf.mxu2 }
 0x365   : > { %v4983_v1 = vpop.f32.mrf.mxu0  ;;  %v5286_v6 = vpop.f32.mrf.mxu3  ;;  %v5008_v41 = vld [vmem:[#allocation2 + $0x20] sm:$0xff] }
 0x366   : > { %4923 = vst.msk [vmem:[#allocation2 + $0x28] sm:$0xff] %vm395_vm1, %v4915_v0  ;;  %v5013_v11 = vadd.f32 %v5005_v2, %v4983_v1  ;;  %v5085_v16 = vpop.f32.mrf.mxu1 }
 0x367   : > { %v5106_v3 = vld [vmem:[#allocation2] sm:$0xff] }
 0x368   : > { %5021 = vst.msk [vmem:[#allocation2 + $0x8] sm:$0xff] %vm395_vm1, %v5013_v11  ;;  %v5114_v4 = vadd.f32 %v5106_v3, %v5082_v57 }
 0x369   : > { %v4807_v5 = vld [vmem:[#allocation2 + $0x38] sm:$0xff] }
 0x36a   : > { %5122 = vst.msk [vmem:[#allocation2] sm:$0xff] %vm395_vm1, %v5114_v4  ;;  %v4815_v35 = vadd.f32 %v4807_v5, %v4797_v54 }
 0x36b   : > { %v4908_v7 = vld [vmem:[#allocation2 + $0x30] sm:$0xff] }
 0x36c   : > { %4823 = vst.msk [vmem:[#allocation2 + $0x38] sm:$0xff] %vm395_vm1, %v4815_v35  ;;  %v4916_v8 = vadd.f32 %v4908_v7, %v4896_v49  ;;  %v5187_v10 = vpop.f32.mrf.mxu2 }
 0x36d   : > { %v4986_v12 = vpop.f32.mrf.mxu0  ;;  %v5289_v25 = vpop.f32.mrf.mxu3  ;;  %v5009_v52 = vld [vmem:[#allocation2 + $0x28] sm:$0xff] }
 0x36e   : > { %4924 = vst.msk [vmem:[#allocation2 + $0x30] sm:$0xff] %vm395_vm1, %v4916_v8  ;;  %v5014_v22 = vadd.f32 %v5006_v14, %v4986_v12  ;;  %v5088_v18 = vpop.f32.mrf.mxu1 }
 0x36f   : > { %v5107_v20 = vld [vmem:[#allocation2 + $0x8] sm:$0xff] }
 0x370   : > { %5022 = vst.msk [vmem:[#allocation2 + $0x10] sm:$0xff] %vm395_vm1, %v5014_v22  ;;  %v5115_v21 = vadd.f32 %v5107_v20, %v5085_v16 }
 0x371   : > { %v5208_v13 = vld [vmem:[#allocation2] sm:$0xff] }
 0x372   : > { %5123 = vst.msk [vmem:[#allocation2 + $0x8] sm:$0xff] %vm395_vm1, %v5115_v21  ;;  %v5216_v23 = vadd.f32 %v5208_v13, %v5184_v19 }
 0x373   : > { %v4909_v24 = vld [vmem:[#allocation2 + $0x38] sm:$0xff] }
 0x374   : > { %5224 = vst.msk [vmem:[#allocation2] sm:$0xff] %vm395_vm1, %v5216_v23  ;;  %v4917_v37 = vadd.f32 %v4909_v24, %v4899_v33  ;;  %v5190_v30 = vpop.f32.mrf.mxu2 }
 0x375   : > { %v4989_v27 = vpop.f32.mrf.mxu0  ;;  %v5292_v43 = vpop.f32.mrf.mxu3  ;;  %v5010_v0 = vld [vmem:[#allocation2 + $0x30] sm:$0xff] }
 0x376   : > { %4925 = vst.msk [vmem:[#allocation2 + $0x38] sm:$0xff] %vm395_vm1, %v4917_v37  ;;  %v5015_v32 = vadd.f32 %v5007_v29, %v4989_v27  ;;  %v5091_v34 = vpop.f32.mrf.mxu1 }
 0x377   : > { %v5108_v36 = vld [vmem:[#allocation2 + $0x10] sm:$0xff] }
 0x378   : > { %5023 = vst.msk [vmem:[#allocation2 + $0x18] sm:$0xff] %vm395_vm1, %v5015_v32  ;;  %v5116_v26 = vadd.f32 %v5108_v36, %v5088_v18 }
 0x379   : > { %v5209_v38 = vld [vmem:[#allocation2 + $0x8] sm:$0xff] }
 0x37a   : > { %5124 = vst.msk [vmem:[#allocation2 + $0x10] sm:$0xff] %vm395_vm1, %v5116_v26  ;;  %v5217_v28 = vadd.f32 %v5209_v38, %v5187_v10 }
 0x37b   : > { %v5310_v40 = vld [vmem:[#allocation2] sm:$0xff] }
 0x37c   : > { %5225 = vst.msk [vmem:[#allocation2 + $0x8] sm:$0xff] %vm395_vm1, %v5217_v28  ;;  %v5318_v15 = vadd.f32 %v5310_v40, %v5286_v6  ;;  %v5193_v46 = vpop.f32.mrf.mxu2 }
 0x37d   : > { %v4992_v39 = vpop.f32.mrf.mxu0  ;;  %v5295_v56 = vpop.f32.mrf.mxu3  ;;  %v5011_v12 = vld [vmem:[#allocation2 + $0x38] sm:$0xff] }
 0x37e   : > { %5326 = vst.msk [vmem:[#allocation2] sm:$0xff] %vm395_vm1, %v5318_v15  ;;  %v5016_v42 = vadd.f32 %v5008_v41, %v4992_v39  ;;  %v5094_v45 = vpop.f32.mrf.mxu1  ;;  %v6440_v39 = vld [vmem:[%s8277_s4] ss:$0 sm:$0xff] }
 0x37f   : > { %v5109_v44 = vld [vmem:[#allocation2 + $0x18] sm:$0xff] }
 0x380   : > { %5024 = vst.msk [vmem:[#allocation2 + $0x20] sm:$0xff] %vm395_vm1, %v5016_v42  ;;  %v5117_v47 = vadd.f32 %v5109_v44, %v5091_v34 }
 0x381   : > { %v5210_v48 = vld [vmem:[#allocation2 + $0x10] sm:$0xff] }
 0x382   : > { %5125 = vst.msk [vmem:[#allocation2 + $0x18] sm:$0xff] %vm395_vm1, %v5117_v47  ;;  %v5218_v49 = vadd.f32 %v5210_v48, %v5190_v30 }
 0x383   : > { %v5311_v50 = vld [vmem:[#allocation2 + $0x8] sm:$0xff] }
 0x384   : > { %5226 = vst.msk [vmem:[#allocation2 + $0x10] sm:$0xff] %vm395_vm1, %v5218_v49  ;;  %v5319_v31 = vadd.f32 %v5311_v50, %v5289_v25  ;;  %v5196_v59 = vpop.f32.mrf.mxu2 }
 0x385   : > { %v4995_v51 = vpop.f32.mrf.mxu0  ;;  %v5334_v53 = vld [vmem:[#allocation2] sm:$0xff]  ;;  %v5298_v5 = vpop.f32.mrf.mxu3 }
 0x386   : > { %5327 = vst.msk [vmem:[#allocation2 + $0x8] sm:$0xff] %vm395_vm1, %v5319_v31  ;;  %v5017_v17 = vadd.f32 %v5009_v52, %v4995_v51  ;;  %v5342_v54 = vadd.f32 %v7967_v60, %v5334_v53  ;;  %v5097_v58 = vpop.f32.mrf.mxu1 }
 0x387   : > { %v5110_v9 = vld [vmem:[#allocation2 + $0x20] sm:$0xff] }
 0x388   : > { %5025 = vst.msk [vmem:[#allocation2 + $0x28] sm:$0xff] %vm395_vm1, %v5017_v17  ;;  %v5118_v55 = vadd.f32 %v5110_v9, %v5094_v45  ;;  %5358 = vrot.lane.b32.xlu2 %v5342_v54, %s6537_s15 }
 0x389   : > { %v5211_v57 = vld [vmem:[#allocation2 + $0x18] sm:$0xff] }
 0x38a   : > { %5126 = vst.msk [vmem:[#allocation2 + $0x20] sm:$0xff] %vm395_vm1, %v5118_v55  ;;  %v5219_v33 = vadd.f32 %v5211_v57, %v5193_v46 }
 0x38b   : > { %v5312_v61 = vld [vmem:[#allocation2 + $0x10] sm:$0xff] }
 0x38c   : > { %5227 = vst.msk [vmem:[#allocation2 + $0x18] sm:$0xff] %vm395_vm1, %v5219_v33  ;;  %v5320_v62 = vadd.f32 %v5312_v61, %v5292_v43  ;;  %v5199_v7 = vpop.f32.mrf.mxu2 }
 0x38d   : > { %v4998_v63 = vpop.f32.mrf.mxu0  ;;  %v5335_v19 = vld [vmem:[#allocation2 + $0x8] sm:$0xff]  ;;  %v5301_v25 = vpop.f32.mrf.mxu3 }
 0x38e   : > { %5328 = vst.msk [vmem:[#allocation2 + $0x10] sm:$0xff] %vm395_vm1, %v5320_v62  ;;  %v5018_v1 = vadd.f32 %v5010_v0, %v4998_v63  ;;  %v5343_v2 = vadd.f32 %v7967_v60, %v5335_v19  ;;  %v5100_v6 = vpop.f32.mrf.mxu1 }
 0x38f   : > { %v5111_v11 = vld [vmem:[#allocation2 + $0x28] sm:$0xff] }
 0x390   : > { %5026 = vst.msk [vmem:[#allocation2 + $0x30] sm:$0xff] %vm395_vm1, %v5018_v1  ;;  %v5119_v16 = vadd.f32 %v5111_v11, %v5097_v58  ;;  %5360 = vrot.lane.b32.xlu0 %v5343_v2, %s6537_s15 }
 0x391   : > { %v5212_v3 = vld [vmem:[#allocation2 + $0x20] sm:$0xff] }
 0x392   : > { %5127 = vst.msk [vmem:[#allocation2 + $0x28] sm:$0xff] %vm395_vm1, %v5119_v16  ;;  %v5220_v4 = vadd.f32 %v5212_v3, %v5196_v59 }
 0x393   : > { %v5313_v35 = vld [vmem:[#allocation2 + $0x18] sm:$0xff] }
 0x394   : > { %5228 = vst.msk [vmem:[#allocation2 + $0x20] sm:$0xff] %vm395_vm1, %v5220_v4  ;;  %v5321_v8 = vadd.f32 %v5313_v35, %v5295_v56  ;;  %v5202_v30 = vpop.f32.mrf.mxu2 }
 0x395   : > { %v5001_v10 = vpop.f32.mrf.mxu0  ;;  %v5336_v14 = vld [vmem:[#allocation2 + $0x10] sm:$0xff]  ;;  %v5304_v42 = vpop.f32.mrf.mxu3 }
 0x396   : > { %5329 = vst.msk [vmem:[#allocation2 + $0x18] sm:$0xff] %vm395_vm1, %v5321_v8  ;;  %v5019_v22 = vadd.f32 %v5011_v12, %v5001_v10  ;;  %v5344_v18 = vadd.f32 %v7967_v60, %v5336_v14  ;;  %v5103_v27 = vpop.f32.mrf.mxu1 }
 0x397   : > { %v5112_v20 = vld [vmem:[#allocation2 + $0x30] sm:$0xff] }
 0x398   : > { %5027 = vst.msk [vmem:[#allocation2 + $0x38] sm:$0xff] %vm395_vm1, %v5019_v22  ;;  %v5120_v21 = vadd.f32 %v5112_v20, %v5100_v6  ;;  %5362 = vrot.lane.b32.xlu1 %v5344_v18, %s6537_s15 }
 0x399   : > { %v5213_v13 = vld [vmem:[#allocation2 + $0x28] sm:$0xff] }
 0x39a   : > { %5128 = vst.msk [vmem:[#allocation2 + $0x30] sm:$0xff] %vm395_vm1, %v5120_v21  ;;  %v5221_v23 = vadd.f32 %v5213_v13, %v5199_v7 }
 0x39b   : > { %v5314_v24 = vld [vmem:[#allocation2 + $0x20] sm:$0xff] }
 0x39c   : > { %5229 = vst.msk [vmem:[#allocation2 + $0x28] sm:$0xff] %vm395_vm1, %v5221_v23  ;;  %v5322_v37 = vadd.f32 %v5314_v24, %v5298_v5  ;;  %v5205_v41 = vpop.f32.mrf.mxu2 }
 0x39d   : > { %v5337_v29 = vld [vmem:[#allocation2 + $0x18] sm:$0xff]  ;;  %v5307_v49 = vpop.f32.mrf.mxu3 }
 0x39e   : > { %5330 = vst.msk [vmem:[#allocation2 + $0x20] sm:$0xff] %vm395_vm1, %v5322_v37  ;;  %v5345_v32 = vadd.f32 %v7967_v60, %v5337_v29 }
 0x39f   : > { %v5113_v34 = vld [vmem:[#allocation2 + $0x38] sm:$0xff] }
 0x3a0   : > { %v5121_v36 = vadd.f32 %v5113_v34, %v5103_v27  ;;  %5364 = vrot.lane.b32.xlu2 %v5345_v32, %s6537_s15 }
 0x3a1   : > { %v5214_v26 = vld [vmem:[#allocation2 + $0x30] sm:$0xff] }
 0x3a2   : > { %5129 = vst.msk [vmem:[#allocation2 + $0x38] sm:$0xff] %vm395_vm1, %v5121_v36  ;;  %v5222_v38 = vadd.f32 %v5214_v26, %v5202_v30 }
 0x3a3   : > { %v5315_v28 = vld [vmem:[#allocation2 + $0x28] sm:$0xff] }
 0x3a4   : > { %5230 = vst.msk [vmem:[#allocation2 + $0x30] sm:$0xff] %vm395_vm1, %v5222_v38  ;;  %v5323_v40 = vadd.f32 %v5315_v28, %v5301_v25 }
 0x3a5   : > { %v5338_v15 = vld [vmem:[#allocation2 + $0x20] sm:$0xff] }
 0x3a6   : > { %5331 = vst.msk [vmem:[#allocation2 + $0x28] sm:$0xff] %vm395_vm1, %v5323_v40  ;;  %v5346_v60 = vadd.f32 %v6440_v39, %v5338_v15 }
 0x3a8   : > { %5366 = vrot.lane.b32.xlu0 %v5346_v60, %s6537_s15 }
 0x3a9   : > { %v5215_v43 = vld [vmem:[#allocation2 + $0x38] sm:$0xff] }
 0x3aa   : > { %v5223_v44 = vadd.f32 %v5215_v43, %v5205_v41 }
 0x3ab   : > { %v5316_v45 = vld [vmem:[#allocation2 + $0x30] sm:$0xff] }
 0x3ac   : > { %5231 = vst.msk [vmem:[#allocation2 + $0x38] sm:$0xff] %vm395_vm1, %v5223_v44  ;;  %v5324_v46 = vadd.f32 %v5316_v45, %v5304_v42 }
 0x3ad   : > { %v5339_v47 = vld [vmem:[#allocation2 + $0x28] sm:$0xff] }
 0x3ae   : > { %5332 = vst.msk [vmem:[#allocation2 + $0x30] sm:$0xff] %vm395_vm1, %v5324_v46  ;;  %v5347_v48 = vadd.f32 %v6440_v39, %v5339_v47 }
 0x3b0   : > { %5368 = vrot.lane.b32.xlu1 %v5347_v48, %s6537_s15 }
 0x3b3   : > { %v5317_v50 = vld [vmem:[#allocation2 + $0x38] sm:$0xff] }
 0x3b4   : > { %v5325_v31 = vadd.f32 %v5317_v50, %v5307_v49 }
 0x3b5   : > { %v5340_v51 = vld [vmem:[#allocation2 + $0x30] sm:$0xff] }
 0x3b6   : > { %5333 = vst.msk [vmem:[#allocation2 + $0x38] sm:$0xff] %vm395_vm1, %v5325_v31  ;;  %v5348_v52 = vadd.f32 %v6440_v39, %v5340_v51 }
 0x3b8   : > { %5370 = vrot.lane.b32.xlu2 %v5348_v52, %s6537_s15 }
 0x3bd   : > { %v5341_v53 = vld [vmem:[#allocation2 + $0x38] sm:$0xff] }
 0x3be   : > { %v5349_v17 = vadd.f32 %v6440_v39, %v5341_v53 }
 0x3c0   : > { %5372 = vrot.lane.b32.xlu0 %v5349_v17, %s6537_s15  ;;  %s6354_s15 = sshll.u32 %s6519_s21, 4  ;;  %s5391_s21 = scalar_lea.sflag [#allocation4], %s338_s12 }
 0x3c1   : > { %s5405_s16 = sadd.s32 %s6355_s30, %s6354_s15 }
 0x3c2   : > { %s6356_s8 = sshll.u32 %s5405_s16, 3  ;;  %s6461_s16 = scalar_lea.hbm %s8278_s5, 1024 }
 0x3c3   : > { %s5407_s13 = scalar_lea.hbm %s8278_s5, %s6356_s8 }
 0x3c4   : > { %s5410_s17 = sshll.u32 %s5407_s13, 4  ;;  %s5411_s17 = int_to_ptr.hbm [resolvable:$true] %s5410_s17 }
 0x3c5   : > { %s6455_s22 = sshra.s32 %s5411_s17, 4  ;;  %s6456_s22 = int_to_ptr.hbm [resolvable:$true] %s6455_s22 }
 0x3c6   : > { %s6457_s10 = scalar_lea.hbm %s6456_s22, 128  ;;  %p6462_p6 = scmp.lt.s32.totalorder %s6456_s22, %s8278_s5 }
 0x3c7   : > { %p6458_p2 = scmp.ne.s32.totalorder %s6456_s22, %s6457_s10  ;;  %p6463_p7 = scmp.lt.s32.totalorder %s6461_s16, %s6457_s10 }
 0x3c9   : > { %p6459_p4 = pnand %p6458_p2, %p6621_p3  ;;  %p6464_p9 = por %p6463_p7, %p6462_p6 }
 0x3cb   : > { %p6460_p5 = pneg %p6459_p4 }
 0x3cd   : > { %p6465_p10 = pnand %p6464_p9, %p6460_p5 }
 0x3e2   : > { %v5359_v54 = vpop.permute.xlu2 %5358 }
 0x3e3   : > { %6345 = vst.msk [vmem:[%s7187_s27 + $0x8] sm:$0xff] %vm2881_vm2, %v5359_v54 }
 0x3fa   : > { %v5365_v9 = vpop.permute.xlu2 %5364 }
 0x3fb   : > { %6348 = vst.msk [vmem:[%s7187_s27 + $0x38] sm:$0xff] %vm2881_vm2, %v5365_v9 }
 0x402   : > { %v5361_v55 = vpop.permute.xlu0 %5360 }
 0x403   : > { %6346 = vst.msk [vmem:[%s7187_s27 + $0x18] sm:$0xff] %vm2881_vm2, %v5361_v55 }
 0x40a   : > { %v5363_v56 = vpop.permute.xlu1 %5362 }
 0x40b   : > { %6347 = vst.msk [vmem:[%s7187_s27 + $0x28] sm:$0xff] %vm2881_vm2, %v5363_v56 }
 0x412   : > { %v5371_v57 = vpop.permute.xlu2 %5370 }
 0x413   : > { %6351 = vst.msk [vmem:[%s7187_s27 + $0x68] sm:$0xff] %vm2881_vm2, %v5371_v57 }
 0x41a   : > { %v5367_v58 = vpop.permute.xlu0 %5366 }
 0x41b   : > { %6349 = vst.msk [vmem:[%s7187_s27 + $0x48] sm:$0xff] %vm2881_vm2, %v5367_v58 }
 0x422   : > { %v5369_v59 = vpop.permute.xlu1 %5368 }
 0x423   : > { %6350 = vst.msk [vmem:[%s7187_s27 + $0x58] sm:$0xff] %vm2881_vm2, %v5369_v59 }
 0x432   : > { %v5373_v33 = vpop.permute.xlu0 %5372 }
 0x433   : > { %6352 = vst.msk [vmem:[%s7187_s27 + $0x78] sm:$0xff] %vm2881_vm2, %v5373_v33 }
 0x434   : > { %6468 = shalt.err (!%p6465_p10)
}
 0x435   : > { %s6538_s12 = smov 128   ;;  %s6539_s27 = smov 8  }
 0x436   : > { %6363 = dma.vmem_to_hbm [thread:$0]  (%p6621_p3), %s5409_s26, 2048, %s5411_s17, %s5391_s21, %s6538_s12, %s6538_s12, %s6539_s27  }
 0x437 PF: > { %p6369_p11 = scmp.ge.s32.totalorder %s6535_s25, 2  ;;  %s5425_s9 = sand.u32 1, %s6507_s18  }
 0x438   : > { %s5426_s13 = scalar_lea.sflag [#allocation4], %s5425_s9 }
 0x439   : > { %p6366_p12 = pnand %p6369_p11, %p6630_p8 }
 0x43b   : > { %p6367_p13 = pneg %p6366_p12 }
 0x43d   : > { %6502 = dma.done.wait (%p6367_p13), %s5426_s13, 2048  }
 0x43e   : > { %6504 = vsyncadd (%p6367_p13), %s5426_s13, 4294965248  ;;  %s18_s25 = sadd.s32 1, %s6535_s25   ;;  %s8281_s18 = smov %s6511_s19 }
 0x43f   : > { %p15_p0 = scmp.ge.s32.totalorder %s18_s25, 10   ;;  %s8282_s19 = smov %s6515_s20 }
 0x440   : > { %s8283_s20 = smov %s6639_s11  ;;  %s8284_s21 = smov %s6527_s23 }
 0x441   : > { %s8285_s22 = smov %s6531_s24  ;;  %s8286_s23 = smov %s8289_s28 }
 0x442   : > { %s8287_s24 = smov %s8293_s29  ;;  %17 = sbr.rel (!%p15_p0) target bundleno = 5 (0x5), region = 135 }
 0x447   :  { %5432 = vsyncpa [#allocation4], 1 }
 0x448   :  { %5434 = vsyncpa [#allocation4 + $0x1], 1 }

</bundles_post_ra>
